<compile_context>
chip_gen: v7x
topology: tpu7x:2x2x1
jax: 0.10.0
libtpu: 0.0.40
codegen_flags: <defaults>
</compile_context>

<pallas_src>
import jax
import jax.numpy as jnp
from jax.experimental import pallas as pl
from jax.experimental.pallas import tpu as pltpu


# ----------------------------- Pallas kernels ------------------------------

def _conv_fused_kernel(p1_ref, w1_ref, b1_ref, w2_ref, b2_ref, sel_ref,
                       o_ref, h1_scr):
    # p1_ref : (1, 26, 26, 9)  bf16   conv1 im2col of one image (tiny)
    # w1_ref : (9, 32)         bf16   conv1 weights (tap, cout)
    # b1_ref : (1, 32)         f32
    # w2_ref : (9, 32, 64)     bf16   conv2 weights (tap, cin, cout)
    # b2_ref : (1, 64)         f32
    # sel_ref: (2, 12, 24)     f32    even / odd column-selection (W pooling)
    # o_ref  : (1, 12, 12, 64) bf16   pooled NHWC features of this image
    # h1_scr : VMEM (26, 26, 32) f32  conv1 activations (stay on-chip)

    # ---- conv1 + ReLU: one (26,9)@(9,32) matmul per output row ----
    @pl.loop(0, 26)
    def _(y):
        r = jnp.dot(p1_ref[0, y], w1_ref[...],
                    preferred_element_type=jnp.float32)          # (26, 32)
        h1_scr[y] = jnp.maximum(r + b1_ref[...], 0.0)

    sel_e = sel_ref[0]                                            # (12, 24)
    sel_o = sel_ref[1]                                            # (12, 24)
    b2 = b2_ref[...]                                              # (1, 64)

    # ---- conv2 + ReLU + 2x2 max-pool: one pooled output row per step ----
    @pl.loop(0, 12)
    def _(i):
        def h2_row(y):
            # in-kernel im2col: 9 shifted windows read straight from VMEM
            acc = jnp.zeros((24, 64), jnp.float32)
            for t in range(9):
                dy, dx = t // 3, t % 3
                lhs = h1_scr[y + dy, pl.ds(dx, 24), :].astype(jnp.bfloat16)
                acc = acc + jnp.dot(lhs, w2_ref[t],
                                    preferred_element_type=jnp.float32)
            return jnp.maximum(acc + b2, 0.0)                     # (24, 64)

        # max over the two H rows of the pool window
        hm = jnp.maximum(h2_row(2 * i), h2_row(2 * i + 1))        # (24, 64)
        # max over the two W columns via 0/1 selection matmuls (exact)
        pooled = jnp.maximum(
            jnp.dot(sel_e, hm, preferred_element_type=jnp.float32),
            jnp.dot(sel_o, hm, preferred_element_type=jnp.float32))  # (12, 64)
        o_ref[0, i] = pooled.astype(o_ref.dtype)


def _mlp_head_kernel(x_ref, w1_ref, b1_ref, w2_ref, b2_ref, o_ref):
    # x_ref : (tm, 9216) bf16        flattened pooled features (NHWC order)
    # w1_ref: (9216, 128) bf16       fc1 weight (rows pre-permuted at init)
    # b1_ref: (1, 128)   f32
    # w2_ref: (128, 128) bf16        fc2 weight padded 10 -> 128 lanes (zeros)
    # b2_ref: (1, 128)   f32         padded bias = -1e30 on fake lanes
    # o_ref : (tm, 128)  f32         lane-dense log_softmax output
    h = jnp.dot(x_ref[...], w1_ref[...], preferred_element_type=jnp.float32)
    h = jnp.maximum(h + b1_ref[...], 0.0)                         # fc1 + ReLU
    y = jnp.dot(h.astype(jnp.bfloat16), w2_ref[...],
                preferred_element_type=jnp.float32) + b2_ref[...]  # fc2
    m = jnp.max(y, axis=-1, keepdims=True)                        # padded lanes
    s = y - m                                                     # never win max
    lse = jnp.log(jnp.sum(jnp.exp(s), axis=-1, keepdims=True))    # exp(pad)=0
    o_ref[...] = s - lse


# ------------------------------ kernel wrappers -----------------------------

def conv_stack(x_nchw, params):
    # x_nchw: (N, 1, 28, 28) f32 -> (N, 9216) bf16 pooled features (NHWC order)
    N = x_nchw.shape[0]
    x = x_nchw[:, 0]                                              # (N, 28, 28)
    # conv1 im2col outside the kernel: only a 9x blow-up of a 3 KB/image input.
    cols = [x[:, dy:dy + 26, dx:dx + 26]
            for dy in range(3) for dx in range(3)]
    p1 = jnp.stack(cols, axis=-1).astype(jnp.bfloat16)            # (N,26,26,9)

    pooled = pl.pallas_call(
        _conv_fused_kernel,
        out_shape=jax.ShapeDtypeStruct((N, 12, 12, 64), jnp.bfloat16),
        grid_spec=pltpu.PrefetchScalarGridSpec(
            num_scalar_prefetch=0,
            grid=(N,),
            in_specs=[
                pl.BlockSpec((1, 26, 26, 9), lambda n: (n, 0, 0, 0)),
                pl.BlockSpec((9, 32), lambda n: (0, 0)),          # resident
                pl.BlockSpec((1, 32), lambda n: (0, 0)),
                pl.BlockSpec((9, 32, 64), lambda n: (0, 0, 0)),   # resident
                pl.BlockSpec((1, 64), lambda n: (0, 0)),
                pl.BlockSpec((2, 12, 24), lambda n: (0, 0, 0)),
            ],
            out_specs=pl.BlockSpec((1, 12, 12, 64), lambda n: (n, 0, 0, 0)),
            scratch_shapes=[pltpu.VMEM((26, 26, 32), jnp.float32)]),
        compiler_params=pltpu.CompilerParams(
            dimension_semantics=("parallel",)),
    )(p1, params["w1k"], params["b1"], params["w2k"], params["b2"],
      params["sel"])

    # NHWC flatten is a plain reshape; fc1 weight rows were permuted at init.
    return pooled.reshape(N, 9216)


def mlp_head(xf, w1p, b1, w2p, b2p):
    # xf: (M, 9216) bf16 -> log_softmax logits (M, 10) f32
    M = xf.shape[0]
    if M <= 512:
        tm = M                                       # block == full dim is legal
    else:
        tm = 512                                     # multiple of 8 sublanes
        pad = (-M) % tm
        if pad:
            xf = jnp.pad(xf, ((0, pad), (0, 0)))
    Mp = xf.shape[0]

    out = pl.pallas_call(
        _mlp_head_kernel,
        out_shape=jax.ShapeDtypeStruct((Mp, 128), jnp.float32),
        grid_spec=pltpu.PrefetchScalarGridSpec(
            num_scalar_prefetch=0,
            grid=(Mp // tm,),
            in_specs=[
                pl.BlockSpec((tm, 9216), lambda i: (i, 0)),
                pl.BlockSpec((9216, 128), lambda i: (0, 0)),      # resident
                pl.BlockSpec((1, 128), lambda i: (0, 0)),
                pl.BlockSpec((128, 128), lambda i: (0, 0)),       # resident
                pl.BlockSpec((1, 128), lambda i: (0, 0)),
            ],
            out_specs=pl.BlockSpec((tm, 128), lambda i: (i, 0))),
        compiler_params=pltpu.CompilerParams(
            dimension_semantics=("parallel",),
            vmem_limit_bytes=48 * 1024 * 1024),
    )(xf, w1p, b1, w2p, b2p)
    return out[:M, :10]                              # drop padded rows / lanes


# --------------------------------- params -----------------------------------

def init_params(key):
    # Deterministic synthetic parameters matching nn.Module shapes:
    #   conv1: (32,1,3,3)  conv2: (64,32,3,3)  fc1: (128,9216)  fc2: (10,128)
    ks = jax.random.split(key, 8)

    def u(k, shape, fan_in):
        bound = 1.0 / (fan_in ** 0.5)
        return jax.random.uniform(k, shape, jnp.float32, -bound, bound)

    w1 = u(ks[0], (32, 1, 3, 3), 9)
    b1 = u(ks[1], (32,), 9)
    w2 = u(ks[2], (64, 32, 3, 3), 288)
    b2 = u(ks[3], (64,), 288)
    wf1 = u(ks[4], (128, 9216), 9216)
    bf1 = u(ks[5], (128,), 9216)
    wf2 = u(ks[6], (10, 128), 128)
    bf2 = u(ks[7], (10,), 128)

    # conv weights in (tap = dy*3+dx, cin, cout) im2col order, bf16 for the MXU.
    w1k = jnp.transpose(w1, (2, 3, 1, 0)).reshape(9, 32).astype(jnp.bfloat16)
    w2k = jnp.transpose(w2, (2, 3, 1, 0)).reshape(9, 32, 64).astype(jnp.bfloat16)

    # fc1: permute K rows from PyTorch's NCHW-flatten order (c*144 + h*12 + w)
    # to the kernel's NHWC-flatten order (h*768 + w*64 + c), one-time at init.
    k = jnp.arange(9216)
    c = k % 64
    hw = k // 64
    w_, h_ = hw % 12, hw // 12
    perm = c * 144 + h_ * 12 + w_
    wf1p = wf1.T[perm, :].astype(jnp.bfloat16)                    # (9216, 128)

    # fc2: pad 10 -> 128 output lanes. Padded weight cols are 0 and padded bias
    # is -1e30, so exp(pad)=0 and the row max is a real logit -> log_softmax of
    # the first 10 columns is exactly the unpadded result.
    wf2p = jnp.zeros((128, 128), jnp.float32).at[:, :10].set(wf2.T)
    wf2p = wf2p.astype(jnp.bfloat16)
    bf2p = jnp.full((1, 128), -1e30, jnp.float32).at[0, :10].set(bf2)

    # 2x2 max-pool column selection matrices (even / odd W columns).
    j = jnp.arange(12)[:, None]
    w = jnp.arange(24)[None, :]
    sel = jnp.stack([(w == 2 * j).astype(jnp.float32),
                     (w == 2 * j + 1).astype(jnp.float32)])        # (2, 12, 24)

    return {
        "w1k": w1k, "b1": b1.reshape(1, 32),
        "w2k": w2k, "b2": b2.reshape(1, 64),
        "wf1": wf1p, "bf1": bf1.reshape(1, 128),
        "wf2p": wf2p, "bf2p": bf2p,
        "sel": sel,
    }


# --------------------------------- forward ----------------------------------

def net_forward(x_nchw, params):
    # conv1 -> relu -> conv2 -> relu -> maxpool(2)   (fused, grid over batch)
    feats = conv_stack(x_nchw, params)                             # (N, 9216)
    # dropout1 / dropout2: identity (eval mode)
    # flatten -> fc1 -> relu -> fc2 -> log_softmax   (fused, weights resident)
    return mlp_head(feats, params["wf1"], params["bf1"],
                    params["wf2p"], params["bf2p"])                # (N, 10)


if __name__ == "__main__":
    key = jax.random.PRNGKey(0)
    k_x, k_p = jax.random.split(key)

    # MNIST-shaped input (batch=2, 1 channel, 28x28) — required by fc1's 9216.
    x = jax.random.normal(k_x, (2, 1, 28, 28), dtype=jnp.float32)
    params = init_params(k_p)

    out = jax.jit(net_forward)(x, params)
    out = jax.block_until_ready(out)

    assert out.shape == (2, 10) and out.dtype == jnp.float32
    # log_softmax sanity: each row's probabilities sum to ~1
    assert bool(jnp.all(jnp.abs(jnp.sum(jnp.exp(out), axis=1) - 1.0) < 1e-3))

    print("KERNEL_OK")
</pallas_src>

<mosaic_0001>
module attributes {stable_mosaic.version = 11 : i64} {
  func.func @_conv_fused_kernel(%arg0: i32, %arg1: memref<1x26x26x9xbf16, #tpu.memory_space<vmem>>, %arg2: memref<9x32xbf16, #tpu.memory_space<vmem>>, %arg3: memref<1x32xf32, #tpu.memory_space<vmem>>, %arg4: memref<9x32x64xbf16, #tpu.memory_space<vmem>>, %arg5: memref<1x64xf32, #tpu.memory_space<vmem>>, %arg6: memref<2x12x24xf32, #tpu.memory_space<vmem>>, %arg7: memref<1x12x12x64xbf16, #tpu.memory_space<vmem>>, %arg8: memref<26x26x32xf32, #tpu.memory_space<vmem>>) attributes {dimension_semantics = [#tpu.dimension_semantics<parallel>], iteration_bounds = array<i64: 2>, scalar_prefetch = 0 : i64, scratch_operands = 1 : i64, tpu.core_type = #tpu.core_type<tc>, window_params = [{transform_indices = @transform_0, window_bounds = array<i64: 1, 26, 26, 9>}, {pipeline_mode = #tpu.pipeline_mode<synchronous>, transform_indices = @transform_1, window_bounds = array<i64: 9, 32>}, {pipeline_mode = #tpu.pipeline_mode<synchronous>, transform_indices = @transform_2, window_bounds = array<i64: 1, 32>}, {pipeline_mode = #tpu.pipeline_mode<synchronous>, transform_indices = @transform_3, window_bounds = array<i64: 9, 32, 64>}, {pipeline_mode = #tpu.pipeline_mode<synchronous>, transform_indices = @transform_4, window_bounds = array<i64: 1, 64>}, {pipeline_mode = #tpu.pipeline_mode<synchronous>, transform_indices = @transform_5, window_bounds = array<i64: 2, 12, 24>}, {transform_indices = @transform_6, window_bounds = array<i64: 1, 12, 12, 64>}]} {
    %c0_i32 = arith.constant 0 : i32
    %c26_i32 = arith.constant 26 : i32
    %0 = arith.addi %c0_i32, %c26_i32 : i32
    %c1_i32 = arith.constant 1 : i32
    scf.for %arg9 = %c0_i32 to %0 step %c1_i32  : i32 {
      %c1_i32_10 = arith.constant 1 : i32
      %7 = arith.muli %arg9, %c1_i32_10 : i32
      %c0_i32_11 = arith.constant 0 : i32
      %8 = arith.addi %c0_i32_11, %7 : i32
      %c0_12 = arith.constant 0 : index
      %9 = arith.index_cast %8 : i32 to index
      %c0_13 = arith.constant 0 : index
      %c0_14 = arith.constant 0 : index
      %10 = vector.load %arg1[%c0_12, %9, %c0_13, %c0_14] : memref<1x26x26x9xbf16, #tpu.memory_space<vmem>>, vector<1x1x26x9xbf16>
      %11 = vector.shape_cast %10 : vector<1x1x26x9xbf16> to vector<26x9xbf16>
      %c0_15 = arith.constant 0 : index
      %c0_16 = arith.constant 0 : index
      %12 = vector.load %arg2[%c0_15, %c0_16] : memref<9x32xbf16, #tpu.memory_space<vmem>>, vector<9x32xbf16>
      %cst = arith.constant dense<0.000000e+00> : vector<26x32xf32>
      %13 = tpu.matmul %11, %12, %cst {dimension_numbers = #tpu.dot_dimension_numbers<[1], [0], [0], [1], [0, 0, 1, 1], [], []>} : vector<26x9xbf16>, vector<9x32xbf16>, vector<26x32xf32> -> vector<26x32xf32>
      %c0_17 = arith.constant 0 : index
      %c0_18 = arith.constant 0 : index
      %14 = vector.load %arg3[%c0_17, %c0_18] : memref<1x32xf32, #tpu.memory_space<vmem>>, vector<1x32xf32>
      %15 = vector.broadcast %14 : vector<1x32xf32> to vector<26x32xf32>
      %16 = arith.addf %13, %15 : vector<26x32xf32>
      %cst_19 = arith.constant 0.000000e+00 : f32
      %17 = vector.broadcast %cst_19 : f32 to vector<26x32xf32>
      %18 = arith.maximumf %16, %17 : vector<26x32xf32>
      %19 = arith.index_cast %8 : i32 to index
      %c0_20 = arith.constant 0 : index
      %c0_21 = arith.constant 0 : index
      %20 = vector.load %arg8[%19, %c0_20, %c0_21] : memref<26x26x32xf32, #tpu.memory_space<vmem>>, vector<1x26x32xf32>
      %21 = vector.shape_cast %20 : vector<1x26x32xf32> to vector<26x32xf32>
      %22 = vector.shape_cast %18 : vector<26x32xf32> to vector<1x26x32xf32>
      tpu.vector_store %arg8[%19, %c0_20, %c0_21], %22 {strides = array<i32>} : memref<26x26x32xf32, #tpu.memory_space<vmem>>, vector<1x26x32xf32>,
    }
    %c26_i32_0 = arith.constant 26 : i32
    %c0 = arith.constant 0 : index
    %c0_1 = arith.constant 0 : index
    %c0_2 = arith.constant 0 : index
    %1 = vector.load %arg6[%c0, %c0_1, %c0_2] : memref<2x12x24xf32, #tpu.memory_space<vmem>>, vector<1x12x24xf32>
    %2 = vector.shape_cast %1 : vector<1x12x24xf32> to vector<12x24xf32>
    %c1 = arith.constant 1 : index
    %c0_3 = arith.constant 0 : index
    %c0_4 = arith.constant 0 : index
    %3 = vector.load %arg6[%c1, %c0_3, %c0_4] : memref<2x12x24xf32, #tpu.memory_space<vmem>>, vector<1x12x24xf32>
    %4 = vector.shape_cast %3 : vector<1x12x24xf32> to vector<12x24xf32>
    %c0_5 = arith.constant 0 : index
    %c0_6 = arith.constant 0 : index
    %5 = vector.load %arg5[%c0_5, %c0_6] : memref<1x64xf32, #tpu.memory_space<vmem>>, vector<1x64xf32>
    %c0_i32_7 = arith.constant 0 : i32
    %c12_i32 = arith.constant 12 : i32
    %6 = arith.addi %c0_i32_7, %c12_i32 : i32
    %c1_i32_8 = arith.constant 1 : i32
    scf.for %arg9 = %c0_i32_7 to %6 step %c1_i32_8  : i32 {
      %c1_i32_10 = arith.constant 1 : i32
      %7 = arith.muli %arg9, %c1_i32_10 : i32
      %c0_i32_11 = arith.constant 0 : i32
      %8 = arith.addi %c0_i32_11, %7 : i32
      %c2_i32 = arith.constant 2 : i32
      %9 = arith.muli %c2_i32, %8 : i32
      %cst = arith.constant 0.000000e+00 : f32
      %10 = vector.broadcast %cst : f32 to vector<24x64xf32>
      %c0_i32_12 = arith.constant 0 : i32
      %11 = arith.addi %9, %c0_i32_12 : i32
      %12 = arith.index_cast %11 : i32 to index
      %c0_13 = arith.constant 0 : index
      %c0_14 = arith.constant 0 : index
      %13 = vector.load %arg8[%12, %c0_13, %c0_14] : memref<26x26x32xf32, #tpu.memory_space<vmem>>, vector<1x24x32xf32>
      %14 = vector.shape_cast %13 : vector<1x24x32xf32> to vector<24x32xf32>
      %15 = arith.truncf %14 : vector<24x32xf32> to vector<24x32xbf16>
      %c0_15 = arith.constant 0 : index
      %c0_16 = arith.constant 0 : index
      %c0_17 = arith.constant 0 : index
      %16 = vector.load %arg4[%c0_15, %c0_16, %c0_17] : memref<9x32x64xbf16, #tpu.memory_space<vmem>>, vector<1x32x64xbf16>
      %17 = vector.shape_cast %16 : vector<1x32x64xbf16> to vector<32x64xbf16>
      %cst_18 = arith.constant dense<0.000000e+00> : vector<24x64xf32>
      %18 = tpu.matmul %15, %17, %cst_18 {dimension_numbers = #tpu.dot_dimension_numbers<[1], [0], [0], [1], [0, 0, 1, 1], [], []>} : vector<24x32xbf16>, vector<32x64xbf16>, vector<24x64xf32> -> vector<24x64xf32>
      %19 = arith.addf %10, %18 : vector<24x64xf32>
      %c0_i32_19 = arith.constant 0 : i32
      %20 = arith.addi %9, %c0_i32_19 : i32
      %21 = arith.index_cast %20 : i32 to index
      %c1_20 = arith.constant 1 : index
      %c0_21 = arith.constant 0 : index
      %22 = vector.load %arg8[%21, %c1_20, %c0_21] : memref<26x26x32xf32, #tpu.memory_space<vmem>>, vector<1x24x32xf32>
      %23 = vector.shape_cast %22 : vector<1x24x32xf32> to vector<24x32xf32>
      %24 = arith.truncf %23 : vector<24x32xf32> to vector<24x32xbf16>
      %c1_22 = arith.constant 1 : index
      %c0_23 = arith.constant 0 : index
      %c0_24 = arith.constant 0 : index
      %25 = vector.load %arg4[%c1_22, %c0_23, %c0_24] : memref<9x32x64xbf16, #tpu.memory_space<vmem>>, vector<1x32x64xbf16>
      %26 = vector.shape_cast %25 : vector<1x32x64xbf16> to vector<32x64xbf16>
      %cst_25 = arith.constant dense<0.000000e+00> : vector<24x64xf32>
      %27 = tpu.matmul %24, %26, %cst_25 {dimension_numbers = #tpu.dot_dimension_numbers<[1], [0], [0], [1], [0, 0, 1, 1], [], []>} : vector<24x32xbf16>, vector<32x64xbf16>, vector<24x64xf32> -> vector<24x64xf32>
      %28 = arith.addf %19, %27 : vector<24x64xf32>
      %c0_i32_26 = arith.constant 0 : i32
      %29 = arith.addi %9, %c0_i32_26 : i32
      %30 = arith.index_cast %29 : i32 to index
      %c2 = arith.constant 2 : index
      %c0_27 = arith.constant 0 : index
      %31 = vector.load %arg8[%30, %c2, %c0_27] : memref<26x26x32xf32, #tpu.memory_space<vmem>>, vector<1x24x32xf32>
      %32 = vector.shape_cast %31 : vector<1x24x32xf32> to vector<24x32xf32>
      %33 = arith.truncf %32 : vector<24x32xf32> to vector<24x32xbf16>
      %c2_28 = arith.constant 2 : index
      %c0_29 = arith.constant 0 : index
      %c0_30 = arith.constant 0 : index
      %34 = vector.load %arg4[%c2_28, %c0_29, %c0_30] : memref<9x32x64xbf16, #tpu.memory_space<vmem>>, vector<1x32x64xbf16>
      %35 = vector.shape_cast %34 : vector<1x32x64xbf16> to vector<32x64xbf16>
      %cst_31 = arith.constant dense<0.000000e+00> : vector<24x64xf32>
      %36 = tpu.matmul %33, %35, %cst_31 {dimension_numbers = #tpu.dot_dimension_numbers<[1], [0], [0], [1], [0, 0, 1, 1], [], []>} : vector<24x32xbf16>, vector<32x64xbf16>, vector<24x64xf32> -> vector<24x64xf32>
      %37 = arith.addf %28, %36 : vector<24x64xf32>
      %c1_i32_32 = arith.constant 1 : i32
      %38 = arith.addi %9, %c1_i32_32 : i32
      %39 = arith.index_cast %38 : i32 to index
      %c0_33 = arith.constant 0 : index
      %c0_34 = arith.constant 0 : index
      %40 = vector.load %arg8[%39, %c0_33, %c0_34] : memref<26x26x32xf32, #tpu.memory_space<vmem>>, vector<1x24x32xf32>
      %41 = vector.shape_cast %40 : vector<1x24x32xf32> to vector<24x32xf32>
      %42 = arith.truncf %41 : vector<24x32xf32> to vector<24x32xbf16>
      %c3 = arith.constant 3 : index
      %c0_35 = arith.constant 0 : index
      %c0_36 = arith.constant 0 : index
      %43 = vector.load %arg4[%c3, %c0_35, %c0_36] : memref<9x32x64xbf16, #tpu.memory_space<vmem>>, vector<1x32x64xbf16>
      %44 = vector.shape_cast %43 : vector<1x32x64xbf16> to vector<32x64xbf16>
      %cst_37 = arith.constant dense<0.000000e+00> : vector<24x64xf32>
      %45 = tpu.matmul %42, %44, %cst_37 {dimension_numbers = #tpu.dot_dimension_numbers<[1], [0], [0], [1], [0, 0, 1, 1], [], []>} : vector<24x32xbf16>, vector<32x64xbf16>, vector<24x64xf32> -> vector<24x64xf32>
      %46 = arith.addf %37, %45 : vector<24x64xf32>
      %c1_i32_38 = arith.constant 1 : i32
      %47 = arith.addi %9, %c1_i32_38 : i32
      %48 = arith.index_cast %47 : i32 to index
      %c1_39 = arith.constant 1 : index
      %c0_40 = arith.constant 0 : index
      %49 = vector.load %arg8[%48, %c1_39, %c0_40] : memref<26x26x32xf32, #tpu.memory_space<vmem>>, vector<1x24x32xf32>
      %50 = vector.shape_cast %49 : vector<1x24x32xf32> to vector<24x32xf32>
      %51 = arith.truncf %50 : vector<24x32xf32> to vector<24x32xbf16>
      %c4 = arith.constant 4 : index
      %c0_41 = arith.constant 0 : index
      %c0_42 = arith.constant 0 : index
      %52 = vector.load %arg4[%c4, %c0_41, %c0_42] : memref<9x32x64xbf16, #tpu.memory_space<vmem>>, vector<1x32x64xbf16>
      %53 = vector.shape_cast %52 : vector<1x32x64xbf16> to vector<32x64xbf16>
      %cst_43 = arith.constant dense<0.000000e+00> : vector<24x64xf32>
      %54 = tpu.matmul %51, %53, %cst_43 {dimension_numbers = #tpu.dot_dimension_numbers<[1], [0], [0], [1], [0, 0, 1, 1], [], []>} : vector<24x32xbf16>, vector<32x64xbf16>, vector<24x64xf32> -> vector<24x64xf32>
      %55 = arith.addf %46, %54 : vector<24x64xf32>
      %c1_i32_44 = arith.constant 1 : i32
      %56 = arith.addi %9, %c1_i32_44 : i32
      %57 = arith.index_cast %56 : i32 to index
      %c2_45 = arith.constant 2 : index
      %c0_46 = arith.constant 0 : index
      %58 = vector.load %arg8[%57, %c2_45, %c0_46] : memref<26x26x32xf32, #tpu.memory_space<vmem>>, vector<1x24x32xf32>
      %59 = vector.shape_cast %58 : vector<1x24x32xf32> to vector<24x32xf32>
      %60 = arith.truncf %59 : vector<24x32xf32> to vector<24x32xbf16>
      %c5 = arith.constant 5 : index
      %c0_47 = arith.constant 0 : index
      %c0_48 = arith.constant 0 : index
      %61 = vector.load %arg4[%c5, %c0_47, %c0_48] : memref<9x32x64xbf16, #tpu.memory_space<vmem>>, vector<1x32x64xbf16>
      %62 = vector.shape_cast %61 : vector<1x32x64xbf16> to vector<32x64xbf16>
      %cst_49 = arith.constant dense<0.000000e+00> : vector<24x64xf32>
      %63 = tpu.matmul %60, %62, %cst_49 {dimension_numbers = #tpu.dot_dimension_numbers<[1], [0], [0], [1], [0, 0, 1, 1], [], []>} : vector<24x32xbf16>, vector<32x64xbf16>, vector<24x64xf32> -> vector<24x64xf32>
      %64 = arith.addf %55, %63 : vector<24x64xf32>
      %c2_i32_50 = arith.constant 2 : i32
      %65 = arith.addi %9, %c2_i32_50 : i32
      %66 = arith.index_cast %65 : i32 to index
      %c0_51 = arith.constant 0 : index
      %c0_52 = arith.constant 0 : index
      %67 = vector.load %arg8[%66, %c0_51, %c0_52] : memref<26x26x32xf32, #tpu.memory_space<vmem>>, vector<1x24x32xf32>
      %68 = vector.shape_cast %67 : vector<1x24x32xf32> to vector<24x32xf32>
      %69 = arith.truncf %68 : vector<24x32xf32> to vector<24x32xbf16>
      %c6 = arith.constant 6 : index
      %c0_53 = arith.constant 0 : index
      %c0_54 = arith.constant 0 : index
      %70 = vector.load %arg4[%c6, %c0_53, %c0_54] : memref<9x32x64xbf16, #tpu.memory_space<vmem>>, vector<1x32x64xbf16>
      %71 = vector.shape_cast %70 : vector<1x32x64xbf16> to vector<32x64xbf16>
      %cst_55 = arith.constant dense<0.000000e+00> : vector<24x64xf32>
      %72 = tpu.matmul %69, %71, %cst_55 {dimension_numbers = #tpu.dot_dimension_numbers<[1], [0], [0], [1], [0, 0, 1, 1], [], []>} : vector<24x32xbf16>, vector<32x64xbf16>, vector<24x64xf32> -> vector<24x64xf32>
      %73 = arith.addf %64, %72 : vector<24x64xf32>
      %c2_i32_56 = arith.constant 2 : i32
      %74 = arith.addi %9, %c2_i32_56 : i32
      %75 = arith.index_cast %74 : i32 to index
      %c1_57 = arith.constant 1 : index
      %c0_58 = arith.constant 0 : index
      %76 = vector.load %arg8[%75, %c1_57, %c0_58] : memref<26x26x32xf32, #tpu.memory_space<vmem>>, vector<1x24x32xf32>
      %77 = vector.shape_cast %76 : vector<1x24x32xf32> to vector<24x32xf32>
      %78 = arith.truncf %77 : vector<24x32xf32> to vector<24x32xbf16>
      %c7 = arith.constant 7 : index
      %c0_59 = arith.constant 0 : index
      %c0_60 = arith.constant 0 : index
      %79 = vector.load %arg4[%c7, %c0_59, %c0_60] : memref<9x32x64xbf16, #tpu.memory_space<vmem>>, vector<1x32x64xbf16>
      %80 = vector.shape_cast %79 : vector<1x32x64xbf16> to vector<32x64xbf16>
      %cst_61 = arith.constant dense<0.000000e+00> : vector<24x64xf32>
      %81 = tpu.matmul %78, %80, %cst_61 {dimension_numbers = #tpu.dot_dimension_numbers<[1], [0], [0], [1], [0, 0, 1, 1], [], []>} : vector<24x32xbf16>, vector<32x64xbf16>, vector<24x64xf32> -> vector<24x64xf32>
      %82 = arith.addf %73, %81 : vector<24x64xf32>
      %c2_i32_62 = arith.constant 2 : i32
      %83 = arith.addi %9, %c2_i32_62 : i32
      %84 = arith.index_cast %83 : i32 to index
      %c2_63 = arith.constant 2 : index
      %c0_64 = arith.constant 0 : index
      %85 = vector.load %arg8[%84, %c2_63, %c0_64] : memref<26x26x32xf32, #tpu.memory_space<vmem>>, vector<1x24x32xf32>
      %86 = vector.shape_cast %85 : vector<1x24x32xf32> to vector<24x32xf32>
      %87 = arith.truncf %86 : vector<24x32xf32> to vector<24x32xbf16>
      %c8 = arith.constant 8 : index
      %c0_65 = arith.constant 0 : index
      %c0_66 = arith.constant 0 : index
      %88 = vector.load %arg4[%c8, %c0_65, %c0_66] : memref<9x32x64xbf16, #tpu.memory_space<vmem>>, vector<1x32x64xbf16>
      %89 = vector.shape_cast %88 : vector<1x32x64xbf16> to vector<32x64xbf16>
      %cst_67 = arith.constant dense<0.000000e+00> : vector<24x64xf32>
      %90 = tpu.matmul %87, %89, %cst_67 {dimension_numbers = #tpu.dot_dimension_numbers<[1], [0], [0], [1], [0, 0, 1, 1], [], []>} : vector<24x32xbf16>, vector<32x64xbf16>, vector<24x64xf32> -> vector<24x64xf32>
      %91 = arith.addf %82, %90 : vector<24x64xf32>
      %92 = vector.broadcast %5 : vector<1x64xf32> to vector<24x64xf32>
      %93 = arith.addf %91, %92 : vector<24x64xf32>
      %cst_68 = arith.constant 0.000000e+00 : f32
      %94 = vector.broadcast %cst_68 : f32 to vector<24x64xf32>
      %95 = arith.maximumf %93, %94 : vector<24x64xf32>
      %c2_i32_69 = arith.constant 2 : i32
      %96 = arith.muli %c2_i32_69, %8 : i32
      %c1_i32_70 = arith.constant 1 : i32
      %97 = arith.addi %96, %c1_i32_70 : i32
      %cst_71 = arith.constant 0.000000e+00 : f32
      %98 = vector.broadcast %cst_71 : f32 to vector<24x64xf32>
      %c0_i32_72 = arith.constant 0 : i32
      %99 = arith.addi %97, %c0_i32_72 : i32
      %100 = arith.index_cast %99 : i32 to index
      %c0_73 = arith.constant 0 : index
      %c0_74 = arith.constant 0 : index
      %101 = vector.load %arg8[%100, %c0_73, %c0_74] : memref<26x26x32xf32, #tpu.memory_space<vmem>>, vector<1x24x32xf32>
      %102 = vector.shape_cast %101 : vector<1x24x32xf32> to vector<24x32xf32>
      %103 = arith.truncf %102 : vector<24x32xf32> to vector<24x32xbf16>
      %c0_75 = arith.constant 0 : index
      %c0_76 = arith.constant 0 : index
      %c0_77 = arith.constant 0 : index
      %104 = vector.load %arg4[%c0_75, %c0_76, %c0_77] : memref<9x32x64xbf16, #tpu.memory_space<vmem>>, vector<1x32x64xbf16>
      %105 = vector.shape_cast %104 : vector<1x32x64xbf16> to vector<32x64xbf16>
      %cst_78 = arith.constant dense<0.000000e+00> : vector<24x64xf32>
      %106 = tpu.matmul %103, %105, %cst_78 {dimension_numbers = #tpu.dot_dimension_numbers<[1], [0], [0], [1], [0, 0, 1, 1], [], []>} : vector<24x32xbf16>, vector<32x64xbf16>, vector<24x64xf32> -> vector<24x64xf32>
      %107 = arith.addf %98, %106 : vector<24x64xf32>
      %c0_i32_79 = arith.constant 0 : i32
      %108 = arith.addi %97, %c0_i32_79 : i32
      %109 = arith.index_cast %108 : i32 to index
      %c1_80 = arith.constant 1 : index
      %c0_81 = arith.constant 0 : index
      %110 = vector.load %arg8[%109, %c1_80, %c0_81] : memref<26x26x32xf32, #tpu.memory_space<vmem>>, vector<1x24x32xf32>
      %111 = vector.shape_cast %110 : vector<1x24x32xf32> to vector<24x32xf32>
      %112 = arith.truncf %111 : vector<24x32xf32> to vector<24x32xbf16>
      %c1_82 = arith.constant 1 : index
      %c0_83 = arith.constant 0 : index
      %c0_84 = arith.constant 0 : index
      %113 = vector.load %arg4[%c1_82, %c0_83, %c0_84] : memref<9x32x64xbf16, #tpu.memory_space<vmem>>, vector<1x32x64xbf16>
      %114 = vector.shape_cast %113 : vector<1x32x64xbf16> to vector<32x64xbf16>
      %cst_85 = arith.constant dense<0.000000e+00> : vector<24x64xf32>
      %115 = tpu.matmul %112, %114, %cst_85 {dimension_numbers = #tpu.dot_dimension_numbers<[1], [0], [0], [1], [0, 0, 1, 1], [], []>} : vector<24x32xbf16>, vector<32x64xbf16>, vector<24x64xf32> -> vector<24x64xf32>
      %116 = arith.addf %107, %115 : vector<24x64xf32>
      %c0_i32_86 = arith.constant 0 : i32
      %117 = arith.addi %97, %c0_i32_86 : i32
      %118 = arith.index_cast %117 : i32 to index
      %c2_87 = arith.constant 2 : index
      %c0_88 = arith.constant 0 : index
      %119 = vector.load %arg8[%118, %c2_87, %c0_88] : memref<26x26x32xf32, #tpu.memory_space<vmem>>, vector<1x24x32xf32>
      %120 = vector.shape_cast %119 : vector<1x24x32xf32> to vector<24x32xf32>
      %121 = arith.truncf %120 : vector<24x32xf32> to vector<24x32xbf16>
      %c2_89 = arith.constant 2 : index
      %c0_90 = arith.constant 0 : index
      %c0_91 = arith.constant 0 : index
      %122 = vector.load %arg4[%c2_89, %c0_90, %c0_91] : memref<9x32x64xbf16, #tpu.memory_space<vmem>>, vector<1x32x64xbf16>
      %123 = vector.shape_cast %122 : vector<1x32x64xbf16> to vector<32x64xbf16>
      %cst_92 = arith.constant dense<0.000000e+00> : vector<24x64xf32>
      %124 = tpu.matmul %121, %123, %cst_92 {dimension_numbers = #tpu.dot_dimension_numbers<[1], [0], [0], [1], [0, 0, 1, 1], [], []>} : vector<24x32xbf16>, vector<32x64xbf16>, vector<24x64xf32> -> vector<24x64xf32>
      %125 = arith.addf %116, %124 : vector<24x64xf32>
      %c1_i32_93 = arith.constant 1 : i32
      %126 = arith.addi %97, %c1_i32_93 : i32
      %127 = arith.index_cast %126 : i32 to index
      %c0_94 = arith.constant 0 : index
      %c0_95 = arith.constant 0 : index
      %128 = vector.load %arg8[%127, %c0_94, %c0_95] : memref<26x26x32xf32, #tpu.memory_space<vmem>>, vector<1x24x32xf32>
      %129 = vector.shape_cast %128 : vector<1x24x32xf32> to vector<24x32xf32>
      %130 = arith.truncf %129 : vector<24x32xf32> to vector<24x32xbf16>
      %c3_96 = arith.constant 3 : index
      %c0_97 = arith.constant 0 : index
      %c0_98 = arith.constant 0 : index
      %131 = vector.load %arg4[%c3_96, %c0_97, %c0_98] : memref<9x32x64xbf16, #tpu.memory_space<vmem>>, vector<1x32x64xbf16>
      %132 = vector.shape_cast %131 : vector<1x32x64xbf16> to vector<32x64xbf16>
      %cst_99 = arith.constant dense<0.000000e+00> : vector<24x64xf32>
      %133 = tpu.matmul %130, %132, %cst_99 {dimension_numbers = #tpu.dot_dimension_numbers<[1], [0], [0], [1], [0, 0, 1, 1], [], []>} : vector<24x32xbf16>, vector<32x64xbf16>, vector<24x64xf32> -> vector<24x64xf32>
      %134 = arith.addf %125, %133 : vector<24x64xf32>
      %c1_i32_100 = arith.constant 1 : i32
      %135 = arith.addi %97, %c1_i32_100 : i32
      %136 = arith.index_cast %135 : i32 to index
      %c1_101 = arith.constant 1 : index
      %c0_102 = arith.constant 0 : index
      %137 = vector.load %arg8[%136, %c1_101, %c0_102] : memref<26x26x32xf32, #tpu.memory_space<vmem>>, vector<1x24x32xf32>
      %138 = vector.shape_cast %137 : vector<1x24x32xf32> to vector<24x32xf32>
      %139 = arith.truncf %138 : vector<24x32xf32> to vector<24x32xbf16>
      %c4_103 = arith.constant 4 : index
      %c0_104 = arith.constant 0 : index
      %c0_105 = arith.constant 0 : index
      %140 = vector.load %arg4[%c4_103, %c0_104, %c0_105] : memref<9x32x64xbf16, #tpu.memory_space<vmem>>, vector<1x32x64xbf16>
      %141 = vector.shape_cast %140 : vector<1x32x64xbf16> to vector<32x64xbf16>
      %cst_106 = arith.constant dense<0.000000e+00> : vector<24x64xf32>
      %142 = tpu.matmul %139, %141, %cst_106 {dimension_numbers = #tpu.dot_dimension_numbers<[1], [0], [0], [1], [0, 0, 1, 1], [], []>} : vector<24x32xbf16>, vector<32x64xbf16>, vector<24x64xf32> -> vector<24x64xf32>
      %143 = arith.addf %134, %142 : vector<24x64xf32>
      %c1_i32_107 = arith.constant 1 : i32
      %144 = arith.addi %97, %c1_i32_107 : i32
      %145 = arith.index_cast %144 : i32 to index
      %c2_108 = arith.constant 2 : index
      %c0_109 = arith.constant 0 : index
      %146 = vector.load %arg8[%145, %c2_108, %c0_109] : memref<26x26x32xf32, #tpu.memory_space<vmem>>, vector<1x24x32xf32>
      %147 = vector.shape_cast %146 : vector<1x24x32xf32> to vector<24x32xf32>
      %148 = arith.truncf %147 : vector<24x32xf32> to vector<24x32xbf16>
      %c5_110 = arith.constant 5 : index
      %c0_111 = arith.constant 0 : index
      %c0_112 = arith.constant 0 : index
      %149 = vector.load %arg4[%c5_110, %c0_111, %c0_112] : memref<9x32x64xbf16, #tpu.memory_space<vmem>>, vector<1x32x64xbf16>
      %150 = vector.shape_cast %149 : vector<1x32x64xbf16> to vector<32x64xbf16>
      %cst_113 = arith.constant dense<0.000000e+00> : vector<24x64xf32>
      %151 = tpu.matmul %148, %150, %cst_113 {dimension_numbers = #tpu.dot_dimension_numbers<[1], [0], [0], [1], [0, 0, 1, 1], [], []>} : vector<24x32xbf16>, vector<32x64xbf16>, vector<24x64xf32> -> vector<24x64xf32>
      %152 = arith.addf %143, %151 : vector<24x64xf32>
      %c2_i32_114 = arith.constant 2 : i32
      %153 = arith.addi %97, %c2_i32_114 : i32
      %154 = arith.index_cast %153 : i32 to index
      %c0_115 = arith.constant 0 : index
      %c0_116 = arith.constant 0 : index
      %155 = vector.load %arg8[%154, %c0_115, %c0_116] : memref<26x26x32xf32, #tpu.memory_space<vmem>>, vector<1x24x32xf32>
      %156 = vector.shape_cast %155 : vector<1x24x32xf32> to vector<24x32xf32>
      %157 = arith.truncf %156 : vector<24x32xf32> to vector<24x32xbf16>
      %c6_117 = arith.constant 6 : index
      %c0_118 = arith.constant 0 : index
      %c0_119 = arith.constant 0 : index
      %158 = vector.load %arg4[%c6_117, %c0_118, %c0_119] : memref<9x32x64xbf16, #tpu.memory_space<vmem>>, vector<1x32x64xbf16>
      %159 = vector.shape_cast %158 : vector<1x32x64xbf16> to vector<32x64xbf16>
      %cst_120 = arith.constant dense<0.000000e+00> : vector<24x64xf32>
      %160 = tpu.matmul %157, %159, %cst_120 {dimension_numbers = #tpu.dot_dimension_numbers<[1], [0], [0], [1], [0, 0, 1, 1], [], []>} : vector<24x32xbf16>, vector<32x64xbf16>, vector<24x64xf32> -> vector<24x64xf32>
      %161 = arith.addf %152, %160 : vector<24x64xf32>
      %c2_i32_121 = arith.constant 2 : i32
      %162 = arith.addi %97, %c2_i32_121 : i32
      %163 = arith.index_cast %162 : i32 to index
      %c1_122 = arith.constant 1 : index
      %c0_123 = arith.constant 0 : index
      %164 = vector.load %arg8[%163, %c1_122, %c0_123] : memref<26x26x32xf32, #tpu.memory_space<vmem>>, vector<1x24x32xf32>
      %165 = vector.shape_cast %164 : vector<1x24x32xf32> to vector<24x32xf32>
      %166 = arith.truncf %165 : vector<24x32xf32> to vector<24x32xbf16>
      %c7_124 = arith.constant 7 : index
      %c0_125 = arith.constant 0 : index
      %c0_126 = arith.constant 0 : index
      %167 = vector.load %arg4[%c7_124, %c0_125, %c0_126] : memref<9x32x64xbf16, #tpu.memory_space<vmem>>, vector<1x32x64xbf16>
      %168 = vector.shape_cast %167 : vector<1x32x64xbf16> to vector<32x64xbf16>
      %cst_127 = arith.constant dense<0.000000e+00> : vector<24x64xf32>
      %169 = tpu.matmul %166, %168, %cst_127 {dimension_numbers = #tpu.dot_dimension_numbers<[1], [0], [0], [1], [0, 0, 1, 1], [], []>} : vector<24x32xbf16>, vector<32x64xbf16>, vector<24x64xf32> -> vector<24x64xf32>
      %170 = arith.addf %161, %169 : vector<24x64xf32>
      %c2_i32_128 = arith.constant 2 : i32
      %171 = arith.addi %97, %c2_i32_128 : i32
      %172 = arith.index_cast %171 : i32 to index
      %c2_129 = arith.constant 2 : index
      %c0_130 = arith.constant 0 : index
      %173 = vector.load %arg8[%172, %c2_129, %c0_130] : memref<26x26x32xf32, #tpu.memory_space<vmem>>, vector<1x24x32xf32>
      %174 = vector.shape_cast %173 : vector<1x24x32xf32> to vector<24x32xf32>
      %175 = arith.truncf %174 : vector<24x32xf32> to vector<24x32xbf16>
      %c8_131 = arith.constant 8 : index
      %c0_132 = arith.constant 0 : index
      %c0_133 = arith.constant 0 : index
      %176 = vector.load %arg4[%c8_131, %c0_132, %c0_133] : memref<9x32x64xbf16, #tpu.memory_space<vmem>>, vector<1x32x64xbf16>
      %177 = vector.shape_cast %176 : vector<1x32x64xbf16> to vector<32x64xbf16>
      %cst_134 = arith.constant dense<0.000000e+00> : vector<24x64xf32>
      %178 = tpu.matmul %175, %177, %cst_134 {dimension_numbers = #tpu.dot_dimension_numbers<[1], [0], [0], [1], [0, 0, 1, 1], [], []>} : vector<24x32xbf16>, vector<32x64xbf16>, vector<24x64xf32> -> vector<24x64xf32>
      %179 = arith.addf %170, %178 : vector<24x64xf32>
      %180 = vector.broadcast %5 : vector<1x64xf32> to vector<24x64xf32>
      %181 = arith.addf %179, %180 : vector<24x64xf32>
      %cst_135 = arith.constant 0.000000e+00 : f32
      %182 = vector.broadcast %cst_135 : f32 to vector<24x64xf32>
      %183 = arith.maximumf %181, %182 : vector<24x64xf32>
      %184 = arith.maximumf %95, %183 : vector<24x64xf32>
      %cst_136 = arith.constant dense<0.000000e+00> : vector<12x64xf32>
      %185 = tpu.matmul %2, %184, %cst_136 {dimension_numbers = #tpu.dot_dimension_numbers<[1], [0], [0], [1], [0, 0, 1, 1], [], []>} : vector<12x24xf32>, vector<24x64xf32>, vector<12x64xf32> -> vector<12x64xf32>
      %cst_137 = arith.constant dense<0.000000e+00> : vector<12x64xf32>
      %186 = tpu.matmul %4, %184, %cst_137 {dimension_numbers = #tpu.dot_dimension_numbers<[1], [0], [0], [1], [0, 0, 1, 1], [], []>} : vector<12x24xf32>, vector<24x64xf32>, vector<12x64xf32> -> vector<12x64xf32>
      %187 = arith.maximumf %185, %186 : vector<12x64xf32>
      %188 = arith.truncf %187 : vector<12x64xf32> to vector<12x64xbf16>
      %c0_138 = arith.constant 0 : index
      %189 = arith.index_cast %8 : i32 to index
      %c0_139 = arith.constant 0 : index
      %c0_140 = arith.constant 0 : index
      %190 = vector.load %arg7[%c0_138, %189, %c0_139, %c0_140] : memref<1x12x12x64xbf16, #tpu.memory_space<vmem>>, vector<1x1x12x64xbf16>
      %191 = vector.shape_cast %190 : vector<1x1x12x64xbf16> to vector<12x64xbf16>
      %192 = vector.shape_cast %188 : vector<12x64xbf16> to vector<1x1x12x64xbf16>
      tpu.vector_store %arg7[%c0_138, %189, %c0_139, %c0_140], %192 {strides = array<i32>} : memref<1x12x12x64xbf16, #tpu.memory_space<vmem>>, vector<1x1x12x64xbf16>,
    }
    %c12_i32_9 = arith.constant 12 : i32
    return
  }
  func.func @transform_0(%arg0: i32) -> (i32, i32, i32, i32) {
    %c0_i32 = arith.constant 0 : i32
    %c0_i32_0 = arith.constant 0 : i32
    %c0_i32_1 = arith.constant 0 : i32
    %c0_i32_2 = arith.constant 0 : i32
    return %arg0, %c0_i32, %c0_i32_0, %c0_i32_1 : i32, i32, i32, i32
  }
  func.func @transform_1(%arg0: i32) -> (i32, i32) {
    %c0_i32 = arith.constant 0 : i32
    %c0_i32_0 = arith.constant 0 : i32
    %c0_i32_1 = arith.constant 0 : i32
    return %c0_i32, %c0_i32_0 : i32, i32
  }
  func.func @transform_2(%arg0: i32) -> (i32, i32) {
    %c0_i32 = arith.constant 0 : i32
    %c0_i32_0 = arith.constant 0 : i32
    %c0_i32_1 = arith.constant 0 : i32
    return %c0_i32, %c0_i32_0 : i32, i32
  }
  func.func @transform_3(%arg0: i32) -> (i32, i32, i32) {
    %c0_i32 = arith.constant 0 : i32
    %c0_i32_0 = arith.constant 0 : i32
    %c0_i32_1 = arith.constant 0 : i32
    %c0_i32_2 = arith.constant 0 : i32
    return %c0_i32, %c0_i32_0, %c0_i32_1 : i32, i32, i32
  }
  func.func @transform_4(%arg0: i32) -> (i32, i32) {
    %c0_i32 = arith.constant 0 : i32
    %c0_i32_0 = arith.constant 0 : i32
    %c0_i32_1 = arith.constant 0 : i32
    return %c0_i32, %c0_i32_0 : i32, i32
  }
  func.func @transform_5(%arg0: i32) -> (i32, i32, i32) {
    %c0_i32 = arith.constant 0 : i32
    %c0_i32_0 = arith.constant 0 : i32
    %c0_i32_1 = arith.constant 0 : i32
    %c0_i32_2 = arith.constant 0 : i32
    return %c0_i32, %c0_i32_0, %c0_i32_1 : i32, i32, i32
  }
  func.func @transform_6(%arg0: i32) -> (i32, i32, i32, i32) {
    %c0_i32 = arith.constant 0 : i32
    %c0_i32_0 = arith.constant 0 : i32
    %c0_i32_1 = arith.constant 0 : i32
    %c0_i32_2 = arith.constant 0 : i32
    return %arg0, %c0_i32, %c0_i32_0, %c0_i32_1 : i32, i32, i32, i32
  }
}

module attributes {stable_mosaic.version = 11 : i64} {
  func.func @_mlp_head_kernel(%arg0: i32, %arg1: memref<2x9216xbf16, #tpu.memory_space<vmem>>, %arg2: memref<9216x128xbf16, #tpu.memory_space<vmem>>, %arg3: memref<1x128xf32, #tpu.memory_space<vmem>>, %arg4: memref<128x128xbf16, #tpu.memory_space<vmem>>, %arg5: memref<1x128xf32, #tpu.memory_space<vmem>>, %arg6: memref<2x128xf32, #tpu.memory_space<vmem>>) attributes {dimension_semantics = [#tpu.dimension_semantics<parallel>], iteration_bounds = array<i64: 1>, scalar_prefetch = 0 : i64, scratch_operands = 0 : i64, tpu.core_type = #tpu.core_type<tc>, window_params = [{transform_indices = @transform_0, window_bounds = array<i64: 2, 9216>}, {pipeline_mode = #tpu.pipeline_mode<synchronous>, transform_indices = @transform_1, window_bounds = array<i64: 9216, 128>}, {pipeline_mode = #tpu.pipeline_mode<synchronous>, transform_indices = @transform_2, window_bounds = array<i64: 1, 128>}, {pipeline_mode = #tpu.pipeline_mode<synchronous>, transform_indices = @transform_3, window_bounds = array<i64: 128, 128>}, {pipeline_mode = #tpu.pipeline_mode<synchronous>, transform_indices = @transform_4, window_bounds = array<i64: 1, 128>}, {transform_indices = @transform_5, window_bounds = array<i64: 2, 128>}]} {
    %c0 = arith.constant 0 : index
    %c0_0 = arith.constant 0 : index
    %0 = vector.load %arg1[%c0, %c0_0] : memref<2x9216xbf16, #tpu.memory_space<vmem>>, vector<2x9216xbf16>
    %c0_1 = arith.constant 0 : index
    %c0_2 = arith.constant 0 : index
    %1 = vector.load %arg2[%c0_1, %c0_2] : memref<9216x128xbf16, #tpu.memory_space<vmem>>, vector<9216x128xbf16>
    %cst = arith.constant dense<0.000000e+00> : vector<2x128xf32>
    %2 = tpu.matmul %0, %1, %cst {dimension_numbers = #tpu.dot_dimension_numbers<[1], [0], [0], [1], [0, 0, 1, 1], [], []>} : vector<2x9216xbf16>, vector<9216x128xbf16>, vector<2x128xf32> -> vector<2x128xf32>
    %c0_3 = arith.constant 0 : index
    %c0_4 = arith.constant 0 : index
    %3 = vector.load %arg3[%c0_3, %c0_4] : memref<1x128xf32, #tpu.memory_space<vmem>>, vector<1x128xf32>
    %4 = vector.broadcast %3 : vector<1x128xf32> to vector<2x128xf32>
    %5 = arith.addf %2, %4 : vector<2x128xf32>
    %cst_5 = arith.constant 0.000000e+00 : f32
    %6 = vector.broadcast %cst_5 : f32 to vector<2x128xf32>
    %7 = arith.maximumf %5, %6 : vector<2x128xf32>
    %8 = arith.truncf %7 : vector<2x128xf32> to vector<2x128xbf16>
    %c0_6 = arith.constant 0 : index
    %c0_7 = arith.constant 0 : index
    %9 = vector.load %arg4[%c0_6, %c0_7] : memref<128x128xbf16, #tpu.memory_space<vmem>>, vector<128x128xbf16>
    %cst_8 = arith.constant dense<0.000000e+00> : vector<2x128xf32>
    %10 = tpu.matmul %8, %9, %cst_8 {dimension_numbers = #tpu.dot_dimension_numbers<[1], [0], [0], [1], [0, 0, 1, 1], [], []>} : vector<2x128xbf16>, vector<128x128xbf16>, vector<2x128xf32> -> vector<2x128xf32>
    %c0_9 = arith.constant 0 : index
    %c0_10 = arith.constant 0 : index
    %11 = vector.load %arg5[%c0_9, %c0_10] : memref<1x128xf32, #tpu.memory_space<vmem>>, vector<1x128xf32>
    %12 = vector.broadcast %11 : vector<1x128xf32> to vector<2x128xf32>
    %13 = arith.addf %10, %12 : vector<2x128xf32>
    %cst_11 = arith.constant dense<0xFF800000> : vector<2xf32>
    %14 = vector.multi_reduction <maximumf>, %13, %cst_11 [1] : vector<2x128xf32> to vector<2xf32>
    %15 = vector.shape_cast %14 : vector<2xf32> to vector<2x1xf32>
    %16 = vector.broadcast %15 : vector<2x1xf32> to vector<2x128xf32>
    %17 = arith.subf %13, %16 : vector<2x128xf32>
    %18 = math.exp %17 : vector<2x128xf32>
    %cst_12 = arith.constant dense<0.000000e+00> : vector<2xf32>
    %19 = vector.multi_reduction <add>, %18, %cst_12 [1] : vector<2x128xf32> to vector<2xf32>
    %20 = vector.shape_cast %19 : vector<2xf32> to vector<2x1xf32>
    %21 = math.log %20 : vector<2x1xf32>
    %22 = vector.broadcast %21 : vector<2x1xf32> to vector<2x128xf32>
    %23 = arith.subf %17, %22 : vector<2x128xf32>
    %c0_13 = arith.constant 0 : index
    %c0_14 = arith.constant 0 : index
    %24 = vector.load %arg6[%c0_13, %c0_14] : memref<2x128xf32, #tpu.memory_space<vmem>>, vector<2x128xf32>
    tpu.vector_store %arg6[%c0_13, %c0_14], %23 {strides = array<i32>} : memref<2x128xf32, #tpu.memory_space<vmem>>, vector<2x128xf32>,
    return
  }
  func.func @transform_0(%arg0: i32) -> (i32, i32) {
    %c0_i32 = arith.constant 0 : i32
    %c0_i32_0 = arith.constant 0 : i32
    return %arg0, %c0_i32 : i32, i32
  }
  func.func @transform_1(%arg0: i32) -> (i32, i32) {
    %c0_i32 = arith.constant 0 : i32
    %c0_i32_0 = arith.constant 0 : i32
    %c0_i32_1 = arith.constant 0 : i32
    return %c0_i32, %c0_i32_0 : i32, i32
  }
  func.func @transform_2(%arg0: i32) -> (i32, i32) {
    %c0_i32 = arith.constant 0 : i32
    %c0_i32_0 = arith.constant 0 : i32
    %c0_i32_1 = arith.constant 0 : i32
    return %c0_i32, %c0_i32_0 : i32, i32
  }
  func.func @transform_3(%arg0: i32) -> (i32, i32) {
    %c0_i32 = arith.constant 0 : i32
    %c0_i32_0 = arith.constant 0 : i32
    %c0_i32_1 = arith.constant 0 : i32
    return %c0_i32, %c0_i32_0 : i32, i32
  }
  func.func @transform_4(%arg0: i32) -> (i32, i32) {
    %c0_i32 = arith.constant 0 : i32
    %c0_i32_0 = arith.constant 0 : i32
    %c0_i32_1 = arith.constant 0 : i32
    return %c0_i32, %c0_i32_0 : i32, i32
  }
  func.func @transform_5(%arg0: i32) -> (i32, i32) {
    %c0_i32 = arith.constant 0 : i32
    %c0_i32_0 = arith.constant 0 : i32
    return %arg0, %c0_i32 : i32, i32
  }
}

</mosaic_0001>

<bundles_post_ra>
// kernel: net_forward.2
= control target key start
LH: loop header
LB: loop body
LE: loop exit
PB: predicated region body
PF: predicated region fallthrough
CT: control target
= control target key end

     0   :  { %s2391_s21 = smov 0   ;;  %s2730_s0 = inlined_call_operand.vmem [shape: bf16[2,26,26,9], index: 0, kind: input, shape index: {}]   ;;  %s2731_s1 = inlined_call_operand.vmem [shape: bf16[9,32], index: 1, kind: input, shape index: {}]   ;;  %s2732_s2 = inlined_call_operand.vmem [shape: f32[1,32], index: 2, kind: input, shape index: {}]   ;;  %s2733_s3 = inlined_call_operand.vmem [shape: bf16[9,32,64], index: 3, kind: input, shape index: {}]   ;;  %s2734_s4 = inlined_call_operand.vmem [shape: f32[1,64], index: 4, kind: input, shape index: {}]   ;;  %s2735_s5 = inlined_call_operand.vmem [shape: f32[2,12,24], index: 5, kind: input, shape index: {}]   ;;  %s2736_s6 = inlined_call_operand.vmem [shape: bf16[2,12,12,64], index: 6, kind: output, shape index: {}]  }
   0x1 LB: > { %s1865_s22 = sadd.s32 4294967295, %s2345_s21   ;;  %p1869_p0 = scmp.ge.s32.totalorder %s2345_s21, 1  ;;  %s2345_s21 = sphi %s2391_s21, %s16_s21  }
   0x2   : > { %p212_p1 = scmp.lt.s32.totalorder %s2345_s21, 3 }
   0x4   : > { %p213_p2 = pnand %p1869_p0, %p212_p1 }
   0x5   : > { %p242_p3 = scmp.lt.s32.totalorder (!%p213_p2), %s1865_s22, 1  ;;  %s2409_s7 = smov (!%p213_p2), 0  }
   0x6   : > { %216 = sbr.rel (%p213_p2) target bundleno = 772 (0x304), region = 44 }
   0xd   : > { %s2738_s22 = smov (!%p242_p3, %s1865_s22), 1 }
   0xe   : > { %s2283_s23 = smul.u32 416, %s2738_s22 }
   0xf   : > { %s2284_s24 = smul.u32 96, %s2738_s22 }
  0x10   : > { %s2402_s27 = scalar_lea.vmem %s2730_s0, %s2283_s23 }
  0x11   : > { %s2407_s30 = scalar_lea.vmem %s2736_s6, %s2284_s24 }
  0x12 LB: >> { %v2310_v0 = vld [vmem:[%s2731_s1] sm:$0x1f]   ;;  %vm297_vm0 = vcmask 1043456   ;;  %vm298_vm1 = vcmask 1044480   ;;  %v2355_v1 = vmov 65535   ;;  %s2014_s10 = sshll.u32 %s2349_s7, 4  ;;  %s2349_s7 = sphi %s2409_s7, %s258_s7  }
  0x13   : >> { %v299_v2 = vsel %vm297_vm0, 4294967295, %v2355_v1  ;;  %s261_s11 = scalar_lea.vmem %s2402_s27, %s2014_s10  ;;  %vm290_vm2 = vcmask 72704   ;;  %v1874_v7 = vld [vmem:[%s2732_s2] ss:$0 sm:$0xff]  ;;  %s1880_s14 = sshll.u32 %s2349_s7, 5  ;;  %vm359_vm3 = vcmask 261120  }
  0x14   : >> { %v300_v3 = vsel %vm298_vm1, %v299_v2, 0  ;;  %v2311_v5 = vld [vmem:[%s261_s11] sm:$0xff]   ;;  %v2312_v6 = vld [vmem:[%s261_s11 + $0x8] sm:$0x1f]   ;;  %vm363_vm4 = vcmask 254976   ;;  %s358_s15 = scalar_lea.vmem [#allocation2], %s1880_s14 }
  0x15   : >> { %v302_v4 = vand.u32 %v2310_v0, %v300_v3  ;;  %2109 = vmatprep.mubr.msk.bf16.mxu0 %vm290_vm2, %v2311_v5  ;;  %s258_s7 = sadd.s32 1, %s2349_s7  }
  0x16   : >> { %p255_p4 = scmp.ge.s32.totalorder %s258_s7, 26  }
  0x17   : >> { %2107 = vmatprep.subr.bf16.mxu0 %v302_v4  ;;  %v2432_v20 = vld [vmem:[%s2735_s5] sm:$0xff] (%p255_p4)  ;;  %v2437_v21 = vld [vmem:[%s2735_s5 + $0x8] sm:$0xf] (%p255_p4)  ;;  %v2442_v22 = vld [vmem:[%s2735_s5 + $0x10] sm:$0xff] (%p255_p4)  ;;  %s2454_s27 = smov (%p255_p4), 0  }
  0x18   : >> { %2108 = vmatpush3.bf16.msra.mxu0 %v302_v4  ;;  %v2447_v23 = vld [vmem:[%s2735_s5 + $0x18] sm:$0xf] (%p255_p4)  ;;  %v2452_v24 = vld [vmem:[%s2734_s4] ss:$0 sm:$0xff] (%p255_p4) }
  0x1b   : >> { %2110 = vmatmul.mubr.msk.bf16.vlgmr.msra.gmra.mrb[0].mxu0 %vm290_vm2, %v2312_v6 }
  0xee   : >> { %v2111_v8 = vpop.f32.mrb[0].mxu0 }
  0xef   : >> { %v347_v9 = vadd.f32 %v2111_v8, %v1874_v7  ;;  %v338_v10 = vpop.f32.mrb[1].mxu0 }
  0xf0   : >> { %v339_v11 = vadd.f32 %v1874_v7, %v338_v10  ;;  %v2112_v12 = vpop.f32.mrb[2].mxu0  ;;  %257 = sbr.rel (!%p255_p4) target bundleno = 18 (0x12), region = 104 }
  0xf1   : >> { %v355_v13 = vmax.f32 %v347_v9, 0.0  ;;  %v350_v14 = vadd.f32 %v2112_v12, %v1874_v7  ;;  %v341_v15 = vpop.f32.mrb[3].mxu0 }
  0xf2   : >> { %v353_v16 = vmax.f32 %v339_v11, 0.0  ;;  %v342_v17 = vadd.f32 %v1874_v7, %v341_v15 }
  0xf3   : >> { %362 = vst.msk [vmem:[%s358_s15 + $0x10] sm:$0xff] %vm359_vm3, %v355_v13  ;;  %v356_v18 = vmax.f32 %v350_v14, 0.0 }
  0xf4   : >> { %360 = vst.msk [vmem:[%s358_s15] sm:$0xff] %vm359_vm3, %v353_v16  ;;  %v354_v19 = vmax.f32 %v342_v17, 0.0 }
  0xf5   : >> { %364 = vst.msk [vmem:[%s358_s15 + $0x18] sm:$0x3] %vm363_vm4, %v356_v18 }
  0xf6   : >> { %361 = vst.msk [vmem:[%s358_s15 + $0x8] sm:$0xff] %vm359_vm3, %v354_v19 }
  0xf7 LB: >> { %v2462_v25 = vld [vmem:[%s2733_s3 + $0x10] sm:$0xff]   ;;  %v2467_v26 = vld [vmem:[%s2733_s3] sm:$0xff]   ;;  %v2473_v27 = vld [vmem:[%s2733_s3 + $0x18] sm:$0xff]   ;;  %s2015_s11 = sshll.u32 %s2353_s27, 6  ;;  %vm1601_vm5 = vcmask 195584   ;;  %vm1778_vm6 = vcmask 517120   ;;  %s2353_s27 = sphi %s2454_s27, %s376_s27  }
  0xf8   : >> { %2113 = vmatprep.subr.bf16.mxu0 %v2462_v25  ;;  %2121 = vmatprep.subr.bf16.mxu1 %v2467_v26  ;;  %v2481_v28 = vld [vmem:[%s2733_s3 + $0x8] sm:$0xff]   ;;  %s2485_s14 = scalar_lea.vmem [#allocation2], %s2015_s11  ;;  %v2497_v38 = vld [vmem:[%s2733_s3 + $0x20] sm:$0xff]   ;;  %v2504_v40 = vld [vmem:[%s2733_s3 + $0x30] sm:$0xff]   ;;  %vm1776_vm7 = vcmask 519168  }
  0xf9   : >> { %2114 = vmatpush3.bf16.msra.mxu0 %v2462_v25  ;;  %2122 = vmatpush3.bf16.msra.mxu1 %v2467_v26  ;;  %v2511_v41 = vld [vmem:[%s2733_s3 + $0x28] sm:$0xff]   ;;  %v2518_v42 = vld [vmem:[%s2733_s3 + $0x38] sm:$0xff]   ;;  %v2536_v51 = vld [vmem:[%s2733_s3 + $0x40] sm:$0xff]  }
  0xfa   : >> { %2115 = vmatprep.subr.bf16.mxu0 %v2473_v27  ;;  %2123 = vmatprep.subr.bf16.mxu1 %v2481_v28  ;;  %v2543_v52 = vld [vmem:[%s2733_s3 + $0x50] sm:$0xff]   ;;  %v2553_v55 = vld [vmem:[%s2733_s3 + $0x48] sm:$0xff]   ;;  %v2564_v59 = vld [vmem:[%s2733_s3 + $0x58] sm:$0xff]  }
  0xfb   : >> { %v2580_v1 = vld [vmem:[%s2733_s3 + $0x60] sm:$0xff]   ;;  %v2587_v2 = vld [vmem:[%s2733_s3 + $0x70] sm:$0xff]   ;;  %v2601_v9 = vld [vmem:[%s2733_s3 + $0x68] sm:$0xff]  }
  0xfc   : >> { %v2607_v10 = vld [vmem:[%s2733_s3 + $0x78] sm:$0xff]   ;;  %v2619_v15 = vld [vmem:[%s2733_s3 + $0x80] sm:$0xff]  }
  0xfd   : >> { %v389_v29 = vld [vmem:[%s2485_s14 + $0x1] sm:$0xff]  ;;  %v390_v30 = vld [vmem:[%s2485_s14 + $0x9] sm:$0xff]  ;;  %v391_v34 = vld [vmem:[%s2485_s14 + $0x11] sm:$0xff]  ;;  %2116 = vmatpush3.bf16.msra.mxu0 %v2473_v27  ;;  %2124 = vmatpush3.bf16.msra.mxu1 %v2481_v28 }
  0xfe   : >> { %v380_v31 = vld [vmem:[%s2485_s14] sm:$0xff]  ;;  %v392_v32 = vpack.c.bf16 %v390_v30, %v389_v29  ;;  %v381_v33 = vld [vmem:[%s2485_s14 + $0x8] sm:$0xff]  ;;  %v382_v35 = vld [vmem:[%s2485_s14 + $0x10] sm:$0xff]  ;;  %v393_v37 = vpack.c.bf16 %v391_v34, %v391_v34  ;;  %2129 = vmatprep.subr.bf16.mxu0 %v2497_v38  ;;  %2137 = vmatprep.subr.bf16.mxu1 %v2504_v40 }
  0xff   : >> { %v383_v36 = vpack.c.bf16 %v381_v33, %v380_v31  ;;  %v384_v39 = vpack.c.bf16 %v382_v35, %v382_v35  ;;  %v532_v43 = vld [vmem:[%s2485_s14 + $0x2] sm:$0xff]  ;;  %v533_v44 = vld [vmem:[%s2485_s14 + $0xa] sm:$0xff]  ;;  %v534_v48 = vld [vmem:[%s2485_s14 + $0x12] sm:$0xff] }
 0x100   : >> { %2117 = vmatprep.mubr.msk.bf16.mxu0 %vm359_vm3, %v392_v32  ;;  %v1907_v45 = vld [vmem:[%s2485_s14 + $0x20] sm:$0xff]  ;;  %v535_v46 = vpack.c.bf16 %v533_v44, %v532_v43  ;;  %v1908_v47 = vld [vmem:[%s2485_s14 + $0x28] sm:$0xff]  ;;  %v1909_v49 = vld [vmem:[%s2485_s14 + $0x30] sm:$0xff]  ;;  %v536_v53 = vpack.c.bf16 %v534_v48, %v534_v48 }
 0x101   : >> { %2125 = vmatprep.mubr.msk.bf16.mxu1 %vm359_vm3, %v383_v36  ;;  %2118 = vmatmul.mubr.msk.bf16.vlgmr.msra.gmra.mrb[0].mxu0 %vm359_vm3, %v393_v37  ;;  %v2531_v50 = vpack.c.bf16 %v1908_v47, %v1907_v45  ;;  %v2548_v54 = vpack.c.bf16 %v1909_v49, %v1909_v49  ;;  %v1918_v56 = vld [vmem:[%s2485_s14 + $0x21] sm:$0xff]  ;;  %v1919_v57 = vld [vmem:[%s2485_s14 + $0x29] sm:$0xff]  ;;  %v1920_v63 = vld [vmem:[%s2485_s14 + $0x31] sm:$0xff] }
 0x102   : >> { %2126 = vmatmul.mubr.msk.bf16.vlgmr.msra.gmra.mrb[0].mxu1 %vm359_vm3, %v384_v39  ;;  %2130 = vmatpush3.bf16.msra.mxu0 %v2497_v38  ;;  %v1929_v58 = vld [vmem:[%s2485_s14 + $0x22] sm:$0xff]  ;;  %v696_v60 = vpack.c.bf16 %v1919_v57, %v1918_v56  ;;  %v1930_v61 = vld [vmem:[%s2485_s14 + $0x2a] sm:$0xff]  ;;  %v1931_v0 = vld [vmem:[%s2485_s14 + $0x32] sm:$0xff]  ;;  %v697_v3 = vpack.c.bf16 %v1920_v63, %v1920_v63 }
 0x103   : >> { %2138 = vmatpush3.bf16.msra.mxu1 %v2504_v40  ;;  %2131 = vmatprep.subr.bf16.mxu0 %v2511_v41  ;;  %v2568_v62 = vpack.c.bf16 %v1930_v61, %v1929_v58  ;;  %v1942_v4 = vld [vmem:[%s2485_s14 + $0x40] sm:$0xff]  ;;  %v1943_v5 = vld [vmem:[%s2485_s14 + $0x48] sm:$0xff]  ;;  %v776_v6 = vpack.c.bf16 %v1931_v0, %v1931_v0  ;;  %v1944_v13 = vld [vmem:[%s2485_s14 + $0x50] sm:$0xff] }
 0x104   : >> { %2139 = vmatprep.subr.bf16.mxu1 %v2518_v42  ;;  %2133 = vmatprep.mubr.msk.bf16.mxu0 %vm359_vm3, %v535_v46  ;;  %v1953_v7 = vld [vmem:[%s2485_s14 + $0x41] sm:$0xff]  ;;  %v1954_v8 = vld [vmem:[%s2485_s14 + $0x49] sm:$0xff]  ;;  %v857_v11 = vpack.c.bf16 %v1943_v5, %v1942_v4  ;;  %v1955_v14 = vld [vmem:[%s2485_s14 + $0x51] sm:$0xff]  ;;  %v858_v16 = vpack.c.bf16 %v1944_v13, %v1944_v13 }
 0x105   : >> { %2141 = vmatprep.mubr.msk.bf16.mxu1 %vm359_vm3, %v2531_v50  ;;  %v936_v12 = vpack.c.bf16 %v1954_v8, %v1953_v7  ;;  %v1964_v17 = vld [vmem:[%s2485_s14 + $0x42] sm:$0xff]  ;;  %v1965_v18 = vld [vmem:[%s2485_s14 + $0x4a] sm:$0xff]  ;;  %v937_v19 = vpack.c.bf16 %v1955_v14, %v1955_v14  ;;  %v1966_v31 = vld [vmem:[%s2485_s14 + $0x52] sm:$0xff] }
 0x106   : >> { %2132 = vmatpush3.bf16.msra.mxu0 %v2511_v41  ;;  %v2632_v29 = vld [vmem:[%s2733_s3 + $0x88] sm:$0xff]   ;;  %v1015_v30 = vpack.c.bf16 %v1965_v18, %v1964_v17  ;;  %v1016_v32 = vpack.c.bf16 %v1966_v31, %v1966_v31 }
 0x107   : >> { %2140 = vmatpush3.bf16.msra.mxu1 %v2518_v42  ;;  %2145 = vmatprep.subr.bf16.mxu0 %v2536_v51  ;;  %v1995_v33 = vld [vmem:[%s2485_s14 + $0x61] sm:$0xff]  ;;  %v1996_v34 = vld [vmem:[%s2485_s14 + $0x69] sm:$0xff] }
 0x108   : >> { %2153 = vmatprep.subr.bf16.mxu1 %v2543_v52  ;;  %v2000_v36 = vld [vmem:[%s2485_s14 + $0x62] sm:$0xff]  ;;  %v2001_v37 = vld [vmem:[%s2485_s14 + $0x6a] sm:$0xff] }
 0x109   : >> { %2134 = vmatmul.mubr.msk.bf16.vlgmr.msra.gmra.mrb[4].mxu0 %vm359_vm3, %v536_v53  ;;  %v1533_v39 = vpack.c.bf16 %v2001_v37, %v2000_v36 }
 0x10a   : >> { %2142 = vmatmul.mubr.msk.bf16.vlgmr.msra.gmra.mrb[4].mxu1 %vm359_vm3, %v2548_v54  ;;  %2146 = vmatpush3.bf16.msra.mxu0 %v2536_v51 }
 0x10b   : >> { %2154 = vmatpush3.bf16.msra.mxu1 %v2543_v52  ;;  %2147 = vmatprep.subr.bf16.mxu0 %v2553_v55 }
 0x10c   : >> { %2155 = vmatprep.subr.bf16.mxu1 %v2564_v59  ;;  %2149 = vmatprep.mubr.msk.bf16.mxu0 %vm359_vm3, %v696_v60 }
 0x10d   : >> { %2157 = vmatprep.mubr.msk.bf16.mxu1 %vm359_vm3, %v2568_v62 }
 0x10e   : >> { %2148 = vmatpush3.bf16.msra.mxu0 %v2553_v55 }
 0x10f   : >> { %2156 = vmatpush3.bf16.msra.mxu1 %v2564_v59  ;;  %2161 = vmatprep.subr.bf16.mxu0 %v2580_v1 }
 0x110   : >> { %2169 = vmatprep.subr.bf16.mxu1 %v2587_v2 }
 0x111   : >> { %2150 = vmatmul.mubr.msk.bf16.vlgmr.msra.gmra.mrb[8].mxu0 %vm359_vm3, %v697_v3 }
 0x112   : >> { %2158 = vmatmul.mubr.msk.bf16.vlgmr.msra.gmra.mrb[8].mxu1 %vm359_vm3, %v776_v6  ;;  %2162 = vmatpush3.bf16.msra.mxu0 %v2580_v1 }
 0x113   : >> { %2170 = vmatpush3.bf16.msra.mxu1 %v2587_v2  ;;  %2163 = vmatprep.subr.bf16.mxu0 %v2601_v9 }
 0x114   : >> { %2171 = vmatprep.subr.bf16.mxu1 %v2607_v10  ;;  %2165 = vmatprep.mubr.msk.bf16.mxu0 %vm359_vm3, %v857_v11 }
 0x115   : >> { %2173 = vmatprep.mubr.msk.bf16.mxu1 %vm359_vm3, %v936_v12 }
 0x116   : >> { %2164 = vmatpush3.bf16.msra.mxu0 %v2601_v9 }
 0x117   : >> { %2172 = vmatpush3.bf16.msra.mxu1 %v2607_v10  ;;  %2177 = vmatprep.subr.bf16.mxu0 %v2619_v15 }
 0x118   : >> { %2185 = vmatprep.subr.bf16.mxu1 %v2462_v25 }
 0x119   : >> { %2166 = vmatmul.mubr.msk.bf16.vlgmr.msra.gmra.mrb[12].mxu0 %vm359_vm3, %v858_v16 }
 0x11a   : >> { %2174 = vmatmul.mubr.msk.bf16.vlgmr.msra.gmra.mrb[12].mxu1 %vm359_vm3, %v937_v19  ;;  %2178 = vmatpush3.bf16.msra.mxu0 %v2619_v15 }
 0x11b   : >> { %2186 = vmatpush3.bf16.msra.mxu1 %v2462_v25  ;;  %2179 = vmatprep.subr.bf16.mxu0 %v2632_v29  ;;  %v1990_v25 = vld [vmem:[%s2485_s14 + $0x60] sm:$0xff] }
 0x11c   : >> { %2187 = vmatprep.subr.bf16.mxu1 %v2473_v27  ;;  %2181 = vmatprep.mubr.msk.bf16.mxu0 %vm359_vm3, %v1015_v30 }
 0x11d   : >> { %2189 = vmatprep.mubr.msk.bf16.mxu1 %vm359_vm3, %v696_v60 }
 0x11e   : >> { %2180 = vmatpush3.bf16.msra.mxu0 %v2632_v29 }
 0x11f   : >> { %2188 = vmatpush3.bf16.msra.mxu1 %v2473_v27  ;;  %2193 = vmatprep.subr.bf16.mxu0 %v2467_v26 }
 0x120   : >> { %2201 = vmatprep.subr.bf16.mxu1 %v2497_v38 }
 0x121   : >> { %2182 = vmatmul.mubr.msk.bf16.vlgmr.msra.gmra.mrb[16].mxu0 %vm359_vm3, %v1016_v32 }
 0x122   : >> { %2190 = vmatmul.mubr.msk.bf16.vlgmr.msra.gmra.mrb[16].mxu1 %vm359_vm3, %v697_v3  ;;  %2194 = vmatpush3.bf16.msra.mxu0 %v2467_v26  ;;  %v1991_v26 = vld [vmem:[%s2485_s14 + $0x68] sm:$0xff] }
 0x123   : >> { %2202 = vmatpush3.bf16.msra.mxu1 %v2497_v38  ;;  %2195 = vmatprep.subr.bf16.mxu0 %v2481_v28  ;;  %v1409_v27 = vpack.c.bf16 %v1991_v26, %v1990_v25  ;;  %v1471_v38 = vpack.c.bf16 %v1996_v34, %v1995_v33 }
 0x124   : >> { %2203 = vmatprep.subr.bf16.mxu1 %v2511_v41  ;;  %2197 = vmatprep.mubr.msk.bf16.mxu0 %vm359_vm3, %v2531_v50 }
 0x125   : >> { %2205 = vmatprep.mubr.msk.bf16.mxu1 %vm359_vm3, %v2568_v62 }
 0x126   : >> { %2196 = vmatpush3.bf16.msra.mxu0 %v2481_v28  ;;  %v1992_v28 = vld [vmem:[%s2485_s14 + $0x70] sm:$0xff] }
 0x127   : >> { %2204 = vmatpush3.bf16.msra.mxu1 %v2511_v41  ;;  %2209 = vmatprep.subr.bf16.mxu0 %v2504_v40  ;;  %v1410_v35 = vpack.c.bf16 %v1992_v28, %v1992_v28  ;;  %v2002_v41 = vld [vmem:[%s2485_s14 + $0x72] sm:$0xff] }
 0x128   : >> { %2217 = vmatprep.subr.bf16.mxu1 %v2536_v51  ;;  %v1534_v43 = vpack.c.bf16 %v2002_v41, %v2002_v41 }
 0x129   : >> { %2198 = vmatmul.mubr.msk.bf16.vlgmr.msra.gmra.mrb[20].mxu0 %vm359_vm3, %v2548_v54 }
 0x12a   : >> { %2206 = vmatmul.mubr.msk.bf16.vlgmr.msra.gmra.mrb[20].mxu1 %vm359_vm3, %v776_v6  ;;  %2210 = vmatpush3.bf16.msra.mxu0 %v2504_v40  ;;  %v1997_v40 = vld [vmem:[%s2485_s14 + $0x71] sm:$0xff]  ;;  %s2021_s14 = sshll.u32 %s2353_s27, 3  ;;  %s376_s27 = sadd.s32 1, %s2353_s27  }
 0x12b   : >> { %2218 = vmatpush3.bf16.msra.mxu1 %v2536_v51  ;;  %2211 = vmatprep.subr.bf16.mxu0 %v2518_v42  ;;  %s1775_s24 = scalar_lea.vmem %s2407_s30, %s2021_s14  ;;  %p373_p5 = scmp.ge.s32.totalorder %s376_s27, 12  }
 0x12c   : >> { %2219 = vmatprep.subr.bf16.mxu1 %v2553_v55  ;;  %2213 = vmatprep.mubr.msk.bf16.mxu0 %vm359_vm3, %v857_v11 }
 0x12d   : >> { %2221 = vmatprep.mubr.msk.bf16.mxu1 %vm359_vm3, %v936_v12 }
 0x12e   : >> { %2212 = vmatpush3.bf16.msra.mxu0 %v2518_v42  ;;  %v1472_v42 = vpack.c.bf16 %v1997_v40, %v1997_v40 }
 0x12f   : >> { %2220 = vmatpush3.bf16.msra.mxu1 %v2553_v55  ;;  %2225 = vmatprep.subr.bf16.mxu0 %v2543_v52 }
 0x130   : >> { %2233 = vmatprep.subr.bf16.mxu1 %v2580_v1 }
 0x131   : >> { %2214 = vmatmul.mubr.msk.bf16.vlgmr.msra.gmra.mrb[24].mxu0 %vm359_vm3, %v858_v16 }
 0x132   : >> { %2222 = vmatmul.mubr.msk.bf16.vlgmr.msra.gmra.mrb[24].mxu1 %vm359_vm3, %v937_v19  ;;  %2226 = vmatpush3.bf16.msra.mxu0 %v2543_v52 }
 0x133   : >> { %2234 = vmatpush3.bf16.msra.mxu1 %v2580_v1  ;;  %2227 = vmatprep.subr.bf16.mxu0 %v2564_v59 }
 0x134   : >> { %2235 = vmatprep.subr.bf16.mxu1 %v2601_v9  ;;  %2229 = vmatprep.mubr.msk.bf16.mxu0 %vm359_vm3, %v1015_v30 }
 0x135   : >> { %2237 = vmatprep.mubr.msk.bf16.mxu1 %vm359_vm3, %v1409_v27 }
 0x136   : >> { %2228 = vmatpush3.bf16.msra.mxu0 %v2564_v59 }
 0x137   : >> { %2236 = vmatpush3.bf16.msra.mxu1 %v2601_v9  ;;  %2241 = vmatprep.subr.bf16.mxu0 %v2587_v2 }
 0x138   : >> { %2249 = vmatprep.subr.bf16.mxu1 %v2619_v15 }
 0x139   : >> { %2230 = vmatmul.mubr.msk.bf16.vlgmr.msra.gmra.mrb[28].mxu0 %vm359_vm3, %v1016_v32 }
 0x13a   : >> { %2238 = vmatmul.mubr.msk.bf16.vlgmr.msra.gmra.mrb[28].mxu1 %vm359_vm3, %v1410_v35  ;;  %2242 = vmatpush3.bf16.msra.mxu0 %v2587_v2 }
 0x13b   : >> { %2250 = vmatpush3.bf16.msra.mxu1 %v2619_v15  ;;  %2243 = vmatprep.subr.bf16.mxu0 %v2607_v10 }
 0x13c   : >> { %2251 = vmatprep.subr.bf16.mxu1 %v2632_v29  ;;  %2245 = vmatprep.mubr.msk.bf16.mxu0 %vm359_vm3, %v1471_v38 }
 0x13d   : >> { %2253 = vmatprep.mubr.msk.bf16.mxu1 %vm359_vm3, %v1533_v39 }
 0x13e   : >> { %2244 = vmatpush3.bf16.msra.mxu0 %v2607_v10 }
 0x13f   : >> { %2252 = vmatpush3.bf16.msra.mxu1 %v2632_v29 }
 0x141   : >> { %2246 = vmatmul.mubr.msk.bf16.vlgmr.msra.gmra.mrb[32].mxu0 %vm359_vm3, %v1472_v42 }
 0x142   : >> { %2254 = vmatmul.mubr.msk.bf16.vlgmr.msra.gmra.mrb[32].mxu1 %vm359_vm3, %v1534_v43  ;;  %2263 = vmatprep.mubr.msk.f32.mxu0 %vm1601_vm5, %v2432_v20 }
 0x143   : >> { %2272 = vmatprep.mubr.msk.f32.mxu1 %vm1601_vm5, %v2442_v22 }
 0x1d4   : >> { %v2119_v44 = vpop.f32.mrb[0].mxu0 }
 0x1d5   : >> { %v2127_v45 = vpop.f32.mrb[0].mxu1  ;;  %v452_v46 = vpop.f32.mrb[1].mxu0 }
 0x1d6   : >> { %v527_v47 = vadd.f32 %v2127_v45, %v2119_v44  ;;  %v518_v48 = vpop.f32.mrb[1].mxu1  ;;  %v2120_v49 = vpop.f32.mrb[2].mxu0 }
 0x1d7   : >> { %v519_v50 = vadd.f32 %v518_v48, %v452_v46  ;;  %v2128_v51 = vpop.f32.mrb[2].mxu1  ;;  %v455_v52 = vpop.f32.mrb[3].mxu0 }
 0x1d8   : >> { %v521_v53 = vpop.f32.mrb[3].mxu1 }
 0x1d9   : >> { %v522_v54 = vadd.f32 %v521_v53, %v455_v52 }
 0x1dc   : >> { %v2135_v55 = vpop.f32.mrb[4].mxu0 }
 0x1dd   : >> { %v610_v56 = vadd.f32 %v2135_v55, %v527_v47  ;;  %v2143_v57 = vpop.f32.mrb[4].mxu1  ;;  %v594_v58 = vpop.f32.mrb[5].mxu0 }
 0x1de   : >> { %v608_v59 = vadd.f32 %v594_v58, %v519_v50  ;;  %v676_v60 = vpop.f32.mrb[5].mxu1  ;;  %v2136_v61 = vpop.f32.mrb[6].mxu0 }
 0x1df   : >> { %v692_v62 = vadd.f32 %v2143_v57, %v610_v56  ;;  %v2144_v63 = vpop.f32.mrb[6].mxu1  ;;  %v597_v0 = vpop.f32.mrb[7].mxu0 }
 0x1e0   : >> { %v690_v1 = vadd.f32 %v676_v60, %v608_v59  ;;  %v609_v2 = vadd.f32 %v597_v0, %v522_v54  ;;  %v679_v3 = vpop.f32.mrb[7].mxu1 }
 0x1e2   : >> { %v691_v4 = vadd.f32 %v679_v3, %v609_v2 }
 0x1e4   : >> { %v2151_v5 = vpop.f32.mrb[8].mxu0 }
 0x1e5   : >> { %v771_v6 = vadd.f32 %v2151_v5, %v692_v62  ;;  %v2159_v7 = vpop.f32.mrb[8].mxu1  ;;  %v755_v8 = vpop.f32.mrb[9].mxu0 }
 0x1e6   : >> { %v769_v9 = vadd.f32 %v755_v8, %v690_v1  ;;  %v834_v10 = vpop.f32.mrb[9].mxu1  ;;  %v2152_v11 = vpop.f32.mrb[10].mxu0 }
 0x1e7   : >> { %v850_v12 = vadd.f32 %v2159_v7, %v771_v6  ;;  %v2160_v13 = vpop.f32.mrb[10].mxu1  ;;  %v758_v14 = vpop.f32.mrb[11].mxu0 }
 0x1e8   : >> { %v848_v15 = vadd.f32 %v834_v10, %v769_v9  ;;  %v770_v16 = vadd.f32 %v758_v14, %v691_v4  ;;  %v837_v17 = vpop.f32.mrb[11].mxu1 }
 0x1ea   : >> { %v849_v18 = vadd.f32 %v837_v17, %v770_v16 }
 0x1ec   : >> { %v2167_v19 = vpop.f32.mrb[12].mxu0 }
 0x1ed   : >> { %v932_v29 = vadd.f32 %v2167_v19, %v850_v12  ;;  %v2175_v30 = vpop.f32.mrb[12].mxu1  ;;  %v916_v31 = vpop.f32.mrb[13].mxu0 }
 0x1ee   : >> { %v930_v32 = vadd.f32 %v916_v31, %v848_v15  ;;  %v995_v25 = vpop.f32.mrb[13].mxu1  ;;  %v2168_v26 = vpop.f32.mrb[14].mxu0 }
 0x1ef   : >> { %v1011_v27 = vadd.f32 %v2175_v30, %v932_v29  ;;  %v2176_v28 = vpop.f32.mrb[14].mxu1  ;;  %v919_v33 = vpop.f32.mrb[15].mxu0 }
 0x1f0   : >> { %v1009_v34 = vadd.f32 %v995_v25, %v930_v32  ;;  %v931_v35 = vadd.f32 %v919_v33, %v849_v18  ;;  %v998_v36 = vpop.f32.mrb[15].mxu1 }
 0x1f2   : >> { %v1010_v37 = vadd.f32 %v998_v36, %v931_v35 }
 0x1f4   : >> { %v2183_v38 = vpop.f32.mrb[16].mxu0 }
 0x1f5   : >> { %v1090_v39 = vadd.f32 %v2183_v38, %v1011_v27  ;;  %v2191_v40 = vpop.f32.mrb[16].mxu1  ;;  %v1074_v41 = vpop.f32.mrb[17].mxu0 }
 0x1f6   : >> { %v1088_v42 = vadd.f32 %v1074_v41, %v1009_v34  ;;  %v1137_v43 = vpop.f32.mrb[17].mxu1  ;;  %v2184_v44 = vpop.f32.mrb[18].mxu0 }
 0x1f7   : >> { %v2192_v45 = vpop.f32.mrb[18].mxu1  ;;  %v1077_v46 = vpop.f32.mrb[19].mxu0 }
 0x1f8   : >> { %v1089_v47 = vadd.f32 %v1077_v46, %v1010_v37  ;;  %v1140_v48 = vpop.f32.mrb[19].mxu1  ;;  %v1097_v45 = vadd.f32 %v2452_v24, %v1088_v42 }
 0x1fc   : >> { %v2199_v49 = vpop.f32.mrb[20].mxu0 }
 0x1fd   : >> { %v1194_v50 = vadd.f32 %v2199_v49, %v2191_v40  ;;  %v2207_v51 = vpop.f32.mrb[20].mxu1  ;;  %v1185_v52 = vpop.f32.mrb[21].mxu0  ;;  %v1099_v40 = vadd.f32 %v2452_v24, %v1090_v39 }
 0x1fe   : >> { %v1186_v53 = vadd.f32 %v1185_v52, %v1137_v43  ;;  %v1233_v54 = vpop.f32.mrb[21].mxu1  ;;  %v2200_v55 = vpop.f32.mrb[22].mxu0 }
 0x1ff   : >> { %v1249_v56 = vadd.f32 %v2207_v51, %v1194_v50  ;;  %v2208_v57 = vpop.f32.mrb[22].mxu1  ;;  %v1188_v58 = vpop.f32.mrb[23].mxu0  ;;  %v1098_v51 = vadd.f32 %v2452_v24, %v1089_v47 }
 0x200   : >> { %v1247_v59 = vadd.f32 %v1233_v54, %v1186_v53  ;;  %v1189_v60 = vadd.f32 %v1188_v58, %v1140_v48  ;;  %v1236_v61 = vpop.f32.mrb[23].mxu1  ;;  %v1102_v54 = vmax.f32 %v1099_v40, 0.0 }
 0x202   : >> { %v1248_v62 = vadd.f32 %v1236_v61, %v1189_v60 }
 0x204   : >> { %v2215_v63 = vpop.f32.mrb[24].mxu0 }
 0x205   : >> { %v1300_v0 = vadd.f32 %v2215_v63, %v1249_v56  ;;  %v2223_v1 = vpop.f32.mrb[24].mxu1  ;;  %v1284_v2 = vpop.f32.mrb[25].mxu0  ;;  %v1100_v56 = vmax.f32 %v1097_v45, 0.0 }
 0x206   : >> { %v1298_v3 = vadd.f32 %v1284_v2, %v1247_v59  ;;  %v1335_v4 = vpop.f32.mrb[25].mxu1  ;;  %v2216_v5 = vpop.f32.mrb[26].mxu0  ;;  %v1101_v59 = vmax.f32 %v1098_v51, 0.0 }
 0x207   : >> { %v1351_v6 = vadd.f32 %v2223_v1, %v1300_v0  ;;  %v2224_v7 = vpop.f32.mrb[26].mxu1  ;;  %v1287_v8 = vpop.f32.mrb[27].mxu0 }
 0x208   : >> { %v1349_v9 = vadd.f32 %v1335_v4, %v1298_v3  ;;  %v1299_v10 = vadd.f32 %v1287_v8, %v1248_v62  ;;  %v1338_v11 = vpop.f32.mrb[27].mxu1 }
 0x20a   : >> { %v1350_v12 = vadd.f32 %v1338_v11, %v1299_v10 }
 0x20c   : >> { %v2231_v13 = vpop.f32.mrb[28].mxu0 }
 0x20d   : >> { %v1402_v14 = vadd.f32 %v2231_v13, %v1351_v6  ;;  %v2239_v15 = vpop.f32.mrb[28].mxu1  ;;  %v1386_v16 = vpop.f32.mrb[29].mxu0 }
 0x20e   : >> { %v1400_v17 = vadd.f32 %v1386_v16, %v1349_v9  ;;  %v1451_v18 = vpop.f32.mrb[29].mxu1  ;;  %v2232_v19 = vpop.f32.mrb[30].mxu0 }
 0x20f   : >> { %v1467_v29 = vadd.f32 %v2239_v15, %v1402_v14  ;;  %v2240_v30 = vpop.f32.mrb[30].mxu1  ;;  %v1389_v31 = vpop.f32.mrb[31].mxu0 }
 0x210   : >> { %v1465_v32 = vadd.f32 %v1451_v18, %v1400_v17  ;;  %v1401_v25 = vadd.f32 %v1389_v31, %v1350_v12  ;;  %v1454_v26 = vpop.f32.mrb[31].mxu1 }
 0x212   : >> { %v1466_v27 = vadd.f32 %v1454_v26, %v1401_v25 }
 0x214   : >> { %v2247_v28 = vpop.f32.mrb[32].mxu0 }
 0x215   : >> { %v1529_v33 = vadd.f32 %v2247_v28, %v1467_v29  ;;  %v2255_v34 = vpop.f32.mrb[32].mxu1  ;;  %v1513_v35 = vpop.f32.mrb[33].mxu0 }
 0x216   : >> { %v1527_v36 = vadd.f32 %v1513_v35, %v1465_v32  ;;  %v1575_v37 = vpop.f32.mrb[33].mxu1  ;;  %v2248_v38 = vpop.f32.mrb[34].mxu0 }
 0x217   : >> { %v1591_v41 = vadd.f32 %v2255_v34, %v1529_v33  ;;  %v2256_v43 = vpop.f32.mrb[34].mxu1  ;;  %v1516_v44 = vpop.f32.mrb[35].mxu0 }
 0x218   : >> { %v1589_v46 = vadd.f32 %v1575_v37, %v1527_v36  ;;  %v1528_v48 = vadd.f32 %v1516_v44, %v1466_v27  ;;  %v1578_v49 = vpop.f32.mrb[35].mxu1 }
 0x219   : >> { %v1594_v50 = vadd.f32 %v2452_v24, %v1591_v41 }
 0x21a   : >> { %v1592_v52 = vadd.f32 %v2452_v24, %v1589_v46  ;;  %v1590_v53 = vadd.f32 %v1578_v49, %v1528_v48 }
 0x21b   : >> { %v1597_v55 = vmax.f32 %v1594_v50, 0.0 }
 0x21c   : >> { %v1595_v57 = vmax.f32 %v1592_v52, 0.0  ;;  %v1593_v39 = vadd.f32 %v2452_v24, %v1590_v53 }
 0x21d   : >> { %v1600_v58 = vmax.f32 %v1102_v54, %v1597_v55 }
 0x21e   : >> { %v1598_v42 = vmax.f32 %v1100_v56, %v1595_v57  ;;  %v1596_v60 = vmax.f32 %v1593_v39, 0.0 }
 0x220   : >> { %v1599_v61 = vmax.f32 %v1101_v59, %v1596_v60 }
 0x222   : >> { %v2275_v62 = vpack.c.bf16 %v1599_v61, %v1598_v42 }
 0x224   : >> { %2276 = vmatprep.subr.bf16.mxu0 %v2275_v62  ;;  %2280 = vmatprep.subr.bf16.mxu1 %v2275_v62 }
 0x225   : >> { %2278 = vmatpush3.bf16.msra.mxu0 %v2275_v62  ;;  %2282 = vmatpush3.bf16.msra.mxu1 %v2275_v62 }
 0x226   : >> { %2261 = vmatprep.subr.mxu0 %v1600_v58  ;;  %2270 = vmatprep.subr.mxu1 %v1600_v58 }
 0x229   : >> { %2262 = vmatpush3.msra.mxu0 %v1600_v58  ;;  %2271 = vmatpush3.msra.mxu1 %v1600_v58 }
 0x22a   : >> { %2264 = vmatmul.mubr.msk.f32.vlgmr.msra.gmra.mrb[36].mxu0 %vm1601_vm5, %v2437_v21  ;;  %2273 = vmatmul.mubr.msk.f32.vlgmr.msra.gmra.mrb[36].mxu1 %vm1601_vm5, %v2447_v23 }
 0x2fd   : >> { %v2265_v47 = vpop.f32.mrb[36].mxu0  ;;  %v2274_v63 = vpop.f32.mrb[36].mxu1  ;;  %375 = sbr.rel (!%p373_p5) target bundleno = 247 (0xf7), region = 115 }
 0x2fe   : >> { %v1765_v0 = vmax.f32 %v2265_v47, %v2274_v63  ;;  %v1674_v1 = vpop.f32.mrb[37].mxu0  ;;  %v1755_v2 = vpop.f32.mrb[37].mxu1 }
 0x2ff   : >> { %v1764_v3 = vmax.f32 %v1674_v1, %v1755_v2 }
 0x300   : >> { %v2020_v4 = vpack.c.bf16 %v1765_v0, %v1765_v0 }
 0x301   : >> { %v2019_v5 = vpack.c.bf16 %v1764_v3, %v1764_v3 }
 0x302   : >> { %1779 = vst.msk [vmem:[%s1775_s24 + $0x4] sm:$0x3] %vm1778_vm6, %v2020_v4 }
 0x303   : >> { %1777 = vst.msk [vmem:[%s1775_s24] sm:$0xf] %vm1776_vm7, %v2019_v5 }
 0x304 PF: > { %s16_s21 = sadd.s32 1, %s2345_s21  }
 0x305   : > { %p13_p6 = scmp.ge.s32.totalorder %s16_s21, 4  }
 0x307   :  { %15 = sbr.rel (!%p13_p6) target bundleno = 1 (0x1), region = 126 }

// kernel: net_forward.3
= control target key start
LH: loop header
LB: loop body
LE: loop exit
PB: predicated region body
PF: predicated region fallthrough
CT: control target
= control target key end

     0   :  { %v1203_v28 = vlaneseq  ;;  %v8781_v36 = vmov 1966171168   ;;  %s10743_s0 = inlined_call_operand.vmem [shape: bf16[2,9216], index: 0, kind: input, shape index: {}]   ;;  %s10744_s1 = inlined_call_operand.vmem [shape: bf16[9216,128], index: 1, kind: input, shape index: {}]   ;;  %s10745_s2 = inlined_call_operand.vmem [shape: f32[1,128], index: 2, kind: input, shape index: {}]   ;;  %s10746_s3 = inlined_call_operand.vmem [shape: bf16[128,128], index: 3, kind: input, shape index: {}]   ;;  %s10747_s4 = inlined_call_operand.vmem [shape: f32[1,128], index: 4, kind: input, shape index: {}]   ;;  %s10748_s5 = inlined_call_operand.hbm [shape: f32[2,128], index: 5, kind: output, shape index: {}]  }
   0x1   :  { %v8160_v0 = vld [vmem:[%s10744_s1 + $0x40] sm:$0xff]   ;;  %v8164_v4 = vld [vmem:[%s10744_s1 + $0x48] sm:$0xff]   ;;  %v8168_v8 = vld [vmem:[%s10744_s1 + $0x50] sm:$0xff]   ;;  %v1201_v37 = vunpack.c.l.s4 %v8781_v36 }
   0x2   :  { %v8161_v1 = vld [vmem:[%s10744_s1 + $0xc0] sm:$0xff]   ;;  %7335 = vmatprep.subr.bf16.mxu0 %v8160_v0  ;;  %v8165_v5 = vld [vmem:[%s10744_s1 + $0xc8] sm:$0xff]   ;;  %v8169_v9 = vld [vmem:[%s10744_s1 + $0xd0] sm:$0xff]   ;;  %v1204_v33 = vshrl.u32 %v1203_v28, 7 }
   0x3   :  { %v8162_v2 = vld [vmem:[%s10744_s1] sm:$0xff]   ;;  %7357 = vmatprep.subr.bf16.mxu1 %v8161_v1  ;;  %v8166_v6 = vld [vmem:[%s10744_s1 + $0x8] sm:$0xff]   ;;  %v8170_v10 = vld [vmem:[%s10744_s1 + $0x10] sm:$0xff]   ;;  %v1202_v40 = vunpack.c.0.s8 %v1201_v37 }
   0x4   :  { %v8163_v3 = vld [vmem:[%s10744_s1 + $0x80] sm:$0xff]   ;;  %7336 = vmatpush3.bf16.msra.mxu0 %v8162_v2  ;;  %v8167_v7 = vld [vmem:[%s10744_s1 + $0x88] sm:$0xff]   ;;  %v8171_v11 = vld [vmem:[%s10744_s1 + $0x90] sm:$0xff]  }
   0x5   :  { %7358 = vmatpush3.bf16.msra.mxu1 %v8163_v3  ;;  %7337 = vmatprep.subr.bf16.mxu0 %v8164_v4  ;;  %v8172_v12 = vld [vmem:[%s10744_s1 + $0x58] sm:$0xff]   ;;  %v8176_v16 = vld [vmem:[%s10744_s1 + $0x60] sm:$0xff]   ;;  %v8180_v20 = vld [vmem:[%s10744_s1 + $0x68] sm:$0xff]   ;;  %v8920_v41 = vsub.s32 %v1202_v40, %v1204_v33 }
   0x6   :  { %7359 = vmatprep.subr.bf16.mxu1 %v8165_v5  ;;  %v8173_v13 = vld [vmem:[%s10744_s1 + $0xd8] sm:$0xff]   ;;  %v8177_v17 = vld [vmem:[%s10744_s1 + $0xe0] sm:$0xff]   ;;  %v8181_v21 = vld [vmem:[%s10744_s1 + $0xe8] sm:$0xff]  }
   0x7   :  { %v8174_v14 = vld [vmem:[%s10744_s1 + $0x18] sm:$0xff]   ;;  %v8178_v18 = vld [vmem:[%s10744_s1 + $0x20] sm:$0xff]   ;;  %v8182_v22 = vld [vmem:[%s10744_s1 + $0x28] sm:$0xff]  }
   0x8   :  { %7338 = vmatpush3.bf16.msra.mxu0 %v8166_v6  ;;  %v8175_v15 = vld [vmem:[%s10744_s1 + $0x98] sm:$0xff]   ;;  %v8179_v19 = vld [vmem:[%s10744_s1 + $0xa0] sm:$0xff]   ;;  %v8183_v23 = vld [vmem:[%s10744_s1 + $0xa8] sm:$0xff]  }
   0x9   :  { %7360 = vmatpush3.bf16.msra.mxu1 %v8167_v7  ;;  %7339 = vmatprep.subr.bf16.mxu0 %v8168_v8  ;;  %v8184_v24 = vld [vmem:[%s10744_s1 + $0x70] sm:$0xff]   ;;  %v8188_v29 = vld [vmem:[%s10744_s1 + $0x78] sm:$0xff]   ;;  %v22_v34 = vld [vmem:[%s10743_s0] sm:$0xff] }
   0xa   :  { %7361 = vmatprep.subr.bf16.mxu1 %v8169_v9  ;;  %v8185_v25 = vld [vmem:[%s10744_s1 + $0xf0] sm:$0xff]   ;;  %v8189_v30 = vld [vmem:[%s10744_s1 + $0xf8] sm:$0xff]   ;;  %v8193_v35 = vld [vmem:[%s10744_s1 + $0x140] sm:$0xff]   ;;  %v1199_v39 = vcombine.high %v22_v34, %v22_v34  ;;  %v1206_v42 = vrot.slane %v22_v34, %v8920_v41 }
   0xb   :  { %v8186_v26 = vld [vmem:[%s10744_s1 + $0x30] sm:$0xff]   ;;  %v8190_v31 = vld [vmem:[%s10744_s1 + $0x38] sm:$0xff]   ;;  %v8194_v38 = vld [vmem:[%s10744_s1 + $0x1c0] sm:$0xff]  }
   0xc   :  { %7340 = vmatpush3.bf16.msra.mxu0 %v8170_v10  ;;  %v8187_v27 = vld [vmem:[%s10744_s1 + $0xb0] sm:$0xff]   ;;  %v8191_v32 = vld [vmem:[%s10744_s1 + $0xb8] sm:$0xff]   ;;  %v8924_v43 = vrot.slane %v1199_v39, %v8920_v41  ;;  %v1214_v44 = vcombine.high %v1206_v42, %v1206_v42  ;;  %v1222_v45 = vrot.slane %v1206_v42, %v8920_v41  ;;  %v8195_v47 = vld [vmem:[%s10744_s1 + $0x100] sm:$0xff]  }
   0xd   :  { %7362 = vmatpush3.bf16.msra.mxu1 %v8171_v11  ;;  %7341 = vmatprep.subr.bf16.mxu0 %v8172_v12  ;;  %v8196_v49 = vld [vmem:[%s10744_s1 + $0x180] sm:$0xff]   ;;  %v8197_v52 = vld [vmem:[%s10744_s1 + $0x148] sm:$0xff]   ;;  %v8201_v58 = vld [vmem:[%s10744_s1 + $0x150] sm:$0xff]  }
   0xe   :  { %7363 = vmatprep.subr.bf16.mxu1 %v8173_v13  ;;  %v1215_v46 = vcombine.high %v8924_v43, %v8924_v43  ;;  %v1236_v48 = vrot.slane %v1214_v44, %v8920_v41  ;;  %v1244_v51 = vcombine.high %v1222_v45, %v1222_v45  ;;  %v8198_v54 = vld [vmem:[%s10744_s1 + $0x1c8] sm:$0xff]   ;;  %v8202_v59 = vld [vmem:[%s10744_s1 + $0x1d0] sm:$0xff]   ;;  %v8205_v62 = vld [vmem:[%s10744_s1 + $0x158] sm:$0xff]  }
   0xf   :  { %v8199_v55 = vld [vmem:[%s10744_s1 + $0x108] sm:$0xff]   ;;  %v8203_v60 = vld [vmem:[%s10744_s1 + $0x110] sm:$0xff]   ;;  %v8206_v63 = vld [vmem:[%s10744_s1 + $0x1d8] sm:$0xff]  }
  0x10   :  { %7342 = vmatpush3.bf16.msra.mxu0 %v8174_v14  ;;  %v1243_v50 = vrot.slane %v1215_v46, %v8920_v41  ;;  %5200 = vmatprep.mubr.bf16.mxu0 %v1236_v48  ;;  %v1246_v53 = vcombine.high %v1236_v48, %v1236_v48  ;;  %v8200_v57 = vld [vmem:[%s10744_s1 + $0x188] sm:$0xff]   ;;  %v8204_v61 = vld [vmem:[%s10744_s1 + $0x190] sm:$0xff]   ;;  %v8207_v0 = vld [vmem:[%s10744_s1 + $0x118] sm:$0xff]  }
  0x11   :  { %7364 = vmatpush3.bf16.msra.mxu1 %v8175_v15  ;;  %7343 = vmatprep.subr.bf16.mxu0 %v8176_v16  ;;  %v8208_v1 = vld [vmem:[%s10744_s1 + $0x198] sm:$0xff]   ;;  %v8209_v2 = vld [vmem:[%s10744_s1 + $0x160] sm:$0xff]   ;;  %v8213_v6 = vld [vmem:[%s10744_s1 + $0x168] sm:$0xff]  }
  0x12   :  { %7365 = vmatprep.subr.bf16.mxu1 %v8177_v17  ;;  %v1247_v56 = vcombine.high %v1243_v50, %v1243_v50  ;;  %5240 = vmatprep.mubr.bf16.mxu1 %v1246_v53  ;;  %v8210_v3 = vld [vmem:[%s10744_s1 + $0x1e0] sm:$0xff]   ;;  %v8214_v7 = vld [vmem:[%s10744_s1 + $0x1e8] sm:$0xff]   ;;  %v8217_v10 = vld [vmem:[%s10744_s1 + $0x170] sm:$0xff]  }
  0x13   :  { %v8211_v4 = vld [vmem:[%s10744_s1 + $0x120] sm:$0xff]   ;;  %v8215_v8 = vld [vmem:[%s10744_s1 + $0x128] sm:$0xff]   ;;  %v8218_v11 = vld [vmem:[%s10744_s1 + $0x1f0] sm:$0xff]  }
  0x14   :  { %7344 = vmatpush3.bf16.msra.mxu0 %v8178_v18  ;;  %v8212_v5 = vld [vmem:[%s10744_s1 + $0x1a0] sm:$0xff]   ;;  %v8216_v9 = vld [vmem:[%s10744_s1 + $0x1a8] sm:$0xff]   ;;  %v8219_v12 = vld [vmem:[%s10744_s1 + $0x130] sm:$0xff]   ;;  %v1229_v18 = vrot.slane %v8924_v43, %v8920_v41 }
  0x15   :  { %7366 = vmatpush3.bf16.msra.mxu1 %v8179_v19  ;;  %7345 = vmatprep.subr.bf16.mxu0 %v8180_v20  ;;  %v8220_v13 = vld [vmem:[%s10744_s1 + $0x1b0] sm:$0xff]   ;;  %v8221_v14 = vld [vmem:[%s10744_s1 + $0x178] sm:$0xff]   ;;  %v8225_v19 = vld [vmem:[%s10744_s1 + $0x240] sm:$0xff]  }
  0x16   :  { %7367 = vmatprep.subr.bf16.mxu1 %v8181_v21  ;;  %v8222_v15 = vld [vmem:[%s10744_s1 + $0x1f8] sm:$0xff]   ;;  %v8226_v20 = vld [vmem:[%s10744_s1 + $0x2c0] sm:$0xff]   ;;  %v8233_v28 = vld [vmem:[%s10744_s1 + $0x250] sm:$0xff]  }
  0x17   :  { %v8223_v16 = vld [vmem:[%s10744_s1 + $0x138] sm:$0xff]   ;;  %v8227_v21 = vld [vmem:[%s10744_s1 + $0x200] sm:$0xff]   ;;  %v8245_v40 = vld [vmem:[%s10744_s1 + $0x268] sm:$0xff]  }
  0x18   :  { %7346 = vmatpush3.bf16.msra.mxu0 %v8182_v22  ;;  %v8224_v17 = vld [vmem:[%s10744_s1 + $0x1b8] sm:$0xff]   ;;  %v8228_v22 = vld [vmem:[%s10744_s1 + $0x280] sm:$0xff]   ;;  %v8246_v42 = vld [vmem:[%s10744_s1 + $0x2e8] sm:$0xff]  }
  0x19   :  { %7368 = vmatpush3.bf16.msra.mxu1 %v8183_v23  ;;  %7347 = vmatprep.subr.bf16.mxu0 %v8184_v24  ;;  %v1245_v23 = vcombine.high %v1229_v18, %v1229_v18  ;;  %v8229_v24 = vld [vmem:[%s10744_s1 + $0x248] sm:$0xff]   ;;  %v8238_v33 = vld [vmem:[%s10744_s1 + $0x2d8] sm:$0xff]   ;;  %v8241_v36 = vld [vmem:[%s10744_s1 + $0x260] sm:$0xff]  }
  0x1a   :  { %7369 = vmatprep.subr.bf16.mxu1 %v8185_v25  ;;  %v8230_v25 = vld [vmem:[%s10744_s1 + $0x2c8] sm:$0xff]   ;;  %v8239_v34 = vld [vmem:[%s10744_s1 + $0x218] sm:$0xff]   ;;  %v8242_v37 = vld [vmem:[%s10744_s1 + $0x2e0] sm:$0xff]  }
  0x1b   :  { %v8244_v39 = vld [vmem:[%s10744_s1 + $0x2a0] sm:$0xff]   ;;  %v8247_v43 = vld [vmem:[%s10744_s1 + $0x228] sm:$0xff]  }
  0x1c   :  { %7348 = vmatpush3.bf16.msra.mxu0 %v8186_v26  ;;  %v8231_v26 = vld [vmem:[%s10744_s1 + $0x208] sm:$0xff]  }
  0x1d   :  { %7370 = vmatpush3.bf16.msra.mxu1 %v8187_v27  ;;  %7349 = vmatprep.subr.bf16.mxu0 %v8188_v29  ;;  %v8232_v27 = vld [vmem:[%s10744_s1 + $0x288] sm:$0xff]   ;;  %v8234_v29 = vld [vmem:[%s10744_s1 + $0x2d0] sm:$0xff]  }
  0x1e   :  { %7371 = vmatprep.subr.bf16.mxu1 %v8189_v30  ;;  %v8235_v30 = vld [vmem:[%s10744_s1 + $0x210] sm:$0xff]   ;;  %v8248_v44 = vld [vmem:[%s10744_s1 + $0x2a8] sm:$0xff]  }
  0x1f   :  { %v23_v46 = vld [vmem:[%s10743_s0 + $0x8] sm:$0xff] }
  0x20   :  { %7350 = vmatpush3.bf16.msra.mxu0 %v8190_v31  ;;  %v8236_v31 = vld [vmem:[%s10744_s1 + $0x290] sm:$0xff]   ;;  %v1255_v48 = vrot.slane %v23_v46, %v8920_v41 }
  0x21   :  { %7372 = vmatpush3.bf16.msra.mxu1 %v8191_v32  ;;  %7379 = vmatprep.subr.bf16.mxu0 %v8193_v35  ;;  %v8237_v32 = vld [vmem:[%s10744_s1 + $0x258] sm:$0xff]  }
  0x22   :  { %7401 = vmatprep.subr.bf16.mxu1 %v8194_v38  ;;  %v8240_v35 = vld [vmem:[%s10744_s1 + $0x298] sm:$0xff]   ;;  %v8243_v38 = vld [vmem:[%s10744_s1 + $0x220] sm:$0xff]  }
  0x23   :  { %5201 = vmatmul.mubr.bf16.vlgmr.msra.gmra.mrb[0].mxu0 %v1222_v45  ;;  %v8249_v45 = vld [vmem:[%s10744_s1 + $0x270] sm:$0xff]  }
  0x24   :  { %7380 = vmatpush3.bf16.msra.mxu0 %v8195_v47  ;;  %5241 = vmatmul.mubr.bf16.vlgmr.msra.gmra.mrb[0].mxu1 %v1244_v51  ;;  %v8250_v47 = vld [vmem:[%s10744_s1 + $0x2f0] sm:$0xff]  }
  0x25   :  { %7381 = vmatprep.subr.bf16.mxu0 %v8197_v52  ;;  %7402 = vmatpush3.bf16.msra.mxu1 %v8196_v49  ;;  %v1248_v49 = vcombine.high %v23_v46, %v23_v46  ;;  %v8252_v51 = vld [vmem:[%s10744_s1 + $0x2b0] sm:$0xff]   ;;  %v1263_v52 = vcombine.high %v1255_v48, %v1255_v48 }
  0x26   :  { %5280 = vmatprep.mubr.bf16.mxu0 %v1243_v50  ;;  %7403 = vmatprep.subr.bf16.mxu1 %v8198_v54  ;;  %v8251_v50 = vld [vmem:[%s10744_s1 + $0x230] sm:$0xff]   ;;  %v8253_v54 = vld [vmem:[%s10744_s1 + $0x278] sm:$0xff]  }
  0x27   :  { %5320 = vmatprep.mubr.bf16.mxu1 %v1247_v56  ;;  %v9112_v53 = vrot.slane %v1248_v49, %v8920_v41  ;;  %v1285_v56 = vrot.slane %v1263_v52, %v8920_v41  ;;  %v8300_v46 = vld [vmem:[%s10744_s1 + $0x410] sm:$0xff]   ;;  %v8303_v49 = vld [vmem:[%s10744_s1 + $0x4d8] sm:$0xff]   ;;  %v8306_v52 = vld [vmem:[%s10744_s1 + $0x460] sm:$0xff]  }
  0x28   :  { %7382 = vmatpush3.bf16.msra.mxu0 %v8199_v55  ;;  %v8254_v55 = vld [vmem:[%s10744_s1 + $0x2f8] sm:$0xff]  }
  0x29   :  { %7383 = vmatprep.subr.bf16.mxu0 %v8201_v58  ;;  %7404 = vmatpush3.bf16.msra.mxu1 %v8200_v57  ;;  %v1264_v57 = vcombine.high %v9112_v53, %v9112_v53  ;;  %v8255_v58 = vld [vmem:[%s10744_s1 + $0x238] sm:$0xff]  }
  0x2a   :  { %7405 = vmatprep.subr.bf16.mxu1 %v8202_v59  ;;  %v8256_v59 = vld [vmem:[%s10744_s1 + $0x2b8] sm:$0xff]  }
  0x2c   :  { %7384 = vmatpush3.bf16.msra.mxu0 %v8203_v60  ;;  %v1295_v60 = vcombine.high %v1285_v56, %v1285_v56 }
  0x2d   :  { %7385 = vmatprep.subr.bf16.mxu0 %v8205_v62  ;;  %7406 = vmatpush3.bf16.msra.mxu1 %v8204_v61  ;;  %v1271_v61 = vrot.slane %v1255_v48, %v8920_v41  ;;  %v8257_v62 = vld [vmem:[%s10744_s1 + $0x340] sm:$0xff]   ;;  %v8302_v48 = vld [vmem:[%s10744_s1 + $0x458] sm:$0xff]  }
  0x2e   :  { %7407 = vmatprep.subr.bf16.mxu1 %v8206_v63  ;;  %v8258_v63 = vld [vmem:[%s10744_s1 + $0x3c0] sm:$0xff]  }
  0x30   :  { %7386 = vmatpush3.bf16.msra.mxu0 %v8207_v0  ;;  %v1292_v0 = vrot.slane %v1264_v57, %v8920_v41  ;;  %v8311_v57 = vld [vmem:[%s10744_s1 + $0x4e8] sm:$0xff]  }
  0x31   :  { %7387 = vmatprep.subr.bf16.mxu0 %v8209_v2  ;;  %7408 = vmatpush3.bf16.msra.mxu1 %v8208_v1  ;;  %v8259_v1 = vld [vmem:[%s10744_s1 + $0x300] sm:$0xff]  }
  0x32   :  { %7409 = vmatprep.subr.bf16.mxu1 %v8210_v3  ;;  %v8260_v2 = vld [vmem:[%s10744_s1 + $0x380] sm:$0xff]   ;;  %v1293_v3 = vcombine.high %v1271_v61, %v1271_v61 }
  0x34   :  { %7388 = vmatpush3.bf16.msra.mxu0 %v8211_v4  ;;  %v8261_v4 = vld [vmem:[%s10744_s1 + $0x348] sm:$0xff]  }
  0x35   :  { %7389 = vmatprep.subr.bf16.mxu0 %v8213_v6  ;;  %7410 = vmatpush3.bf16.msra.mxu1 %v8212_v5  ;;  %v8262_v5 = vld [vmem:[%s10744_s1 + $0x3c8] sm:$0xff]   ;;  %v1296_v6 = vcombine.high %v1292_v0, %v1292_v0 }
  0x36   :  { %7411 = vmatprep.subr.bf16.mxu1 %v8214_v7  ;;  %v8263_v7 = vld [vmem:[%s10744_s1 + $0x308] sm:$0xff]  }
  0x38   :  { %7390 = vmatpush3.bf16.msra.mxu0 %v8215_v8  ;;  %v8264_v8 = vld [vmem:[%s10744_s1 + $0x388] sm:$0xff]  }
  0x39   :  { %7391 = vmatprep.subr.bf16.mxu0 %v8217_v10  ;;  %7412 = vmatpush3.bf16.msra.mxu1 %v8216_v9  ;;  %v8265_v9 = vld [vmem:[%s10744_s1 + $0x350] sm:$0xff]  }
  0x3a   :  { %7413 = vmatprep.subr.bf16.mxu1 %v8218_v11  ;;  %v8266_v10 = vld [vmem:[%s10744_s1 + $0x3d0] sm:$0xff]  }
  0x3b   :  { %v8267_v11 = vld [vmem:[%s10744_s1 + $0x310] sm:$0xff]  }
  0x3c   :  { %7392 = vmatpush3.bf16.msra.mxu0 %v8219_v12  ;;  %v8268_v12 = vld [vmem:[%s10744_s1 + $0x390] sm:$0xff]  }
  0x3d   :  { %7393 = vmatprep.subr.bf16.mxu0 %v8221_v14  ;;  %7414 = vmatpush3.bf16.msra.mxu1 %v8220_v13  ;;  %v8269_v13 = vld [vmem:[%s10744_s1 + $0x358] sm:$0xff]  }
  0x3e   :  { %7415 = vmatprep.subr.bf16.mxu1 %v8222_v15  ;;  %v8270_v14 = vld [vmem:[%s10744_s1 + $0x3d8] sm:$0xff]  }
  0x3f   :  { %v8271_v15 = vld [vmem:[%s10744_s1 + $0x318] sm:$0xff]  }
  0x40   :  { %7394 = vmatpush3.bf16.msra.mxu0 %v8223_v16  ;;  %v8272_v16 = vld [vmem:[%s10744_s1 + $0x398] sm:$0xff]  }
  0x41   :  { %7423 = vmatprep.subr.bf16.mxu0 %v8225_v19  ;;  %7416 = vmatpush3.bf16.msra.mxu1 %v8224_v17  ;;  %v8273_v17 = vld [vmem:[%s10744_s1 + $0x360] sm:$0xff]  }
  0x42   :  { %7445 = vmatprep.subr.bf16.mxu1 %v8226_v20  ;;  %v8275_v19 = vld [vmem:[%s10744_s1 + $0x320] sm:$0xff]  }
  0x43   :  { %5281 = vmatmul.mubr.bf16.vlgmr.msra.gmra.mrb[4].mxu0 %v1229_v18  ;;  %v8274_v18 = vld [vmem:[%s10744_s1 + $0x3e0] sm:$0xff]  }
  0x44   :  { %7424 = vmatpush3.bf16.msra.mxu0 %v8227_v21  ;;  %5321 = vmatmul.mubr.bf16.vlgmr.msra.gmra.mrb[4].mxu1 %v1245_v23  ;;  %v8276_v20 = vld [vmem:[%s10744_s1 + $0x3a0] sm:$0xff]   ;;  %v8277_v21 = vld [vmem:[%s10744_s1 + $0x368] sm:$0xff]  }
  0x45   :  { %7425 = vmatprep.subr.bf16.mxu0 %v8229_v24  ;;  %7446 = vmatpush3.bf16.msra.mxu1 %v8228_v22  ;;  %v8278_v22 = vld [vmem:[%s10744_s1 + $0x3e8] sm:$0xff]  }
  0x46   :  { %7447 = vmatprep.subr.bf16.mxu1 %v8230_v25  ;;  %5360 = vmatprep.mubr.bf16.mxu0 %v1285_v56  ;;  %v8279_v23 = vld [vmem:[%s10744_s1 + $0x328] sm:$0xff]   ;;  %v8281_v25 = vld [vmem:[%s10744_s1 + $0x370] sm:$0xff]  }
  0x47   :  { %5400 = vmatprep.mubr.bf16.mxu1 %v1295_v60  ;;  %v8280_v24 = vld [vmem:[%s10744_s1 + $0x3a8] sm:$0xff]   ;;  %v8314_v60 = vld [vmem:[%s10744_s1 + $0x470] sm:$0xff]  }
  0x48   :  { %7426 = vmatpush3.bf16.msra.mxu0 %v8231_v26  ;;  %v8282_v26 = vld [vmem:[%s10744_s1 + $0x3f0] sm:$0xff]   ;;  %v8310_v56 = vld [vmem:[%s10744_s1 + $0x468] sm:$0xff]  }
  0x49   :  { %7427 = vmatprep.subr.bf16.mxu0 %v8233_v28  ;;  %7448 = vmatpush3.bf16.msra.mxu1 %v8232_v27  ;;  %v8283_v27 = vld [vmem:[%s10744_s1 + $0x330] sm:$0xff]  }
  0x4a   :  { %7449 = vmatprep.subr.bf16.mxu1 %v8234_v29  ;;  %v8284_v28 = vld [vmem:[%s10744_s1 + $0x3b0] sm:$0xff]   ;;  %v8285_v29 = vld [vmem:[%s10744_s1 + $0x378] sm:$0xff]  }
  0x4c   :  { %7428 = vmatpush3.bf16.msra.mxu0 %v8235_v30  ;;  %v8286_v30 = vld [vmem:[%s10744_s1 + $0x3f8] sm:$0xff]  }
  0x4d   :  { %7429 = vmatprep.subr.bf16.mxu0 %v8237_v32  ;;  %7450 = vmatpush3.bf16.msra.mxu1 %v8236_v31  ;;  %v8287_v31 = vld [vmem:[%s10744_s1 + $0x338] sm:$0xff]  }
  0x4e   :  { %7451 = vmatprep.subr.bf16.mxu1 %v8238_v33  ;;  %v8288_v32 = vld [vmem:[%s10744_s1 + $0x3b8] sm:$0xff]   ;;  %v1278_v33 = vrot.slane %v9112_v53, %v8920_v41  ;;  %v8307_v53 = vld [vmem:[%s10744_s1 + $0x4e0] sm:$0xff]  }
  0x50   :  { %7430 = vmatpush3.bf16.msra.mxu0 %v8239_v34  ;;  %v8290_v34 = vld [vmem:[%s10744_s1 + $0x440] sm:$0xff]  }
  0x51   :  { %7431 = vmatprep.subr.bf16.mxu0 %v8241_v36  ;;  %7452 = vmatpush3.bf16.msra.mxu1 %v8240_v35  ;;  %v8291_v35 = vld [vmem:[%s10744_s1 + $0x4c0] sm:$0xff]  }
  0x52   :  { %7453 = vmatprep.subr.bf16.mxu1 %v8242_v37  ;;  %v8292_v36 = vld [vmem:[%s10744_s1 + $0x400] sm:$0xff]  }
  0x53   :  { %v8293_v37 = vld [vmem:[%s10744_s1 + $0x480] sm:$0xff]  }
  0x54   :  { %7432 = vmatpush3.bf16.msra.mxu0 %v8243_v38  ;;  %v1294_v38 = vcombine.high %v1278_v33, %v1278_v33 }
  0x55   :  { %7433 = vmatprep.subr.bf16.mxu0 %v8245_v40  ;;  %7454 = vmatpush3.bf16.msra.mxu1 %v8244_v39  ;;  %v8294_v39 = vld [vmem:[%s10744_s1 + $0x448] sm:$0xff]  }
  0x56   :  { %7455 = vmatprep.subr.bf16.mxu1 %v8246_v42  ;;  %v8295_v40 = vld [vmem:[%s10744_s1 + $0x4c8] sm:$0xff]  }
  0x57   :  { %v8296_v42 = vld [vmem:[%s10744_s1 + $0x408] sm:$0xff]  }
  0x58   :  { %7434 = vmatpush3.bf16.msra.mxu0 %v8247_v43  ;;  %v8297_v43 = vld [vmem:[%s10744_s1 + $0x488] sm:$0xff]  }
  0x59   :  { %7435 = vmatprep.subr.bf16.mxu0 %v8249_v45  ;;  %7456 = vmatpush3.bf16.msra.mxu1 %v8248_v44  ;;  %v8298_v44 = vld [vmem:[%s10744_s1 + $0x450] sm:$0xff]  }
  0x5a   :  { %7457 = vmatprep.subr.bf16.mxu1 %v8250_v47  ;;  %v8299_v45 = vld [vmem:[%s10744_s1 + $0x4d0] sm:$0xff]  }
  0x5b   :  { %v8301_v47 = vld [vmem:[%s10744_s1 + $0x490] sm:$0xff]  }
  0x5c   :  { %7436 = vmatpush3.bf16.msra.mxu0 %v8251_v50  ;;  %v8304_v50 = vld [vmem:[%s10744_s1 + $0x418] sm:$0xff]  }
  0x5d   :  { %7437 = vmatprep.subr.bf16.mxu0 %v8253_v54  ;;  %7458 = vmatpush3.bf16.msra.mxu1 %v8252_v51  ;;  %v8305_v51 = vld [vmem:[%s10744_s1 + $0x498] sm:$0xff]   ;;  %v8308_v54 = vld [vmem:[%s10744_s1 + $0x420] sm:$0xff]  }
  0x5e   :  { %7459 = vmatprep.subr.bf16.mxu1 %v8254_v55  ;;  %v8309_v55 = vld [vmem:[%s10744_s1 + $0x4a0] sm:$0xff]  }
  0x60   :  { %7438 = vmatpush3.bf16.msra.mxu0 %v8255_v58  ;;  %v8312_v58 = vld [vmem:[%s10744_s1 + $0x428] sm:$0xff]  }
  0x61   :  { %7467 = vmatprep.subr.bf16.mxu0 %v8257_v62  ;;  %7460 = vmatpush3.bf16.msra.mxu1 %v8256_v59  ;;  %v8313_v59 = vld [vmem:[%s10744_s1 + $0x4a8] sm:$0xff]   ;;  %v8315_v62 = vld [vmem:[%s10744_s1 + $0x4f0] sm:$0xff]  }
  0x62   :  { %7489 = vmatprep.subr.bf16.mxu1 %v8258_v63 }
  0x63   :  { %5361 = vmatmul.mubr.bf16.vlgmr.msra.gmra.mrb[8].mxu0 %v1271_v61  ;;  %v24_v61 = vld [vmem:[%s10743_s0 + $0x10] sm:$0xff] }
  0x64   :  { %7468 = vmatpush3.bf16.msra.mxu0 %v8259_v1  ;;  %5440 = vmatprep.mubr.bf16.mxu0 %v1292_v0  ;;  %v1304_v63 = vrot.slane %v24_v61, %v8920_v41  ;;  %v1297_v0 = vcombine.high %v24_v61, %v24_v61  ;;  %v8316_v1 = vld [vmem:[%s10744_s1 + $0x430] sm:$0xff]  }
  0x65   :  { %5401 = vmatmul.mubr.bf16.vlgmr.msra.gmra.mrb[8].mxu1 %v1293_v3  ;;  %7469 = vmatprep.subr.bf16.mxu0 %v8261_v4  ;;  %v8365_v61 = vld [vmem:[%s10744_s1 + $0x610] sm:$0xff]  }
  0x66   :  { %7490 = vmatpush3.bf16.msra.mxu1 %v8260_v2  ;;  %5480 = vmatprep.mubr.bf16.mxu1 %v1296_v6  ;;  %v8317_v2 = vld [vmem:[%s10744_s1 + $0x4b0] sm:$0xff]   ;;  %v1312_v3 = vcombine.high %v1304_v63, %v1304_v63  ;;  %v9318_v4 = vrot.slane %v1297_v0, %v8920_v41  ;;  %v8319_v6 = vld [vmem:[%s10744_s1 + $0x4f8] sm:$0xff]  }
  0x67   :  { %7491 = vmatprep.subr.bf16.mxu1 %v8262_v5  ;;  %v8318_v5 = vld [vmem:[%s10744_s1 + $0x478] sm:$0xff]  }
  0x68   :  { %7470 = vmatpush3.bf16.msra.mxu0 %v8263_v7  ;;  %v1334_v7 = vrot.slane %v1312_v3, %v8920_v41  ;;  %v8368_v0 = vld [vmem:[%s10744_s1 + $0x6d8] sm:$0xff]   ;;  %v8371_v3 = vld [vmem:[%s10744_s1 + $0x660] sm:$0xff]  }
  0x69   :  { %7471 = vmatprep.subr.bf16.mxu0 %v8265_v9  ;;  %v8320_v9 = vld [vmem:[%s10744_s1 + $0x438] sm:$0xff]  }
  0x6a   :  { %7492 = vmatpush3.bf16.msra.mxu1 %v8264_v8  ;;  %v1313_v8 = vcombine.high %v9318_v4, %v9318_v4 }
  0x6b   :  { %7493 = vmatprep.subr.bf16.mxu1 %v8266_v10  ;;  %v8321_v10 = vld [vmem:[%s10744_s1 + $0x4b8] sm:$0xff]  }
  0x6c   :  { %7472 = vmatpush3.bf16.msra.mxu0 %v8267_v11  ;;  %v1344_v11 = vcombine.high %v1334_v7, %v1334_v7 }
  0x6d   :  { %7473 = vmatprep.subr.bf16.mxu0 %v8269_v13  ;;  %v8322_v13 = vld [vmem:[%s10744_s1 + $0x540] sm:$0xff]  }
  0x6e   :  { %7494 = vmatpush3.bf16.msra.mxu1 %v8268_v12  ;;  %v1320_v12 = vrot.slane %v1304_v63, %v8920_v41  ;;  %v8367_v63 = vld [vmem:[%s10744_s1 + $0x658] sm:$0xff]  }
  0x6f   :  { %7495 = vmatprep.subr.bf16.mxu1 %v8270_v14  ;;  %v8323_v14 = vld [vmem:[%s10744_s1 + $0x5c0] sm:$0xff]  }
  0x70   :  { %7474 = vmatpush3.bf16.msra.mxu0 %v8271_v15  ;;  %v1341_v15 = vrot.slane %v1313_v8, %v8920_v41  ;;  %v8376_v8 = vld [vmem:[%s10744_s1 + $0x6e8] sm:$0xff]  }
  0x71   :  { %7475 = vmatprep.subr.bf16.mxu0 %v8273_v17  ;;  %v8325_v17 = vld [vmem:[%s10744_s1 + $0x580] sm:$0xff]  }
  0x72   :  { %7496 = vmatpush3.bf16.msra.mxu1 %v8272_v16  ;;  %v8324_v16 = vld [vmem:[%s10744_s1 + $0x500] sm:$0xff]  }
  0x73   :  { %7497 = vmatprep.subr.bf16.mxu1 %v8274_v18  ;;  %v1342_v18 = vcombine.high %v1320_v12, %v1320_v12 }
  0x74   :  { %7476 = vmatpush3.bf16.msra.mxu0 %v8275_v19  ;;  %v8326_v19 = vld [vmem:[%s10744_s1 + $0x548] sm:$0xff]  }
  0x75   :  { %7477 = vmatprep.subr.bf16.mxu0 %v8277_v21  ;;  %v1345_v21 = vcombine.high %v1341_v15, %v1341_v15 }
  0x76   :  { %7498 = vmatpush3.bf16.msra.mxu1 %v8276_v20  ;;  %v8327_v20 = vld [vmem:[%s10744_s1 + $0x5c8] sm:$0xff]  }
  0x77   :  { %7499 = vmatprep.subr.bf16.mxu1 %v8278_v22  ;;  %v8328_v22 = vld [vmem:[%s10744_s1 + $0x508] sm:$0xff]  }
  0x78   :  { %7478 = vmatpush3.bf16.msra.mxu0 %v8279_v23  ;;  %v8329_v23 = vld [vmem:[%s10744_s1 + $0x588] sm:$0xff]  }
  0x79   :  { %7479 = vmatprep.subr.bf16.mxu0 %v8281_v25  ;;  %v8331_v25 = vld [vmem:[%s10744_s1 + $0x5d0] sm:$0xff]  }
  0x7a   :  { %7500 = vmatpush3.bf16.msra.mxu1 %v8280_v24  ;;  %v8330_v24 = vld [vmem:[%s10744_s1 + $0x550] sm:$0xff]  }
  0x7b   :  { %7501 = vmatprep.subr.bf16.mxu1 %v8282_v26  ;;  %v8332_v26 = vld [vmem:[%s10744_s1 + $0x510] sm:$0xff]  }
  0x7c   :  { %7480 = vmatpush3.bf16.msra.mxu0 %v8283_v27  ;;  %v8333_v27 = vld [vmem:[%s10744_s1 + $0x590] sm:$0xff]  }
  0x7d   :  { %7481 = vmatprep.subr.bf16.mxu0 %v8285_v29  ;;  %v8335_v29 = vld [vmem:[%s10744_s1 + $0x5d8] sm:$0xff]  }
  0x7e   :  { %7502 = vmatpush3.bf16.msra.mxu1 %v8284_v28  ;;  %v8334_v28 = vld [vmem:[%s10744_s1 + $0x558] sm:$0xff]  }
  0x7f   :  { %7503 = vmatprep.subr.bf16.mxu1 %v8286_v30  ;;  %v8336_v30 = vld [vmem:[%s10744_s1 + $0x518] sm:$0xff]  }
  0x80   :  { %7482 = vmatpush3.bf16.msra.mxu0 %v8287_v31  ;;  %v8337_v31 = vld [vmem:[%s10744_s1 + $0x598] sm:$0xff]  }
  0x81   :  { %7511 = vmatprep.subr.bf16.mxu0 %v8290_v34  ;;  %v8340_v34 = vld [vmem:[%s10744_s1 + $0x520] sm:$0xff]  }
  0x82   :  { %7504 = vmatpush3.bf16.msra.mxu1 %v8288_v32  ;;  %v8338_v32 = vld [vmem:[%s10744_s1 + $0x560] sm:$0xff]  }
  0x83   :  { %5441 = vmatmul.mubr.bf16.vlgmr.msra.gmra.mrb[12].mxu0 %v1278_v33  ;;  %7533 = vmatprep.subr.bf16.mxu1 %v8291_v35  ;;  %v8339_v33 = vld [vmem:[%s10744_s1 + $0x5e0] sm:$0xff]  }
  0x84   :  { %7512 = vmatpush3.bf16.msra.mxu0 %v8292_v36  ;;  %5520 = vmatprep.mubr.bf16.mxu0 %v1334_v7  ;;  %v8341_v35 = vld [vmem:[%s10744_s1 + $0x5a0] sm:$0xff]   ;;  %v8342_v36 = vld [vmem:[%s10744_s1 + $0x568] sm:$0xff]  }
  0x85   :  { %5481 = vmatmul.mubr.bf16.vlgmr.msra.gmra.mrb[12].mxu1 %v1294_v38  ;;  %7513 = vmatprep.subr.bf16.mxu0 %v8294_v39  ;;  %v8344_v38 = vld [vmem:[%s10744_s1 + $0x528] sm:$0xff]  }
  0x86   :  { %7534 = vmatpush3.bf16.msra.mxu1 %v8293_v37  ;;  %5560 = vmatprep.mubr.bf16.mxu1 %v1344_v11  ;;  %v8343_v37 = vld [vmem:[%s10744_s1 + $0x5e8] sm:$0xff]   ;;  %v8379_v11 = vld [vmem:[%s10744_s1 + $0x670] sm:$0xff]  }
  0x87   :  { %7535 = vmatprep.subr.bf16.mxu1 %v8295_v40  ;;  %v8345_v39 = vld [vmem:[%s10744_s1 + $0x5a8] sm:$0xff]   ;;  %v8346_v40 = vld [vmem:[%s10744_s1 + $0x570] sm:$0xff]  }
  0x88   :  { %7514 = vmatpush3.bf16.msra.mxu0 %v8296_v42  ;;  %v8347_v42 = vld [vmem:[%s10744_s1 + $0x5f0] sm:$0xff]   ;;  %v8375_v7 = vld [vmem:[%s10744_s1 + $0x668] sm:$0xff]  }
  0x89   :  { %7515 = vmatprep.subr.bf16.mxu0 %v8298_v44  ;;  %v8349_v44 = vld [vmem:[%s10744_s1 + $0x5b0] sm:$0xff]  }
  0x8a   :  { %7536 = vmatpush3.bf16.msra.mxu1 %v8297_v43  ;;  %v8348_v43 = vld [vmem:[%s10744_s1 + $0x530] sm:$0xff]  }
  0x8b   :  { %7537 = vmatprep.subr.bf16.mxu1 %v8299_v45  ;;  %v8350_v45 = vld [vmem:[%s10744_s1 + $0x578] sm:$0xff]  }
  0x8c   :  { %7516 = vmatpush3.bf16.msra.mxu0 %v8300_v46  ;;  %v8351_v46 = vld [vmem:[%s10744_s1 + $0x5f8] sm:$0xff]  }
  0x8d   :  { %7517 = vmatprep.subr.bf16.mxu0 %v8302_v48  ;;  %v8353_v48 = vld [vmem:[%s10744_s1 + $0x5b8] sm:$0xff]  }
  0x8e   :  { %7538 = vmatpush3.bf16.msra.mxu1 %v8301_v47  ;;  %v8352_v47 = vld [vmem:[%s10744_s1 + $0x538] sm:$0xff]  }
  0x8f   :  { %7539 = vmatprep.subr.bf16.mxu1 %v8303_v49  ;;  %v1327_v49 = vrot.slane %v9318_v4, %v8920_v41  ;;  %v8372_v4 = vld [vmem:[%s10744_s1 + $0x6e0] sm:$0xff]  }
  0x90   :  { %7518 = vmatpush3.bf16.msra.mxu0 %v8304_v50  ;;  %v8355_v50 = vld [vmem:[%s10744_s1 + $0x640] sm:$0xff]  }
  0x91   :  { %7519 = vmatprep.subr.bf16.mxu0 %v8306_v52  ;;  %v8357_v52 = vld [vmem:[%s10744_s1 + $0x600] sm:$0xff]  }
  0x92   :  { %7540 = vmatpush3.bf16.msra.mxu1 %v8305_v51  ;;  %v8356_v51 = vld [vmem:[%s10744_s1 + $0x6c0] sm:$0xff]  }
  0x93   :  { %7541 = vmatprep.subr.bf16.mxu1 %v8307_v53  ;;  %v8358_v53 = vld [vmem:[%s10744_s1 + $0x680] sm:$0xff]  }
  0x94   :  { %7520 = vmatpush3.bf16.msra.mxu0 %v8308_v54  ;;  %v1343_v54 = vcombine.high %v1327_v49, %v1327_v49 }
  0x95   :  { %7521 = vmatprep.subr.bf16.mxu0 %v8310_v56  ;;  %v8360_v56 = vld [vmem:[%s10744_s1 + $0x6c8] sm:$0xff]  }
  0x96   :  { %7542 = vmatpush3.bf16.msra.mxu1 %v8309_v55  ;;  %v8359_v55 = vld [vmem:[%s10744_s1 + $0x648] sm:$0xff]  }
  0x97   :  { %7543 = vmatprep.subr.bf16.mxu1 %v8311_v57  ;;  %v8361_v57 = vld [vmem:[%s10744_s1 + $0x608] sm:$0xff]  }
  0x98   :  { %7522 = vmatpush3.bf16.msra.mxu0 %v8312_v58  ;;  %v8362_v58 = vld [vmem:[%s10744_s1 + $0x688] sm:$0xff]  }
  0x99   :  { %7523 = vmatprep.subr.bf16.mxu0 %v8314_v60  ;;  %v8364_v60 = vld [vmem:[%s10744_s1 + $0x6d0] sm:$0xff]  }
  0x9a   :  { %7544 = vmatpush3.bf16.msra.mxu1 %v8313_v59  ;;  %v8363_v59 = vld [vmem:[%s10744_s1 + $0x650] sm:$0xff]  }
  0x9b   :  { %7545 = vmatprep.subr.bf16.mxu1 %v8315_v62  ;;  %v8366_v62 = vld [vmem:[%s10744_s1 + $0x690] sm:$0xff]  }
  0x9c   :  { %7524 = vmatpush3.bf16.msra.mxu0 %v8316_v1  ;;  %v8369_v1 = vld [vmem:[%s10744_s1 + $0x618] sm:$0xff]  }
  0x9d   :  { %7525 = vmatprep.subr.bf16.mxu0 %v8318_v5  ;;  %v8373_v5 = vld [vmem:[%s10744_s1 + $0x620] sm:$0xff]  }
  0x9e   :  { %7546 = vmatpush3.bf16.msra.mxu1 %v8317_v2  ;;  %v8370_v2 = vld [vmem:[%s10744_s1 + $0x698] sm:$0xff]  }
  0x9f   :  { %7547 = vmatprep.subr.bf16.mxu1 %v8319_v6  ;;  %v8374_v6 = vld [vmem:[%s10744_s1 + $0x6a0] sm:$0xff]  }
  0xa0   :  { %7526 = vmatpush3.bf16.msra.mxu0 %v8320_v9  ;;  %v8377_v9 = vld [vmem:[%s10744_s1 + $0x628] sm:$0xff]  }
  0xa1   :  { %7555 = vmatprep.subr.bf16.mxu0 %v8322_v13  ;;  %v8380_v13 = vld [vmem:[%s10744_s1 + $0x6f0] sm:$0xff]  }
  0xa2   :  { %7548 = vmatpush3.bf16.msra.mxu1 %v8321_v10  ;;  %v8378_v10 = vld [vmem:[%s10744_s1 + $0x6a8] sm:$0xff]  }
  0xa3   :  { %5521 = vmatmul.mubr.bf16.vlgmr.msra.gmra.mrb[16].mxu0 %v1320_v12  ;;  %7577 = vmatprep.subr.bf16.mxu1 %v8323_v14  ;;  %v25_v12 = vld [vmem:[%s10743_s0 + $0x18] sm:$0xff] }
  0xa4   :  { %7556 = vmatpush3.bf16.msra.mxu0 %v8324_v16  ;;  %5600 = vmatprep.mubr.bf16.mxu0 %v1341_v15  ;;  %v1353_v14 = vrot.slane %v25_v12, %v8920_v41  ;;  %v1346_v15 = vcombine.high %v25_v12, %v25_v12  ;;  %v8381_v16 = vld [vmem:[%s10744_s1 + $0x630] sm:$0xff]   ;;  %v8418_v12 = vld [vmem:[%s10744_s1 + $0x7b8] sm:$0xff]  }
  0xa5   :  { %5561 = vmatmul.mubr.bf16.vlgmr.msra.gmra.mrb[16].mxu1 %v1342_v18  ;;  %7557 = vmatprep.subr.bf16.mxu0 %v8326_v19 }
  0xa6   :  { %7578 = vmatpush3.bf16.msra.mxu1 %v8325_v17  ;;  %5640 = vmatprep.mubr.bf16.mxu1 %v1345_v21  ;;  %v8383_v17 = vld [vmem:[%s10744_s1 + $0x678] sm:$0xff]   ;;  %v1361_v18 = vcombine.high %v1353_v14, %v1353_v14  ;;  %v9524_v19 = vrot.slane %v1346_v15, %v8920_v41  ;;  %v8421_v15 = vld [vmem:[%s10744_s1 + $0x8c0] sm:$0xff]  }
  0xa7   :  { %7579 = vmatprep.subr.bf16.mxu1 %v8327_v20  ;;  %v8382_v20 = vld [vmem:[%s10744_s1 + $0x6b0] sm:$0xff]   ;;  %v8384_v21 = vld [vmem:[%s10744_s1 + $0x6f8] sm:$0xff]  }
  0xa8   :  { %7558 = vmatpush3.bf16.msra.mxu0 %v8328_v22  ;;  %v1383_v22 = vrot.slane %v1361_v18, %v8920_v41 }
  0xa9   :  { %7559 = vmatprep.subr.bf16.mxu0 %v8330_v24  ;;  %v8385_v24 = vld [vmem:[%s10744_s1 + $0x638] sm:$0xff]  }
  0xaa   :  { %7580 = vmatpush3.bf16.msra.mxu1 %v8329_v23  ;;  %v1362_v23 = vcombine.high %v9524_v19, %v9524_v19 }
  0xab   :  { %7581 = vmatprep.subr.bf16.mxu1 %v8331_v25  ;;  %v1393_v25 = vcombine.high %v1383_v22, %v1383_v22 }
  0xac   :  { %7560 = vmatpush3.bf16.msra.mxu0 %v8332_v26  ;;  %v1369_v26 = vrot.slane %v1353_v14, %v8920_v41  ;;  %v8420_v14 = vld [vmem:[%s10744_s1 + $0x840] sm:$0xff]  }
  0xad   :  { %7561 = vmatprep.subr.bf16.mxu0 %v8334_v28  ;;  %v8386_v28 = vld [vmem:[%s10744_s1 + $0x6b8] sm:$0xff]  }
  0xae   :  { %7582 = vmatpush3.bf16.msra.mxu1 %v8333_v27  ;;  %v8387_v27 = vld [vmem:[%s10744_s1 + $0x740] sm:$0xff]  }
  0xaf   :  { %7583 = vmatprep.subr.bf16.mxu1 %v8335_v29  ;;  %v1390_v29 = vrot.slane %v1362_v23, %v8920_v41  ;;  %v8428_v23 = vld [vmem:[%s10744_s1 + $0x850] sm:$0xff]  }
  0xb0   :  { %7562 = vmatpush3.bf16.msra.mxu0 %v8336_v30  ;;  %v8388_v30 = vld [vmem:[%s10744_s1 + $0x7c0] sm:$0xff]  }
  0xb1   :  { %7563 = vmatprep.subr.bf16.mxu0 %v8338_v32  ;;  %v1391_v32 = vcombine.high %v1369_v26, %v1369_v26 }
  0xb2   :  { %7584 = vmatpush3.bf16.msra.mxu1 %v8337_v31  ;;  %v8389_v31 = vld [vmem:[%s10744_s1 + $0x700] sm:$0xff]  }
  0xb3   :  { %7585 = vmatprep.subr.bf16.mxu1 %v8339_v33  ;;  %v8391_v33 = vld [vmem:[%s10744_s1 + $0x748] sm:$0xff]  }
  0xb4   :  { %7564 = vmatpush3.bf16.msra.mxu0 %v8340_v34  ;;  %v8390_v34 = vld [vmem:[%s10744_s1 + $0x780] sm:$0xff]  }
  0xb5   :  { %7565 = vmatprep.subr.bf16.mxu0 %v8342_v36  ;;  %v8392_v36 = vld [vmem:[%s10744_s1 + $0x7c8] sm:$0xff]  }
  0xb6   :  { %7586 = vmatpush3.bf16.msra.mxu1 %v8341_v35  ;;  %v1394_v35 = vcombine.high %v1390_v29, %v1390_v29 }
  0xb7   :  { %7587 = vmatprep.subr.bf16.mxu1 %v8343_v37  ;;  %v8393_v37 = vld [vmem:[%s10744_s1 + $0x708] sm:$0xff]  }
  0xb8   :  { %7566 = vmatpush3.bf16.msra.mxu0 %v8344_v38  ;;  %v8395_v38 = vld [vmem:[%s10744_s1 + $0x750] sm:$0xff]  }
  0xb9   :  { %7567 = vmatprep.subr.bf16.mxu0 %v8346_v40  ;;  %v8396_v40 = vld [vmem:[%s10744_s1 + $0x7d0] sm:$0xff]  }
  0xba   :  { %7588 = vmatpush3.bf16.msra.mxu1 %v8345_v39  ;;  %v8394_v39 = vld [vmem:[%s10744_s1 + $0x788] sm:$0xff]  }
  0xbb   :  { %7589 = vmatprep.subr.bf16.mxu1 %v8347_v42  ;;  %v8397_v42 = vld [vmem:[%s10744_s1 + $0x710] sm:$0xff]  }
  0xbc   :  { %7568 = vmatpush3.bf16.msra.mxu0 %v8348_v43  ;;  %v8399_v43 = vld [vmem:[%s10744_s1 + $0x758] sm:$0xff]  }
  0xbd   :  { %7569 = vmatprep.subr.bf16.mxu0 %v8350_v45  ;;  %v8400_v45 = vld [vmem:[%s10744_s1 + $0x7d8] sm:$0xff]  }
  0xbe   :  { %7590 = vmatpush3.bf16.msra.mxu1 %v8349_v44  ;;  %v8398_v44 = vld [vmem:[%s10744_s1 + $0x790] sm:$0xff]  }
  0xbf   :  { %7591 = vmatprep.subr.bf16.mxu1 %v8351_v46  ;;  %v8401_v46 = vld [vmem:[%s10744_s1 + $0x718] sm:$0xff]  }
  0xc0   :  { %7570 = vmatpush3.bf16.msra.mxu0 %v8352_v47  ;;  %v8402_v47 = vld [vmem:[%s10744_s1 + $0x798] sm:$0xff]  }
  0xc1   :  { %7599 = vmatprep.subr.bf16.mxu0 %v8355_v50  ;;  %v8405_v50 = vld [vmem:[%s10744_s1 + $0x720] sm:$0xff]  }
  0xc2   :  { %7592 = vmatpush3.bf16.msra.mxu1 %v8353_v48  ;;  %v8403_v48 = vld [vmem:[%s10744_s1 + $0x760] sm:$0xff]  }
  0xc3   :  { %5601 = vmatmul.mubr.bf16.vlgmr.msra.gmra.mrb[20].mxu0 %v1327_v49  ;;  %7621 = vmatprep.subr.bf16.mxu1 %v8356_v51  ;;  %v8404_v49 = vld [vmem:[%s10744_s1 + $0x7e0] sm:$0xff]  }
  0xc4   :  { %7600 = vmatpush3.bf16.msra.mxu0 %v8357_v52  ;;  %5680 = vmatprep.mubr.bf16.mxu0 %v1383_v22  ;;  %v8406_v51 = vld [vmem:[%s10744_s1 + $0x7a0] sm:$0xff]   ;;  %v8407_v52 = vld [vmem:[%s10744_s1 + $0x768] sm:$0xff]  }
  0xc5   :  { %5641 = vmatmul.mubr.bf16.vlgmr.msra.gmra.mrb[20].mxu1 %v1343_v54  ;;  %7601 = vmatprep.subr.bf16.mxu0 %v8359_v55  ;;  %v8409_v54 = vld [vmem:[%s10744_s1 + $0x728] sm:$0xff]  }
  0xc6   :  { %7622 = vmatpush3.bf16.msra.mxu1 %v8358_v53  ;;  %5720 = vmatprep.mubr.bf16.mxu1 %v1393_v25  ;;  %v8408_v53 = vld [vmem:[%s10744_s1 + $0x7e8] sm:$0xff]   ;;  %v8430_v25 = vld [vmem:[%s10744_s1 + $0x810] sm:$0xff]  }
  0xc7   :  { %7623 = vmatprep.subr.bf16.mxu1 %v8360_v56  ;;  %v8410_v55 = vld [vmem:[%s10744_s1 + $0x7a8] sm:$0xff]   ;;  %v6749_v56 = vld [vmem:[%s10745_s2] ss:$0 sm:$0xff] }
  0xc8   :  { %7602 = vmatpush3.bf16.msra.mxu0 %v8361_v57  ;;  %v8411_v57 = vld [vmem:[%s10744_s1 + $0x770] sm:$0xff]   ;;  %v8427_v22 = vld [vmem:[%s10744_s1 + $0x888] sm:$0xff]  }
  0xc9   :  { %7603 = vmatprep.subr.bf16.mxu0 %v8363_v59  ;;  %v8412_v59 = vld [vmem:[%s10744_s1 + $0x7f0] sm:$0xff]  }
  0xca   :  { %7624 = vmatpush3.bf16.msra.mxu1 %v8362_v58 }
  0xcb   :  { %7625 = vmatprep.subr.bf16.mxu1 %v8364_v60 }
  0xcc   :  { %7604 = vmatpush3.bf16.msra.mxu0 %v8365_v61  ;;  %v8413_v61 = vld [vmem:[%s10744_s1 + $0x730] sm:$0xff]  }
  0xcd   :  { %7605 = vmatprep.subr.bf16.mxu0 %v8367_v63 }
  0xce   :  { %7626 = vmatpush3.bf16.msra.mxu1 %v8366_v62 }
  0xcf   :  { %7627 = vmatprep.subr.bf16.mxu1 %v8368_v0 }
  0xd0   :  { %7606 = vmatpush3.bf16.msra.mxu0 %v8369_v1  ;;  %v8414_v1 = vld [vmem:[%s10744_s1 + $0x7b0] sm:$0xff]  }
  0xd1   :  { %7607 = vmatprep.subr.bf16.mxu0 %v8371_v3 }
  0xd2   :  { %7628 = vmatpush3.bf16.msra.mxu1 %v8370_v2  ;;  %v8415_v2 = vld [vmem:[%s10744_s1 + $0x778] sm:$0xff]  }
  0xd3   :  { %7629 = vmatprep.subr.bf16.mxu1 %v8372_v4 }
  0xd4   :  { %7608 = vmatpush3.bf16.msra.mxu0 %v8373_v5 }
  0xd5   :  { %7609 = vmatprep.subr.bf16.mxu0 %v8375_v7 }
  0xd6   :  { %7630 = vmatpush3.bf16.msra.mxu1 %v8374_v6 }
  0xd7   :  { %7631 = vmatprep.subr.bf16.mxu1 %v8376_v8  ;;  %v8416_v8 = vld [vmem:[%s10744_s1 + $0x7f8] sm:$0xff]  }
  0xd8   :  { %7610 = vmatpush3.bf16.msra.mxu0 %v8377_v9 }
  0xd9   :  { %7611 = vmatprep.subr.bf16.mxu0 %v8379_v11 }
  0xda   :  { %7632 = vmatpush3.bf16.msra.mxu1 %v8378_v10  ;;  %v8417_v10 = vld [vmem:[%s10744_s1 + $0x738] sm:$0xff]  }
  0xdb   :  { %7633 = vmatprep.subr.bf16.mxu1 %v8380_v13  ;;  %v1376_v13 = vrot.slane %v9524_v19, %v8920_v41  ;;  %v8424_v19 = vld [vmem:[%s10744_s1 + $0x848] sm:$0xff]  }
  0xdc   :  { %7612 = vmatpush3.bf16.msra.mxu0 %v8381_v16  ;;  %v8422_v16 = vld [vmem:[%s10744_s1 + $0x800] sm:$0xff]  }
  0xdd   :  { %7613 = vmatprep.subr.bf16.mxu0 %v8383_v17  ;;  %v8423_v17 = vld [vmem:[%s10744_s1 + $0x880] sm:$0xff]   ;;  %v1392_v18 = vcombine.high %v1376_v13, %v1376_v13 }
  0xde   :  { %7634 = vmatpush3.bf16.msra.mxu1 %v8382_v20  ;;  %v8425_v20 = vld [vmem:[%s10744_s1 + $0x8c8] sm:$0xff]  }
  0xdf   :  { %7635 = vmatprep.subr.bf16.mxu1 %v8384_v21  ;;  %v8426_v21 = vld [vmem:[%s10744_s1 + $0x808] sm:$0xff]  }
  0xe0   :  { %7614 = vmatpush3.bf16.msra.mxu0 %v8385_v24  ;;  %v8429_v24 = vld [vmem:[%s10744_s1 + $0x8d0] sm:$0xff]  }
  0xe1   :  { %7643 = vmatprep.subr.bf16.mxu0 %v8387_v27  ;;  %v8432_v27 = vld [vmem:[%s10744_s1 + $0x858] sm:$0xff]  }
  0xe2   :  { %7636 = vmatpush3.bf16.msra.mxu1 %v8386_v28  ;;  %v8433_v28 = vld [vmem:[%s10744_s1 + $0x8d8] sm:$0xff]  }
  0xe3   :  { %5681 = vmatmul.mubr.bf16.vlgmr.msra.gmra.mrb[24].mxu0 %v1369_v26  ;;  %7665 = vmatprep.subr.bf16.mxu1 %v8388_v30  ;;  %v8431_v26 = vld [vmem:[%s10744_s1 + $0x890] sm:$0xff]   ;;  %v8435_v30 = vld [vmem:[%s10744_s1 + $0x898] sm:$0xff]  }
  0xe4   :  { %7644 = vmatpush3.bf16.msra.mxu0 %v8389_v31  ;;  %5760 = vmatprep.mubr.bf16.mxu0 %v1390_v29  ;;  %v8434_v29 = vld [vmem:[%s10744_s1 + $0x818] sm:$0xff]   ;;  %v8436_v31 = vld [vmem:[%s10744_s1 + $0x860] sm:$0xff]  }
  0xe5   :  { %5721 = vmatmul.mubr.bf16.vlgmr.msra.gmra.mrb[24].mxu1 %v1391_v32  ;;  %7645 = vmatprep.subr.bf16.mxu0 %v8391_v33  ;;  %v8437_v32 = vld [vmem:[%s10744_s1 + $0x8e0] sm:$0xff]  }
  0xe6   :  { %7666 = vmatpush3.bf16.msra.mxu1 %v8390_v34  ;;  %5800 = vmatprep.mubr.bf16.mxu1 %v1394_v35  ;;  %v8438_v33 = vld [vmem:[%s10744_s1 + $0x820] sm:$0xff]   ;;  %v8440_v35 = vld [vmem:[%s10744_s1 + $0x868] sm:$0xff]  }
  0xe7   :  { %7667 = vmatprep.subr.bf16.mxu1 %v8392_v36  ;;  %v8439_v34 = vld [vmem:[%s10744_s1 + $0x8a0] sm:$0xff]   ;;  %v8441_v36 = vld [vmem:[%s10744_s1 + $0x8e8] sm:$0xff]  }
  0xe8   :  { %7646 = vmatpush3.bf16.msra.mxu0 %v8393_v37  ;;  %v8442_v37 = vld [vmem:[%s10744_s1 + $0x828] sm:$0xff]  }
  0xe9   :  { %7647 = vmatprep.subr.bf16.mxu0 %v8395_v38  ;;  %v8443_v38 = vld [vmem:[%s10744_s1 + $0x8a8] sm:$0xff]  }
  0xea   :  { %7668 = vmatpush3.bf16.msra.mxu1 %v8394_v39  ;;  %v8444_v39 = vld [vmem:[%s10744_s1 + $0x870] sm:$0xff]  }
  0xeb   :  { %7669 = vmatprep.subr.bf16.mxu1 %v8396_v40  ;;  %v8445_v40 = vld [vmem:[%s10744_s1 + $0x8f0] sm:$0xff]  }
  0xec   :  { %7648 = vmatpush3.bf16.msra.mxu0 %v8397_v42 }
  0xed   :  { %7649 = vmatprep.subr.bf16.mxu0 %v8399_v43  ;;  %v8446_v43 = vld [vmem:[%s10744_s1 + $0x830] sm:$0xff]  }
  0xee   :  { %7670 = vmatpush3.bf16.msra.mxu1 %v8398_v44 }
  0xef   :  { %7671 = vmatprep.subr.bf16.mxu1 %v8400_v45  ;;  %v26_v45 = vld [vmem:[%s10743_s0 + $0x20] sm:$0xff] }
  0xf0   :  { %7650 = vmatpush3.bf16.msra.mxu0 %v8401_v46 }
  0xf1   :  { %7651 = vmatprep.subr.bf16.mxu0 %v8403_v48 }
  0xf2   :  { %7672 = vmatpush3.bf16.msra.mxu1 %v8402_v47 }
  0xf3   :  { %7673 = vmatprep.subr.bf16.mxu1 %v8404_v49  ;;  %v8447_v49 = vld [vmem:[%s10744_s1 + $0x8b0] sm:$0xff]  }
  0xf4   :  { %7652 = vmatpush3.bf16.msra.mxu0 %v8405_v50  ;;  %v8448_v50 = vld [vmem:[%s10744_s1 + $0x878] sm:$0xff]  }
  0xf5   :  { %7653 = vmatprep.subr.bf16.mxu0 %v8407_v52  ;;  %v1395_v52 = vcombine.high %v26_v45, %v26_v45 }
  0xf6   :  { %7674 = vmatpush3.bf16.msra.mxu1 %v8406_v51  ;;  %v7351_v58 = vpop.f32.mrb[0].mxu0  ;;  %v1402_v51 = vrot.slane %v26_v45, %v8920_v41 }
  0xf7   :  { %v7352_v60 = vpop.f32.mrb[1].mxu0  ;;  %7675 = vmatprep.subr.bf16.mxu1 %v8408_v53  ;;  %v7373_v62 = vpop.f32.mrb[0].mxu1 }
  0xf8   :  { %v7353_v63 = vadd.f32 %v7352_v60, %v7351_v58  ;;  %v7354_v0 = vpop.f32.mrb[2].mxu0  ;;  %7654 = vmatpush3.bf16.msra.mxu0 %v8409_v54  ;;  %v7374_v3 = vpop.f32.mrb[1].mxu1  ;;  %v8449_v58 = vld [vmem:[%s10744_s1 + $0x8f8] sm:$0xff]  }
  0xf9   :  { %v7355_v4 = vpop.f32.mrb[3].mxu0  ;;  %7655 = vmatprep.subr.bf16.mxu0 %v8411_v57  ;;  %v7375_v6 = vadd.f32 %v7374_v3, %v7373_v62  ;;  %v7376_v7 = vpop.f32.mrb[2].mxu1  ;;  %v9745_v62 = vrot.slane %v1395_v52, %v8920_v41  ;;  %v8451_v0 = vld [vmem:[%s10744_s1 + $0x8b8] sm:$0xff]   ;;  %v8452_v3 = vld [vmem:[%s10744_s1 + $0x940] sm:$0xff]  }
  0xfa   :  { %v5203_v5 = vadd.f32 %v7353_v63, %v6749_v56  ;;  %7676 = vmatpush3.bf16.msra.mxu1 %v8410_v55  ;;  %v7377_v9 = vpop.f32.mrb[3].mxu1  ;;  %v8454_v7 = vld [vmem:[%s10744_s1 + $0x900] sm:$0xff]   ;;  %v8483_v52 = vld [vmem:[%s10744_s1 + $0x9b8] sm:$0xff]  }
  0xfb   :  { %7677 = vmatprep.subr.bf16.mxu1 %v8412_v59  ;;  %v1410_v59 = vcombine.high %v1402_v51, %v1402_v51  ;;  %v1411_v4 = vcombine.high %v9745_v62, %v9745_v62  ;;  %v8455_v9 = vld [vmem:[%s10744_s1 + $0x980] sm:$0xff]  }
  0xfc   :  { %v9639_v11 = vadd.f32 %v7375_v6, %v5203_v5  ;;  %7656 = vmatpush3.bf16.msra.mxu0 %v8413_v61  ;;  %v8450_v61 = vld [vmem:[%s10744_s1 + $0x838] sm:$0xff]   ;;  %v8453_v6 = vld [vmem:[%s10744_s1 + $0x9c0] sm:$0xff]  }
  0xfd   :  { %7657 = vmatprep.subr.bf16.mxu0 %v8415_v2  ;;  %v1418_v2 = vrot.slane %v1402_v51, %v8920_v41 }
  0xfe   :  { %7678 = vmatpush3.bf16.msra.mxu1 %v8414_v1  ;;  %v1432_v1 = vrot.slane %v1410_v59, %v8920_v41  ;;  %v8489_v59 = vld [vmem:[%s10744_s1 + $0xa48] sm:$0xff]  }
  0xff   :  { %7679 = vmatprep.subr.bf16.mxu1 %v8416_v8  ;;  %v1439_v8 = vrot.slane %v1411_v4, %v8920_v41  ;;  %v8498_v4 = vld [vmem:[%s10744_s1 + $0xad8] sm:$0xff]  }
 0x100   :  { %7658 = vmatpush3.bf16.msra.mxu0 %v8417_v10  ;;  %v1442_v5 = vcombine.high %v1432_v1, %v1432_v1  ;;  %v1440_v10 = vcombine.high %v1418_v2, %v1418_v2 }
 0x101   :  { %7687 = vmatprep.subr.bf16.mxu0 %v8420_v14  ;;  %v8458_v14 = vld [vmem:[%s10744_s1 + $0x908] sm:$0xff]  }
 0x102   :  { %7680 = vmatpush3.bf16.msra.mxu1 %v8418_v12  ;;  %v8457_v12 = vld [vmem:[%s10744_s1 + $0x9c8] sm:$0xff]  }
 0x103   :  { %5761 = vmatmul.mubr.bf16.vlgmr.msra.gmra.mrb[28].mxu0 %v1376_v13  ;;  %7709 = vmatprep.subr.bf16.mxu1 %v8421_v15  ;;  %v1443_v13 = vcombine.high %v1439_v8, %v1439_v8  ;;  %v8459_v15 = vld [vmem:[%s10744_s1 + $0x988] sm:$0xff]  }
 0x104   :  { %7688 = vmatpush3.bf16.msra.mxu0 %v8422_v16  ;;  %5840 = vmatprep.mubr.bf16.mxu0 %v1432_v1  ;;  %v8460_v16 = vld [vmem:[%s10744_s1 + $0x950] sm:$0xff]  }
 0x105   :  { %5801 = vmatmul.mubr.bf16.vlgmr.msra.gmra.mrb[28].mxu1 %v1392_v18  ;;  %7689 = vmatprep.subr.bf16.mxu0 %v8424_v19  ;;  %v8462_v18 = vld [vmem:[%s10744_s1 + $0x910] sm:$0xff]  }
 0x106   :  { %7710 = vmatpush3.bf16.msra.mxu1 %v8423_v17  ;;  %5880 = vmatprep.mubr.bf16.mxu1 %v1442_v5  ;;  %v8461_v17 = vld [vmem:[%s10744_s1 + $0x9d0] sm:$0xff]   ;;  %v8499_v5 = vld [vmem:[%s10744_s1 + $0xa18] sm:$0xff]  }
 0x107   :  { %7711 = vmatprep.subr.bf16.mxu1 %v8425_v20  ;;  %v8463_v19 = vld [vmem:[%s10744_s1 + $0x990] sm:$0xff]   ;;  %v8464_v20 = vld [vmem:[%s10744_s1 + $0x958] sm:$0xff]  }
 0x108   :  { %7690 = vmatpush3.bf16.msra.mxu0 %v8426_v21  ;;  %v8465_v21 = vld [vmem:[%s10744_s1 + $0x9d8] sm:$0xff]   ;;  %v8495_v1 = vld [vmem:[%s10744_s1 + $0xa10] sm:$0xff]  }
 0x109   :  { %7691 = vmatprep.subr.bf16.mxu0 %v8428_v23  ;;  %v8467_v23 = vld [vmem:[%s10744_s1 + $0x998] sm:$0xff]  }
 0x10a   :  { %7712 = vmatpush3.bf16.msra.mxu1 %v8427_v22  ;;  %v8466_v22 = vld [vmem:[%s10744_s1 + $0x918] sm:$0xff]  }
 0x10b   :  { %7713 = vmatprep.subr.bf16.mxu1 %v8429_v24  ;;  %v8468_v24 = vld [vmem:[%s10744_s1 + $0x960] sm:$0xff]  }
 0x10c   :  { %7692 = vmatpush3.bf16.msra.mxu0 %v8430_v25  ;;  %v8469_v25 = vld [vmem:[%s10744_s1 + $0x9e0] sm:$0xff]  }
 0x10d   :  { %7693 = vmatprep.subr.bf16.mxu0 %v8432_v27  ;;  %v8471_v27 = vld [vmem:[%s10744_s1 + $0x9a0] sm:$0xff]  }
 0x10e   :  { %7714 = vmatpush3.bf16.msra.mxu1 %v8431_v26  ;;  %v8470_v26 = vld [vmem:[%s10744_s1 + $0x920] sm:$0xff]  }
 0x10f   :  { %7715 = vmatprep.subr.bf16.mxu1 %v8433_v28  ;;  %v8472_v28 = vld [vmem:[%s10744_s1 + $0x968] sm:$0xff]  }
 0x110   :  { %7694 = vmatpush3.bf16.msra.mxu0 %v8434_v29  ;;  %v8473_v29 = vld [vmem:[%s10744_s1 + $0x9e8] sm:$0xff]  }
 0x111   :  { %7695 = vmatprep.subr.bf16.mxu0 %v8436_v31  ;;  %v8475_v31 = vld [vmem:[%s10744_s1 + $0x9a8] sm:$0xff]  }
 0x112   :  { %7716 = vmatpush3.bf16.msra.mxu1 %v8435_v30  ;;  %v8474_v30 = vld [vmem:[%s10744_s1 + $0x928] sm:$0xff]  }
 0x113   :  { %7717 = vmatprep.subr.bf16.mxu1 %v8437_v32  ;;  %v8476_v32 = vld [vmem:[%s10744_s1 + $0x970] sm:$0xff]  }
 0x114   :  { %7696 = vmatpush3.bf16.msra.mxu0 %v8438_v33 }
 0x115   :  { %7697 = vmatprep.subr.bf16.mxu0 %v8440_v35 }
 0x116   :  { %7718 = vmatpush3.bf16.msra.mxu1 %v8439_v34  ;;  %v7395_v42 = vpop.f32.mrb[4].mxu0  ;;  %v8477_v34 = vld [vmem:[%s10744_s1 + $0x9f0] sm:$0xff]  }
 0x117   :  { %v7396_v44 = vpop.f32.mrb[5].mxu0  ;;  %7719 = vmatprep.subr.bf16.mxu1 %v8441_v36  ;;  %v7417_v46 = vpop.f32.mrb[4].mxu1  ;;  %v8478_v36 = vld [vmem:[%s10744_s1 + $0x930] sm:$0xff]  }
 0x118   :  { %v7397_v47 = vadd.f32 %v7396_v44, %v7395_v42  ;;  %v7398_v48 = vpop.f32.mrb[6].mxu0  ;;  %7698 = vmatpush3.bf16.msra.mxu0 %v8442_v37  ;;  %v7418_v53 = vpop.f32.mrb[5].mxu1  ;;  %v8480_v42 = vld [vmem:[%s10744_s1 + $0x978] sm:$0xff]  }
 0x119   :  { %v7399_v54 = vpop.f32.mrb[7].mxu0  ;;  %7699 = vmatprep.subr.bf16.mxu0 %v8444_v39  ;;  %v7419_v56 = vadd.f32 %v7418_v53, %v7417_v46  ;;  %v7420_v57 = vpop.f32.mrb[6].mxu1  ;;  %v8481_v48 = vld [vmem:[%s10744_s1 + $0x9f8] sm:$0xff]   ;;  %v1425_v53 = vrot.slane %v9745_v62, %v8920_v41  ;;  %v8492_v62 = vld [vmem:[%s10744_s1 + $0xa88] sm:$0xff]  }
 0x11a   :  { %v5283_v55 = vadd.f32 %v7397_v47, %v9639_v11  ;;  %7720 = vmatpush3.bf16.msra.mxu1 %v8443_v38  ;;  %v7421_v60 = vpop.f32.mrb[7].mxu1  ;;  %v8456_v11 = vld [vmem:[%s10744_s1 + $0x948] sm:$0xff]   ;;  %v8485_v54 = vld [vmem:[%s10744_s1 + $0xa40] sm:$0xff]  }
 0x11b   :  { %7721 = vmatprep.subr.bf16.mxu1 %v8445_v40  ;;  %v8479_v40 = vld [vmem:[%s10744_s1 + $0x9b0] sm:$0xff]   ;;  %v8488_v57 = vld [vmem:[%s10744_s1 + $0xa80] sm:$0xff]   ;;  %v8490_v60 = vld [vmem:[%s10744_s1 + $0xac8] sm:$0xff]  }
 0x11c   :  { %v9747_v63 = vadd.f32 %v7419_v56, %v5283_v55  ;;  %7700 = vmatpush3.bf16.msra.mxu0 %v8446_v43  ;;  %v8486_v55 = vld [vmem:[%s10744_s1 + $0xac0] sm:$0xff]  }
 0x11d   :  { %7701 = vmatprep.subr.bf16.mxu0 %v8448_v50  ;;  %v8482_v50 = vld [vmem:[%s10744_s1 + $0x938] sm:$0xff]   ;;  %v8487_v56 = vld [vmem:[%s10744_s1 + $0xa00] sm:$0xff]  }
 0x11e   :  { %7722 = vmatpush3.bf16.msra.mxu1 %v8447_v49 }
 0x11f   :  { %7723 = vmatprep.subr.bf16.mxu1 %v8449_v58  ;;  %v1441_v58 = vcombine.high %v1425_v53, %v1425_v53 }
 0x120   :  { %7702 = vmatpush3.bf16.msra.mxu0 %v8450_v61  ;;  %v8491_v61 = vld [vmem:[%s10744_s1 + $0xa08] sm:$0xff]  }
 0x121   :  { %7731 = vmatprep.subr.bf16.mxu0 %v8452_v3  ;;  %v8497_v3 = vld [vmem:[%s10744_s1 + $0xa58] sm:$0xff]  }
 0x122   :  { %7724 = vmatpush3.bf16.msra.mxu1 %v8451_v0  ;;  %v8494_v0 = vld [vmem:[%s10744_s1 + $0xad0] sm:$0xff]  }
 0x123   :  { %5841 = vmatmul.mubr.bf16.vlgmr.msra.gmra.mrb[32].mxu0 %v1418_v2  ;;  %7753 = vmatprep.subr.bf16.mxu1 %v8453_v6  ;;  %v8496_v2 = vld [vmem:[%s10744_s1 + $0xa90] sm:$0xff]   ;;  %v8500_v6 = vld [vmem:[%s10744_s1 + $0xa98] sm:$0xff]  }
 0x124   :  { %7732 = vmatpush3.bf16.msra.mxu0 %v8454_v7  ;;  %5920 = vmatprep.mubr.bf16.mxu0 %v1439_v8  ;;  %v8501_v7 = vld [vmem:[%s10744_s1 + $0xa60] sm:$0xff]  }
 0x125   :  { %5881 = vmatmul.mubr.bf16.vlgmr.msra.gmra.mrb[32].mxu1 %v1440_v10  ;;  %7733 = vmatprep.subr.bf16.mxu0 %v8456_v11  ;;  %v8502_v8 = vld [vmem:[%s10744_s1 + $0xae0] sm:$0xff]   ;;  %v8505_v11 = vld [vmem:[%s10744_s1 + $0xa68] sm:$0xff]  }
 0x126   :  { %7754 = vmatpush3.bf16.msra.mxu1 %v8455_v9  ;;  %5960 = vmatprep.mubr.bf16.mxu1 %v1443_v13  ;;  %v8503_v9 = vld [vmem:[%s10744_s1 + $0xa20] sm:$0xff]   ;;  %v8507_v13 = vld [vmem:[%s10744_s1 + $0xa28] sm:$0xff]  }
 0x127   :  { %7755 = vmatprep.subr.bf16.mxu1 %v8457_v12  ;;  %v8504_v10 = vld [vmem:[%s10744_s1 + $0xaa0] sm:$0xff]   ;;  %v8506_v12 = vld [vmem:[%s10744_s1 + $0xae8] sm:$0xff]  }
 0x128   :  { %7734 = vmatpush3.bf16.msra.mxu0 %v8458_v14  ;;  %v8508_v14 = vld [vmem:[%s10744_s1 + $0xaa8] sm:$0xff]  }
 0x129   :  { %7735 = vmatprep.subr.bf16.mxu0 %v8460_v16 }
 0x12a   :  { %7756 = vmatpush3.bf16.msra.mxu1 %v8459_v15  ;;  %v8509_v15 = vld [vmem:[%s10744_s1 + $0xa70] sm:$0xff]  }
 0x12b   :  { %7757 = vmatprep.subr.bf16.mxu1 %v8461_v17  ;;  %v8510_v17 = vld [vmem:[%s10744_s1 + $0xaf0] sm:$0xff]  }
 0x12c   :  { %7736 = vmatpush3.bf16.msra.mxu0 %v8462_v18 }
 0x12d   :  { %7737 = vmatprep.subr.bf16.mxu0 %v8464_v20 }
 0x12e   :  { %7758 = vmatpush3.bf16.msra.mxu1 %v8463_v19  ;;  %v8511_v19 = vld [vmem:[%s10744_s1 + $0xa30] sm:$0xff]  }
 0x12f   :  { %7759 = vmatprep.subr.bf16.mxu1 %v8465_v21 }
 0x130   :  { %7738 = vmatpush3.bf16.msra.mxu0 %v8466_v22 }
 0x131   :  { %7739 = vmatprep.subr.bf16.mxu0 %v8468_v24  ;;  %v8513_v24 = vld [vmem:[%s10744_s1 + $0xa78] sm:$0xff]  }
 0x132   :  { %7760 = vmatpush3.bf16.msra.mxu1 %v8467_v23  ;;  %v8512_v23 = vld [vmem:[%s10744_s1 + $0xab0] sm:$0xff]  }
 0x133   :  { %7761 = vmatprep.subr.bf16.mxu1 %v8469_v25  ;;  %v27_v25 = vld [vmem:[%s10743_s0 + $0x28] sm:$0xff] }
 0x134   :  { %7740 = vmatpush3.bf16.msra.mxu0 %v8470_v26 }
 0x135   :  { %7741 = vmatprep.subr.bf16.mxu0 %v8472_v28  ;;  %v1451_v28 = vrot.slane %v27_v25, %v8920_v41 }
 0x136   :  { %7762 = vmatpush3.bf16.msra.mxu1 %v8471_v27  ;;  %v7439_v33 = vpop.f32.mrb[8].mxu0 }
 0x137   :  { %v7440_v35 = vpop.f32.mrb[9].mxu0  ;;  %7763 = vmatprep.subr.bf16.mxu1 %v8473_v29  ;;  %v1444_v29 = vcombine.high %v27_v25, %v27_v25  ;;  %v8547_v25 = vld [vmem:[%s10744_s1 + $0xb38] sm:$0xff]  }
 0x138   :  { %v7461_v37 = vpop.f32.mrb[8].mxu1  ;;  %v7441_v38 = vadd.f32 %v7440_v35, %v7439_v33  ;;  %v7442_v39 = vpop.f32.mrb[10].mxu0  ;;  %7742 = vmatpush3.bf16.msra.mxu0 %v8474_v30  ;;  %v8514_v33 = vld [vmem:[%s10744_s1 + $0xaf8] sm:$0xff]  }
 0x139   :  { %v7462_v43 = vpop.f32.mrb[9].mxu1  ;;  %v7443_v44 = vpop.f32.mrb[11].mxu0  ;;  %7743 = vmatprep.subr.bf16.mxu0 %v8476_v32  ;;  %v8515_v35 = vld [vmem:[%s10744_s1 + $0xa38] sm:$0xff]  }
 0x13a   :  { %v5363_v45 = vadd.f32 %v7441_v38, %v9747_v63  ;;  %v7463_v46 = vadd.f32 %v7462_v43, %v7461_v37  ;;  %v7464_v47 = vpop.f32.mrb[10].mxu1  ;;  %7764 = vmatpush3.bf16.msra.mxu1 %v8475_v31  ;;  %v8493_v63 = vld [vmem:[%s10744_s1 + $0xa50] sm:$0xff]   ;;  %v9957_v37 = vrot.slane %v1444_v29, %v8920_v41  ;;  %v8516_v39 = vld [vmem:[%s10744_s1 + $0xab8] sm:$0xff]   ;;  %v8517_v43 = vld [vmem:[%s10744_s1 + $0xb40] sm:$0xff]  }
 0x13b   :  { %v7465_v49 = vpop.f32.mrb[11].mxu1  ;;  %7765 = vmatprep.subr.bf16.mxu1 %v8477_v34  ;;  %v8519_v47 = vld [vmem:[%s10744_s1 + $0xb00] sm:$0xff]  }
 0x13c   :  { %v9851_v51 = vadd.f32 %v7463_v46, %v5363_v45  ;;  %7744 = vmatpush3.bf16.msra.mxu0 %v8478_v36  ;;  %v1459_v36 = vcombine.high %v1451_v28, %v1451_v28  ;;  %v1460_v44 = vcombine.high %v9957_v37, %v9957_v37  ;;  %v8518_v45 = vld [vmem:[%s10744_s1 + $0xbc0] sm:$0xff]  }
 0x13d   :  { %7745 = vmatprep.subr.bf16.mxu0 %v8480_v42  ;;  %v1467_v42 = vrot.slane %v1451_v28, %v8920_v41  ;;  %v8520_v49 = vld [vmem:[%s10744_s1 + $0xb80] sm:$0xff]   ;;  %v1474_v28 = vrot.slane %v9957_v37, %v8920_v41  ;;  %v8557_v37 = vld [vmem:[%s10744_s1 + $0xc88] sm:$0xff]  }
 0x13e   :  { %7766 = vmatpush3.bf16.msra.mxu1 %v8479_v40  ;;  %v1481_v40 = vrot.slane %v1459_v36, %v8920_v41  ;;  %v8550_v29 = vld [vmem:[%s10744_s1 + $0xc40] sm:$0xff]   ;;  %v8556_v36 = vld [vmem:[%s10744_s1 + $0xc08] sm:$0xff]  }
 0x13f   :  { %7767 = vmatprep.subr.bf16.mxu1 %v8481_v48  ;;  %v1488_v48 = vrot.slane %v1460_v44, %v8920_v41  ;;  %v8563_v44 = vld [vmem:[%s10744_s1 + $0xcd8] sm:$0xff]  }
 0x140   :  { %7746 = vmatpush3.bf16.msra.mxu0 %v8482_v50  ;;  %v1491_v46 = vcombine.high %v1481_v40, %v1481_v40  ;;  %v1489_v50 = vcombine.high %v1467_v42, %v1467_v42 }
 0x141   :  { %7775 = vmatprep.subr.bf16.mxu0 %v8485_v54  ;;  %v8523_v54 = vld [vmem:[%s10744_s1 + $0xb08] sm:$0xff]  }
 0x142   :  { %7768 = vmatpush3.bf16.msra.mxu1 %v8483_v52  ;;  %v8522_v52 = vld [vmem:[%s10744_s1 + $0xbc8] sm:$0xff]  }
 0x143   :  { %5921 = vmatmul.mubr.bf16.vlgmr.msra.gmra.mrb[36].mxu0 %v1425_v53  ;;  %7797 = vmatprep.subr.bf16.mxu1 %v8486_v55  ;;  %v1492_v53 = vcombine.high %v1488_v48, %v1488_v48  ;;  %v8524_v55 = vld [vmem:[%s10744_s1 + $0xb88] sm:$0xff]  }
 0x144   :  { %7776 = vmatpush3.bf16.msra.mxu0 %v8487_v56  ;;  %6000 = vmatprep.mubr.bf16.mxu0 %v1481_v40  ;;  %v8525_v56 = vld [vmem:[%s10744_s1 + $0xb50] sm:$0xff]  }
 0x145   :  { %5961 = vmatmul.mubr.bf16.vlgmr.msra.gmra.mrb[36].mxu1 %v1441_v58  ;;  %7777 = vmatprep.subr.bf16.mxu0 %v8489_v59  ;;  %v8527_v58 = vld [vmem:[%s10744_s1 + $0xb10] sm:$0xff]  }
 0x146   :  { %7798 = vmatpush3.bf16.msra.mxu1 %v8488_v57  ;;  %6040 = vmatprep.mubr.bf16.mxu1 %v1491_v46  ;;  %v8526_v57 = vld [vmem:[%s10744_s1 + $0xbd0] sm:$0xff]   ;;  %v8565_v46 = vld [vmem:[%s10744_s1 + $0xc98] sm:$0xff]  }
 0x147   :  { %7799 = vmatprep.subr.bf16.mxu1 %v8490_v60  ;;  %v8528_v59 = vld [vmem:[%s10744_s1 + $0xb90] sm:$0xff]   ;;  %v8529_v60 = vld [vmem:[%s10744_s1 + $0xb58] sm:$0xff]  }
 0x148   :  { %7778 = vmatpush3.bf16.msra.mxu0 %v8491_v61  ;;  %v8530_v61 = vld [vmem:[%s10744_s1 + $0xbd8] sm:$0xff]   ;;  %v8560_v40 = vld [vmem:[%s10744_s1 + $0xc10] sm:$0xff]  }
 0x149   :  { %7779 = vmatprep.subr.bf16.mxu0 %v8493_v63  ;;  %v8532_v63 = vld [vmem:[%s10744_s1 + $0xb98] sm:$0xff]  }
 0x14a   :  { %7800 = vmatpush3.bf16.msra.mxu1 %v8492_v62  ;;  %v8531_v62 = vld [vmem:[%s10744_s1 + $0xb18] sm:$0xff]  }
 0x14b   :  { %7801 = vmatprep.subr.bf16.mxu1 %v8494_v0  ;;  %v8533_v0 = vld [vmem:[%s10744_s1 + $0xb60] sm:$0xff]  }
 0x14c   :  { %7780 = vmatpush3.bf16.msra.mxu0 %v8495_v1  ;;  %v8534_v1 = vld [vmem:[%s10744_s1 + $0xbe0] sm:$0xff]  }
 0x14d   :  { %7781 = vmatprep.subr.bf16.mxu0 %v8497_v3  ;;  %v8536_v3 = vld [vmem:[%s10744_s1 + $0xba0] sm:$0xff]  }
 0x14e   :  { %7802 = vmatpush3.bf16.msra.mxu1 %v8496_v2  ;;  %v8535_v2 = vld [vmem:[%s10744_s1 + $0xb20] sm:$0xff]  }
 0x14f   :  { %7803 = vmatprep.subr.bf16.mxu1 %v8498_v4  ;;  %v8537_v4 = vld [vmem:[%s10744_s1 + $0xb68] sm:$0xff]  }
 0x150   :  { %7782 = vmatpush3.bf16.msra.mxu0 %v8499_v5  ;;  %v8538_v5 = vld [vmem:[%s10744_s1 + $0xbe8] sm:$0xff]  }
 0x151   :  { %7783 = vmatprep.subr.bf16.mxu0 %v8501_v7  ;;  %v8540_v7 = vld [vmem:[%s10744_s1 + $0xba8] sm:$0xff]  }
 0x152   :  { %7804 = vmatpush3.bf16.msra.mxu1 %v8500_v6  ;;  %v8539_v6 = vld [vmem:[%s10744_s1 + $0xb28] sm:$0xff]  }
 0x153   :  { %7805 = vmatprep.subr.bf16.mxu1 %v8502_v8  ;;  %v8541_v8 = vld [vmem:[%s10744_s1 + $0xb70] sm:$0xff]  }
 0x154   :  { %7784 = vmatpush3.bf16.msra.mxu0 %v8503_v9 }
 0x155   :  { %7785 = vmatprep.subr.bf16.mxu0 %v8505_v11 }
 0x156   :  { %7806 = vmatpush3.bf16.msra.mxu1 %v8504_v10  ;;  %v7483_v16 = vpop.f32.mrb[12].mxu0  ;;  %v8542_v10 = vld [vmem:[%s10744_s1 + $0xbf0] sm:$0xff]  }
 0x157   :  { %v7484_v18 = vpop.f32.mrb[13].mxu0  ;;  %7807 = vmatprep.subr.bf16.mxu1 %v8506_v12  ;;  %v8543_v12 = vld [vmem:[%s10744_s1 + $0xb30] sm:$0xff]  }
 0x158   :  { %v7505_v20 = vpop.f32.mrb[12].mxu1  ;;  %v7485_v21 = vadd.f32 %v7484_v18, %v7483_v16  ;;  %v7486_v22 = vpop.f32.mrb[14].mxu0  ;;  %7786 = vmatpush3.bf16.msra.mxu0 %v8507_v13  ;;  %v8544_v16 = vld [vmem:[%s10744_s1 + $0xbb0] sm:$0xff]  }
 0x159   :  { %v7506_v26 = vpop.f32.mrb[13].mxu1  ;;  %v7487_v27 = vpop.f32.mrb[15].mxu0  ;;  %7787 = vmatprep.subr.bf16.mxu0 %v8509_v15 }
 0x15a   :  { %v5443_v30 = vadd.f32 %v7485_v21, %v9851_v51  ;;  %v7507_v31 = vadd.f32 %v7506_v26, %v7505_v20  ;;  %v7508_v32 = vpop.f32.mrb[14].mxu1  ;;  %7808 = vmatpush3.bf16.msra.mxu1 %v8508_v14  ;;  %v8521_v51 = vld [vmem:[%s10744_s1 + $0xb48] sm:$0xff]   ;;  %v8548_v27 = vld [vmem:[%s10744_s1 + $0xbb8] sm:$0xff]  }
 0x15b   :  { %v7509_v34 = vpop.f32.mrb[15].mxu1  ;;  %7809 = vmatprep.subr.bf16.mxu1 %v8510_v17  ;;  %v8545_v17 = vld [vmem:[%s10744_s1 + $0xb78] sm:$0xff]   ;;  %v8553_v32 = vld [vmem:[%s10744_s1 + $0xc80] sm:$0xff]  }
 0x15c   :  { %v9959_v38 = vadd.f32 %v7507_v31, %v5443_v30  ;;  %7788 = vmatpush3.bf16.msra.mxu0 %v8511_v19  ;;  %v8551_v30 = vld [vmem:[%s10744_s1 + $0xcc0] sm:$0xff]   ;;  %v8554_v34 = vld [vmem:[%s10744_s1 + $0xc48] sm:$0xff]  }
 0x15d   :  { %7789 = vmatprep.subr.bf16.mxu0 %v8513_v24  ;;  %v8552_v31 = vld [vmem:[%s10744_s1 + $0xc00] sm:$0xff]  }
 0x15e   :  { %7810 = vmatpush3.bf16.msra.mxu1 %v8512_v23  ;;  %v8546_v23 = vld [vmem:[%s10744_s1 + $0xbf8] sm:$0xff]  }
 0x15f   :  { %7811 = vmatprep.subr.bf16.mxu1 %v8514_v33  ;;  %v1490_v33 = vcombine.high %v1474_v28, %v1474_v28 }
 0x160   :  { %7790 = vmatpush3.bf16.msra.mxu0 %v8515_v35  ;;  %v8555_v35 = vld [vmem:[%s10744_s1 + $0xcc8] sm:$0xff]  }
 0x161   :  { %7819 = vmatprep.subr.bf16.mxu0 %v8517_v43  ;;  %v8562_v43 = vld [vmem:[%s10744_s1 + $0xc58] sm:$0xff]  }
 0x162   :  { %7812 = vmatpush3.bf16.msra.mxu1 %v8516_v39  ;;  %v8559_v39 = vld [vmem:[%s10744_s1 + $0xcd0] sm:$0xff]  }
 0x163   :  { %6001 = vmatmul.mubr.bf16.vlgmr.msra.gmra.mrb[40].mxu0 %v1467_v42  ;;  %7841 = vmatprep.subr.bf16.mxu1 %v8518_v45  ;;  %v8561_v42 = vld [vmem:[%s10744_s1 + $0xc90] sm:$0xff]   ;;  %v8564_v45 = vld [vmem:[%s10744_s1 + $0xc18] sm:$0xff]  }
 0x164   :  { %7820 = vmatpush3.bf16.msra.mxu0 %v8519_v47  ;;  %6080 = vmatprep.mubr.bf16.mxu0 %v1488_v48  ;;  %v8566_v47 = vld [vmem:[%s10744_s1 + $0xc60] sm:$0xff]  }
 0x165   :  { %6041 = vmatmul.mubr.bf16.vlgmr.msra.gmra.mrb[40].mxu1 %v1489_v50  ;;  %7821 = vmatprep.subr.bf16.mxu0 %v8521_v51  ;;  %v8567_v48 = vld [vmem:[%s10744_s1 + $0xce0] sm:$0xff]   ;;  %v8570_v51 = vld [vmem:[%s10744_s1 + $0xc68] sm:$0xff]  }
 0x166   :  { %7842 = vmatpush3.bf16.msra.mxu1 %v8520_v49  ;;  %6120 = vmatprep.mubr.bf16.mxu1 %v1492_v53  ;;  %v8568_v49 = vld [vmem:[%s10744_s1 + $0xc20] sm:$0xff]   ;;  %v8572_v53 = vld [vmem:[%s10744_s1 + $0xc28] sm:$0xff]  }
 0x167   :  { %7843 = vmatprep.subr.bf16.mxu1 %v8522_v52  ;;  %v8569_v50 = vld [vmem:[%s10744_s1 + $0xca0] sm:$0xff]   ;;  %v8571_v52 = vld [vmem:[%s10744_s1 + $0xce8] sm:$0xff]  }
 0x168   :  { %7822 = vmatpush3.bf16.msra.mxu0 %v8523_v54  ;;  %v8573_v54 = vld [vmem:[%s10744_s1 + $0xca8] sm:$0xff]  }
 0x169   :  { %7823 = vmatprep.subr.bf16.mxu0 %v8525_v56 }
 0x16a   :  { %7844 = vmatpush3.bf16.msra.mxu1 %v8524_v55  ;;  %v8574_v55 = vld [vmem:[%s10744_s1 + $0xc70] sm:$0xff]  }
 0x16b   :  { %7845 = vmatprep.subr.bf16.mxu1 %v8526_v57  ;;  %v8575_v57 = vld [vmem:[%s10744_s1 + $0xcf0] sm:$0xff]  }
 0x16c   :  { %7824 = vmatpush3.bf16.msra.mxu0 %v8527_v58 }
 0x16d   :  { %7825 = vmatprep.subr.bf16.mxu0 %v8529_v60 }
 0x16e   :  { %7846 = vmatpush3.bf16.msra.mxu1 %v8528_v59  ;;  %v8576_v59 = vld [vmem:[%s10744_s1 + $0xc30] sm:$0xff]  }
 0x16f   :  { %7847 = vmatprep.subr.bf16.mxu1 %v8530_v61 }
 0x170   :  { %7826 = vmatpush3.bf16.msra.mxu0 %v8531_v62 }
 0x171   :  { %7827 = vmatprep.subr.bf16.mxu0 %v8533_v0 }
 0x172   :  { %7848 = vmatpush3.bf16.msra.mxu1 %v8532_v63  ;;  %v8577_v63 = vld [vmem:[%s10744_s1 + $0xcb0] sm:$0xff]  }
 0x173   :  { %7849 = vmatprep.subr.bf16.mxu1 %v8534_v1 }
 0x174   :  { %7828 = vmatpush3.bf16.msra.mxu0 %v8535_v2  ;;  %v8578_v2 = vld [vmem:[%s10744_s1 + $0xc78] sm:$0xff]  }
 0x175   :  { %7829 = vmatprep.subr.bf16.mxu0 %v8537_v4 }
 0x176   :  { %7850 = vmatpush3.bf16.msra.mxu1 %v8536_v3  ;;  %v7527_v9 = vpop.f32.mrb[16].mxu0  ;;  %v28_v3 = vld [vmem:[%s10743_s0 + $0x30] sm:$0xff] }
 0x177   :  { %v7528_v11 = vpop.f32.mrb[17].mxu0  ;;  %7851 = vmatprep.subr.bf16.mxu1 %v8538_v5 }
 0x178   :  { %v7549_v13 = vpop.f32.mrb[16].mxu1  ;;  %v7529_v14 = vadd.f32 %v7528_v11, %v7527_v9  ;;  %v7530_v15 = vpop.f32.mrb[18].mxu0  ;;  %7830 = vmatpush3.bf16.msra.mxu0 %v8539_v6  ;;  %v1493_v9 = vcombine.high %v28_v3, %v28_v3  ;;  %v8580_v11 = vld [vmem:[%s10744_s1 + $0xc38] sm:$0xff]  }
 0x179   :  { %v7550_v18 = vpop.f32.mrb[17].mxu1  ;;  %v7531_v19 = vpop.f32.mrb[19].mxu0  ;;  %7831 = vmatprep.subr.bf16.mxu0 %v8541_v8  ;;  %v1500_v8 = vrot.slane %v28_v3, %v8920_v41  ;;  %v8613_v3 = vld [vmem:[%s10744_s1 + $0xdb8] sm:$0xff]  }
 0x17a   :  { %v5523_v20 = vadd.f32 %v7529_v14, %v9959_v38  ;;  %v7551_v21 = vadd.f32 %v7550_v18, %v7549_v13  ;;  %v7552_v22 = vpop.f32.mrb[18].mxu1  ;;  %7852 = vmatpush3.bf16.msra.mxu1 %v8540_v7  ;;  %v8558_v38 = vld [vmem:[%s10744_s1 + $0xc50] sm:$0xff]   ;;  %v8579_v7 = vld [vmem:[%s10744_s1 + $0xcf8] sm:$0xff]   ;;  %v10174_v15 = vrot.slane %v1493_v9, %v8920_v41  ;;  %v8583_v19 = vld [vmem:[%s10744_s1 + $0xdc0] sm:$0xff]  }
 0x17b   :  { %v7553_v24 = vpop.f32.mrb[19].mxu1  ;;  %7853 = vmatprep.subr.bf16.mxu1 %v8542_v10  ;;  %v8581_v13 = vld [vmem:[%s10744_s1 + $0xcb8] sm:$0xff]   ;;  %v1508_v14 = vcombine.high %v1500_v8, %v1500_v8 }
 0x17c   :  { %v10063_v26 = vadd.f32 %v7551_v21, %v5523_v20  ;;  %7832 = vmatpush3.bf16.msra.mxu0 %v8543_v12  ;;  %v1509_v20 = vcombine.high %v10174_v15, %v10174_v15  ;;  %v8584_v21 = vld [vmem:[%s10744_s1 + $0xd00] sm:$0xff]  }
 0x17d   :  { %7833 = vmatprep.subr.bf16.mxu0 %v8545_v17  ;;  %v8582_v17 = vld [vmem:[%s10744_s1 + $0xd40] sm:$0xff]   ;;  %v1530_v18 = vrot.slane %v1508_v14, %v8920_v41  ;;  %v8623_v14 = vld [vmem:[%s10744_s1 + $0xe50] sm:$0xff]  }
 0x17e   :  { %7854 = vmatpush3.bf16.msra.mxu1 %v8544_v16  ;;  %v1516_v16 = vrot.slane %v1500_v8, %v8920_v41  ;;  %v1537_v24 = vrot.slane %v1509_v20, %v8920_v41  ;;  %v8618_v8 = vld [vmem:[%s10744_s1 + $0xe80] sm:$0xff]   ;;  %v8629_v20 = vld [vmem:[%s10744_s1 + $0xe18] sm:$0xff]  }
 0x17f   :  { %7855 = vmatprep.subr.bf16.mxu1 %v8546_v23  ;;  %v1540_v22 = vcombine.high %v1530_v18, %v1530_v18  ;;  %v8585_v23 = vld [vmem:[%s10744_s1 + $0xd80] sm:$0xff]  }
 0x180   :  { %7834 = vmatpush3.bf16.msra.mxu0 %v8547_v25  ;;  %v1538_v25 = vcombine.high %v1516_v16, %v1516_v16 }
 0x181   :  { %7863 = vmatprep.subr.bf16.mxu0 %v8550_v29  ;;  %v8588_v29 = vld [vmem:[%s10744_s1 + $0xd08] sm:$0xff]  }
 0x182   :  { %7856 = vmatpush3.bf16.msra.mxu1 %v8548_v27  ;;  %v8587_v27 = vld [vmem:[%s10744_s1 + $0xdc8] sm:$0xff]  }
 0x183   :  { %6081 = vmatmul.mubr.bf16.vlgmr.msra.gmra.mrb[44].mxu0 %v1474_v28  ;;  %7885 = vmatprep.subr.bf16.mxu1 %v8551_v30  ;;  %v1541_v28 = vcombine.high %v1537_v24, %v1537_v24  ;;  %v8589_v30 = vld [vmem:[%s10744_s1 + $0xd88] sm:$0xff]  }
 0x184   :  { %7864 = vmatpush3.bf16.msra.mxu0 %v8552_v31  ;;  %6160 = vmatprep.mubr.bf16.mxu0 %v1530_v18  ;;  %v8590_v31 = vld [vmem:[%s10744_s1 + $0xd50] sm:$0xff]   ;;  %v8627_v18 = vld [vmem:[%s10744_s1 + $0xe58] sm:$0xff]  }
 0x185   :  { %6121 = vmatmul.mubr.bf16.vlgmr.msra.gmra.mrb[44].mxu1 %v1490_v33  ;;  %7865 = vmatprep.subr.bf16.mxu0 %v8554_v34  ;;  %v8592_v33 = vld [vmem:[%s10744_s1 + $0xd10] sm:$0xff]  }
 0x186   :  { %7886 = vmatpush3.bf16.msra.mxu1 %v8553_v32  ;;  %6200 = vmatprep.mubr.bf16.mxu1 %v1540_v22  ;;  %v8591_v32 = vld [vmem:[%s10744_s1 + $0xdd0] sm:$0xff]   ;;  %v8631_v22 = vld [vmem:[%s10744_s1 + $0xe60] sm:$0xff]  }
 0x187   :  { %7887 = vmatprep.subr.bf16.mxu1 %v8555_v35  ;;  %v8593_v34 = vld [vmem:[%s10744_s1 + $0xd90] sm:$0xff]   ;;  %v8594_v35 = vld [vmem:[%s10744_s1 + $0xd58] sm:$0xff]  }
 0x188   :  { %7866 = vmatpush3.bf16.msra.mxu0 %v8556_v36  ;;  %v8595_v36 = vld [vmem:[%s10744_s1 + $0xdd8] sm:$0xff]  }
 0x189   :  { %7867 = vmatprep.subr.bf16.mxu0 %v8558_v38  ;;  %v8597_v38 = vld [vmem:[%s10744_s1 + $0xd98] sm:$0xff]  }
 0x18a   :  { %7888 = vmatpush3.bf16.msra.mxu1 %v8557_v37  ;;  %v8596_v37 = vld [vmem:[%s10744_s1 + $0xd18] sm:$0xff]  }
 0x18b   :  { %7889 = vmatprep.subr.bf16.mxu1 %v8559_v39  ;;  %v8598_v39 = vld [vmem:[%s10744_s1 + $0xd60] sm:$0xff]  }
 0x18c   :  { %7868 = vmatpush3.bf16.msra.mxu0 %v8560_v40  ;;  %v8599_v40 = vld [vmem:[%s10744_s1 + $0xde0] sm:$0xff]  }
 0x18d   :  { %7869 = vmatprep.subr.bf16.mxu0 %v8562_v43  ;;  %v8601_v43 = vld [vmem:[%s10744_s1 + $0xda0] sm:$0xff]  }
 0x18e   :  { %7890 = vmatpush3.bf16.msra.mxu1 %v8561_v42  ;;  %v8600_v42 = vld [vmem:[%s10744_s1 + $0xd20] sm:$0xff]  }
 0x18f   :  { %7891 = vmatprep.subr.bf16.mxu1 %v8563_v44  ;;  %v8602_v44 = vld [vmem:[%s10744_s1 + $0xd68] sm:$0xff]  }
 0x190   :  { %7870 = vmatpush3.bf16.msra.mxu0 %v8564_v45  ;;  %v8603_v45 = vld [vmem:[%s10744_s1 + $0xde8] sm:$0xff]  }
 0x191   :  { %7871 = vmatprep.subr.bf16.mxu0 %v8566_v47  ;;  %v8605_v47 = vld [vmem:[%s10744_s1 + $0xda8] sm:$0xff]  }
 0x192   :  { %7892 = vmatpush3.bf16.msra.mxu1 %v8565_v46  ;;  %v8604_v46 = vld [vmem:[%s10744_s1 + $0xd28] sm:$0xff]  }
 0x193   :  { %7893 = vmatprep.subr.bf16.mxu1 %v8567_v48  ;;  %v8606_v48 = vld [vmem:[%s10744_s1 + $0xd70] sm:$0xff]  }
 0x194   :  { %7872 = vmatpush3.bf16.msra.mxu0 %v8568_v49 }
 0x195   :  { %7873 = vmatprep.subr.bf16.mxu0 %v8570_v51 }
 0x196   :  { %7894 = vmatpush3.bf16.msra.mxu1 %v8569_v50  ;;  %v7571_v56 = vpop.f32.mrb[20].mxu0  ;;  %v8607_v50 = vld [vmem:[%s10744_s1 + $0xdf0] sm:$0xff]  }
 0x197   :  { %v7572_v58 = vpop.f32.mrb[21].mxu0  ;;  %7895 = vmatprep.subr.bf16.mxu1 %v8571_v52  ;;  %v8608_v52 = vld [vmem:[%s10744_s1 + $0xd30] sm:$0xff]  }
 0x198   :  { %v7593_v60 = vpop.f32.mrb[20].mxu1  ;;  %v7573_v61 = vadd.f32 %v7572_v58, %v7571_v56  ;;  %v7574_v62 = vpop.f32.mrb[22].mxu0  ;;  %7874 = vmatpush3.bf16.msra.mxu0 %v8572_v53  ;;  %v8609_v56 = vld [vmem:[%s10744_s1 + $0xdb0] sm:$0xff]  }
 0x199   :  { %v7594_v0 = vpop.f32.mrb[21].mxu1  ;;  %v7575_v1 = vpop.f32.mrb[23].mxu0  ;;  %7875 = vmatprep.subr.bf16.mxu0 %v8574_v55 }
 0x19a   :  { %v5603_v4 = vadd.f32 %v7573_v61, %v10063_v26  ;;  %v7595_v5 = vadd.f32 %v7594_v0, %v7593_v60  ;;  %v7596_v6 = vpop.f32.mrb[22].mxu1  ;;  %7896 = vmatpush3.bf16.msra.mxu1 %v8573_v54  ;;  %v8586_v26 = vld [vmem:[%s10744_s1 + $0xd48] sm:$0xff]   ;;  %v8612_v1 = vld [vmem:[%s10744_s1 + $0xd38] sm:$0xff]  }
 0x19b   :  { %v7597_v10 = vpop.f32.mrb[23].mxu1  ;;  %7897 = vmatprep.subr.bf16.mxu1 %v8575_v57  ;;  %v8610_v57 = vld [vmem:[%s10744_s1 + $0xd78] sm:$0xff]   ;;  %v8616_v6 = vld [vmem:[%s10744_s1 + $0xec0] sm:$0xff]  }
 0x19c   :  { %v10168_v12 = vadd.f32 %v7595_v5, %v5603_v4  ;;  %7876 = vmatpush3.bf16.msra.mxu0 %v8576_v59  ;;  %v1523_v4 = vrot.slane %v10174_v15, %v8920_v41  ;;  %v8615_v5 = vld [vmem:[%s10744_s1 + $0xe40] sm:$0xff]   ;;  %v8619_v10 = vld [vmem:[%s10744_s1 + $0xe48] sm:$0xff]   ;;  %v8624_v15 = vld [vmem:[%s10744_s1 + $0xed0] sm:$0xff]  }
 0x19d   :  { %7877 = vmatprep.subr.bf16.mxu0 %v8578_v2 }
 0x19e   :  { %7898 = vmatpush3.bf16.msra.mxu1 %v8577_v63  ;;  %v8611_v63 = vld [vmem:[%s10744_s1 + $0xdf8] sm:$0xff]   ;;  %v1539_v9 = vcombine.high %v1523_v4, %v1523_v4 }
 0x19f   :  { %7899 = vmatprep.subr.bf16.mxu1 %v8579_v7  ;;  %v8617_v7 = vld [vmem:[%s10744_s1 + $0xe00] sm:$0xff]  }
 0x1a0   :  { %7878 = vmatpush3.bf16.msra.mxu0 %v8580_v11  ;;  %v8620_v11 = vld [vmem:[%s10744_s1 + $0xec8] sm:$0xff]  }
 0x1a1   :  { %7907 = vmatprep.subr.bf16.mxu0 %v8582_v17  ;;  %v8626_v17 = vld [vmem:[%s10744_s1 + $0xe90] sm:$0xff]  }
 0x1a2   :  { %7900 = vmatpush3.bf16.msra.mxu1 %v8581_v13  ;;  %v8622_v13 = vld [vmem:[%s10744_s1 + $0xe88] sm:$0xff]  }
 0x1a3   :  { %6161 = vmatmul.mubr.bf16.vlgmr.msra.gmra.mrb[48].mxu0 %v1516_v16  ;;  %7929 = vmatprep.subr.bf16.mxu1 %v8583_v19  ;;  %v8625_v16 = vld [vmem:[%s10744_s1 + $0xe10] sm:$0xff]   ;;  %v8628_v19 = vld [vmem:[%s10744_s1 + $0xed8] sm:$0xff]  }
 0x1a4   :  { %7908 = vmatpush3.bf16.msra.mxu0 %v8584_v21  ;;  %6240 = vmatprep.mubr.bf16.mxu0 %v1537_v24  ;;  %v8630_v21 = vld [vmem:[%s10744_s1 + $0xe98] sm:$0xff]   ;;  %v8633_v24 = vld [vmem:[%s10744_s1 + $0xe20] sm:$0xff]  }
 0x1a5   :  { %6201 = vmatmul.mubr.bf16.vlgmr.msra.gmra.mrb[48].mxu1 %v1538_v25  ;;  %7909 = vmatprep.subr.bf16.mxu0 %v8586_v26  ;;  %v8634_v25 = vld [vmem:[%s10744_s1 + $0xea0] sm:$0xff]   ;;  %v8635_v26 = vld [vmem:[%s10744_s1 + $0xe68] sm:$0xff]  }
 0x1a6   :  { %7930 = vmatpush3.bf16.msra.mxu1 %v8585_v23  ;;  %6280 = vmatprep.mubr.bf16.mxu1 %v1541_v28  ;;  %v8632_v23 = vld [vmem:[%s10744_s1 + $0xee0] sm:$0xff]   ;;  %v8637_v28 = vld [vmem:[%s10744_s1 + $0xe28] sm:$0xff]  }
 0x1a7   :  { %7931 = vmatprep.subr.bf16.mxu1 %v8587_v27  ;;  %v8636_v27 = vld [vmem:[%s10744_s1 + $0xee8] sm:$0xff]  }
 0x1a8   :  { %7910 = vmatpush3.bf16.msra.mxu0 %v8588_v29  ;;  %v8638_v29 = vld [vmem:[%s10744_s1 + $0xea8] sm:$0xff]  }
 0x1a9   :  { %7911 = vmatprep.subr.bf16.mxu0 %v8590_v31 }
 0x1aa   :  { %7932 = vmatpush3.bf16.msra.mxu1 %v8589_v30  ;;  %v8639_v30 = vld [vmem:[%s10744_s1 + $0xe70] sm:$0xff]  }
 0x1ab   :  { %7933 = vmatprep.subr.bf16.mxu1 %v8591_v32  ;;  %v8640_v32 = vld [vmem:[%s10744_s1 + $0xef0] sm:$0xff]  }
 0x1ac   :  { %7912 = vmatpush3.bf16.msra.mxu0 %v8592_v33 }
 0x1ad   :  { %7913 = vmatprep.subr.bf16.mxu0 %v8594_v35 }
 0x1ae   :  { %7934 = vmatpush3.bf16.msra.mxu1 %v8593_v34  ;;  %v8641_v34 = vld [vmem:[%s10744_s1 + $0xe30] sm:$0xff]  }
 0x1af   :  { %7935 = vmatprep.subr.bf16.mxu1 %v8595_v36 }
 0x1b0   :  { %7914 = vmatpush3.bf16.msra.mxu0 %v8596_v37 }
 0x1b1   :  { %7915 = vmatprep.subr.bf16.mxu0 %v8598_v39 }
 0x1b2   :  { %7936 = vmatpush3.bf16.msra.mxu1 %v8597_v38  ;;  %v8642_v38 = vld [vmem:[%s10744_s1 + $0xeb0] sm:$0xff]  }
 0x1b3   :  { %7937 = vmatprep.subr.bf16.mxu1 %v8599_v40 }
 0x1b4   :  { %7916 = vmatpush3.bf16.msra.mxu0 %v8600_v42  ;;  %v8643_v42 = vld [vmem:[%s10744_s1 + $0xe78] sm:$0xff]  }
 0x1b5   :  { %7917 = vmatprep.subr.bf16.mxu0 %v8602_v44 }
 0x1b6   :  { %7938 = vmatpush3.bf16.msra.mxu1 %v8601_v43  ;;  %v7615_v49 = vpop.f32.mrb[24].mxu0  ;;  %v8644_v43 = vld [vmem:[%s10744_s1 + $0xef8] sm:$0xff]  }
 0x1b7   :  { %v7616_v51 = vpop.f32.mrb[25].mxu0  ;;  %7939 = vmatprep.subr.bf16.mxu1 %v8603_v45 }
 0x1b8   :  { %v7637_v53 = vpop.f32.mrb[24].mxu1  ;;  %v7617_v54 = vadd.f32 %v7616_v51, %v7615_v49  ;;  %v7618_v55 = vpop.f32.mrb[26].mxu0  ;;  %7918 = vmatpush3.bf16.msra.mxu0 %v8604_v46  ;;  %v8645_v49 = vld [vmem:[%s10744_s1 + $0xe38] sm:$0xff]  }
 0x1b9   :  { %v7638_v58 = vpop.f32.mrb[25].mxu1  ;;  %v7619_v59 = vpop.f32.mrb[27].mxu0  ;;  %7919 = vmatprep.subr.bf16.mxu0 %v8606_v48 }
 0x1ba   :  { %v5683_v60 = vadd.f32 %v7617_v54, %v10168_v12  ;;  %v7639_v61 = vadd.f32 %v7638_v58, %v7637_v53  ;;  %v7640_v62 = vpop.f32.mrb[26].mxu1  ;;  %7940 = vmatpush3.bf16.msra.mxu1 %v8605_v47  ;;  %v8621_v12 = vld [vmem:[%s10744_s1 + $0xe08] sm:$0xff]   ;;  %v29_v47 = vld [vmem:[%s10743_s0 + $0x38] sm:$0xff]  ;;  %v8648_v58 = vld [vmem:[%s10744_s1 + $0xfc0] sm:$0xff]  }
 0x1bb   :  { %v7641_v0 = vpop.f32.mrb[27].mxu1  ;;  %7941 = vmatprep.subr.bf16.mxu1 %v8607_v50  ;;  %v1549_v50 = vrot.slane %v29_v47, %v8920_v41  ;;  %v1542_v51 = vcombine.high %v29_v47, %v29_v47  ;;  %v8646_v53 = vld [vmem:[%s10744_s1 + $0xeb8] sm:$0xff]   ;;  %v8650_v62 = vld [vmem:[%s10744_s1 + $0xf80] sm:$0xff]  }
 0x1bc   :  { %v10275_v2 = vadd.f32 %v7639_v61, %v5683_v60  ;;  %7920 = vmatpush3.bf16.msra.mxu0 %v8608_v52  ;;  %v8649_v60 = vld [vmem:[%s10744_s1 + $0xf00] sm:$0xff]  }
 0x1bd   :  { %7921 = vmatprep.subr.bf16.mxu0 %v8610_v57  ;;  %v1557_v54 = vcombine.high %v1549_v50, %v1549_v50  ;;  %v1565_v55 = vrot.slane %v1549_v50, %v8920_v41  ;;  %v10390_v57 = vrot.slane %v1542_v51, %v8920_v41  ;;  %v8682_v47 = vld [vmem:[%s10744_s1 + $0x1000] sm:$0xff]   ;;  %v8684_v50 = vld [vmem:[%s10744_s1 + $0x1048] sm:$0xff]  }
 0x1be   :  { %7942 = vmatpush3.bf16.msra.mxu1 %v8609_v56  ;;  %v8647_v56 = vld [vmem:[%s10744_s1 + $0xf40] sm:$0xff]   ;;  %v8685_v51 = vld [vmem:[%s10744_s1 + $0x10c8] sm:$0xff]  }
 0x1bf   :  { %7943 = vmatprep.subr.bf16.mxu1 %v8611_v63  ;;  %v1579_v59 = vrot.slane %v1557_v54, %v8920_v41  ;;  %v1558_v61 = vcombine.high %v10390_v57, %v10390_v57  ;;  %v1587_v0 = vcombine.high %v1565_v55, %v1565_v55  ;;  %v8688_v54 = vld [vmem:[%s10744_s1 + $0x1050] sm:$0xff]  }
 0x1c0   :  { %7922 = vmatpush3.bf16.msra.mxu0 %v8612_v1  ;;  %v8651_v1 = vld [vmem:[%s10744_s1 + $0xf48] sm:$0xff]  }
 0x1c1   :  { %7951 = vmatprep.subr.bf16.mxu0 %v8615_v5  ;;  %v1589_v63 = vcombine.high %v1579_v59, %v1579_v59 }
 0x1c2   :  { %7944 = vmatpush3.bf16.msra.mxu1 %v8613_v3  ;;  %v8652_v3 = vld [vmem:[%s10744_s1 + $0xfc8] sm:$0xff]  }
 0x1c3   :  { %6241 = vmatmul.mubr.bf16.vlgmr.msra.gmra.mrb[52].mxu0 %v1523_v4  ;;  %7973 = vmatprep.subr.bf16.mxu1 %v8616_v6  ;;  %v8653_v4 = vld [vmem:[%s10744_s1 + $0xf08] sm:$0xff]  }
 0x1c4   :  { %7952 = vmatpush3.bf16.msra.mxu0 %v8617_v7  ;;  %6320 = vmatprep.mubr.bf16.mxu0 %v1579_v59  ;;  %v8654_v6 = vld [vmem:[%s10744_s1 + $0xf88] sm:$0xff]   ;;  %v8655_v7 = vld [vmem:[%s10744_s1 + $0xf50] sm:$0xff]   ;;  %v8693_v59 = vld [vmem:[%s10744_s1 + $0x10d8] sm:$0xff]  }
 0x1c5   :  { %6281 = vmatmul.mubr.bf16.vlgmr.msra.gmra.mrb[52].mxu1 %v1539_v9  ;;  %7953 = vmatprep.subr.bf16.mxu0 %v8619_v10  ;;  %v8657_v9 = vld [vmem:[%s10744_s1 + $0xf10] sm:$0xff]  }
 0x1c6   :  { %7974 = vmatpush3.bf16.msra.mxu1 %v8618_v8  ;;  %6360 = vmatprep.mubr.bf16.mxu1 %v1589_v63  ;;  %v8656_v8 = vld [vmem:[%s10744_s1 + $0xfd0] sm:$0xff]   ;;  %v8697_v63 = vld [vmem:[%s10744_s1 + $0x10e0] sm:$0xff]  }
 0x1c7   :  { %7975 = vmatprep.subr.bf16.mxu1 %v8620_v11  ;;  %v8658_v10 = vld [vmem:[%s10744_s1 + $0xf90] sm:$0xff]   ;;  %v8659_v11 = vld [vmem:[%s10744_s1 + $0xf58] sm:$0xff]  }
 0x1c8   :  { %7954 = vmatpush3.bf16.msra.mxu0 %v8621_v12  ;;  %v8660_v12 = vld [vmem:[%s10744_s1 + $0xfd8] sm:$0xff]  }
 0x1c9   :  { %7955 = vmatprep.subr.bf16.mxu0 %v8623_v14  ;;  %v8662_v14 = vld [vmem:[%s10744_s1 + $0xf98] sm:$0xff]  }
 0x1ca   :  { %7976 = vmatpush3.bf16.msra.mxu1 %v8622_v13  ;;  %v8661_v13 = vld [vmem:[%s10744_s1 + $0xf18] sm:$0xff]  }
 0x1cb   :  { %7977 = vmatprep.subr.bf16.mxu1 %v8624_v15  ;;  %v8663_v15 = vld [vmem:[%s10744_s1 + $0xf60] sm:$0xff]  }
 0x1cc   :  { %7956 = vmatpush3.bf16.msra.mxu0 %v8625_v16  ;;  %v8664_v16 = vld [vmem:[%s10744_s1 + $0xfe0] sm:$0xff]  }
 0x1cd   :  { %7957 = vmatprep.subr.bf16.mxu0 %v8627_v18  ;;  %v8666_v18 = vld [vmem:[%s10744_s1 + $0xfa0] sm:$0xff]  }
 0x1ce   :  { %7978 = vmatpush3.bf16.msra.mxu1 %v8626_v17  ;;  %v8665_v17 = vld [vmem:[%s10744_s1 + $0xf20] sm:$0xff]  }
 0x1cf   :  { %7979 = vmatprep.subr.bf16.mxu1 %v8628_v19  ;;  %v8667_v19 = vld [vmem:[%s10744_s1 + $0xf68] sm:$0xff]  }
 0x1d0   :  { %7958 = vmatpush3.bf16.msra.mxu0 %v8629_v20  ;;  %v8668_v20 = vld [vmem:[%s10744_s1 + $0xfe8] sm:$0xff]  }
 0x1d1   :  { %7959 = vmatprep.subr.bf16.mxu0 %v8631_v22  ;;  %v8670_v22 = vld [vmem:[%s10744_s1 + $0xfa8] sm:$0xff]  }
 0x1d2   :  { %7980 = vmatpush3.bf16.msra.mxu1 %v8630_v21  ;;  %v8669_v21 = vld [vmem:[%s10744_s1 + $0xf28] sm:$0xff]  }
 0x1d3   :  { %7981 = vmatprep.subr.bf16.mxu1 %v8632_v23  ;;  %v8671_v23 = vld [vmem:[%s10744_s1 + $0xf70] sm:$0xff]  }
 0x1d4   :  { %7960 = vmatpush3.bf16.msra.mxu0 %v8633_v24 }
 0x1d5   :  { %7961 = vmatprep.subr.bf16.mxu0 %v8635_v26 }
 0x1d6   :  { %7982 = vmatpush3.bf16.msra.mxu1 %v8634_v25  ;;  %v7659_v31 = vpop.f32.mrb[28].mxu0  ;;  %v8672_v25 = vld [vmem:[%s10744_s1 + $0xff0] sm:$0xff]  }
 0x1d7   :  { %v7660_v33 = vpop.f32.mrb[29].mxu0  ;;  %7983 = vmatprep.subr.bf16.mxu1 %v8636_v27  ;;  %v8673_v27 = vld [vmem:[%s10744_s1 + $0xf30] sm:$0xff]  }
 0x1d8   :  { %v7681_v35 = vpop.f32.mrb[28].mxu1  ;;  %v7661_v36 = vadd.f32 %v7660_v33, %v7659_v31  ;;  %v7662_v37 = vpop.f32.mrb[30].mxu0  ;;  %7962 = vmatpush3.bf16.msra.mxu0 %v8637_v28  ;;  %v8674_v31 = vld [vmem:[%s10744_s1 + $0xfb0] sm:$0xff]  }
 0x1d9   :  { %v7682_v39 = vpop.f32.mrb[29].mxu1  ;;  %v7663_v40 = vpop.f32.mrb[31].mxu0  ;;  %7963 = vmatprep.subr.bf16.mxu0 %v8639_v30 }
 0x1da   :  { %v5763_v44 = vadd.f32 %v7661_v36, %v10275_v2  ;;  %v7683_v45 = vadd.f32 %v7682_v39, %v7681_v35  ;;  %v7684_v46 = vpop.f32.mrb[30].mxu1  ;;  %7984 = vmatpush3.bf16.msra.mxu1 %v8638_v29  ;;  %v1586_v2 = vrot.slane %v1558_v61, %v8920_v41  ;;  %v8677_v40 = vld [vmem:[%s10744_s1 + $0xf38] sm:$0xff]  }
 0x1db   :  { %v7685_v48 = vpop.f32.mrb[31].mxu1  ;;  %7985 = vmatprep.subr.bf16.mxu1 %v8640_v32  ;;  %v8675_v32 = vld [vmem:[%s10744_s1 + $0xf78] sm:$0xff]   ;;  %v8681_v46 = vld [vmem:[%s10744_s1 + $0x10c0] sm:$0xff]  }
 0x1dc   :  { %v10380_v52 = vadd.f32 %v7683_v45, %v5763_v44  ;;  %7964 = vmatpush3.bf16.msra.mxu0 %v8641_v34  ;;  %v1590_v5 = vcombine.high %v1586_v2, %v1586_v2  ;;  %v1572_v44 = vrot.slane %v10390_v57, %v8920_v41  ;;  %v8680_v45 = vld [vmem:[%s10744_s1 + $0x1040] sm:$0xff]   ;;  %v8691_v57 = vld [vmem:[%s10744_s1 + $0x1090] sm:$0xff]   ;;  %v8695_v61 = vld [vmem:[%s10744_s1 + $0x1098] sm:$0xff]  }
 0x1dd   :  { %7965 = vmatprep.subr.bf16.mxu0 %v8643_v42  ;;  %v8683_v48 = vld [vmem:[%s10744_s1 + $0x1080] sm:$0xff]  }
 0x1de   :  { %7986 = vmatpush3.bf16.msra.mxu1 %v8642_v38  ;;  %v8676_v38 = vld [vmem:[%s10744_s1 + $0xff8] sm:$0xff]  }
 0x1df   :  { %7987 = vmatprep.subr.bf16.mxu1 %v8644_v43  ;;  %v8678_v43 = vld [vmem:[%s10744_s1 + $0xfb8] sm:$0xff]  }
 0x1e0   :  { %7966 = vmatpush3.bf16.msra.mxu0 %v8645_v49  ;;  %v1588_v49 = vcombine.high %v1572_v44, %v1572_v44 }
 0x1e1   :  { %7995 = vmatprep.subr.bf16.mxu0 %v8647_v56  ;;  %v8690_v56 = vld [vmem:[%s10744_s1 + $0x1010] sm:$0xff]  }
 0x1e2   :  { %7988 = vmatpush3.bf16.msra.mxu1 %v8646_v53  ;;  %v8687_v53 = vld [vmem:[%s10744_s1 + $0x1088] sm:$0xff]  }
 0x1e3   :  { %6321 = vmatmul.mubr.bf16.vlgmr.msra.gmra.mrb[56].mxu0 %v1565_v55  ;;  %8017 = vmatprep.subr.bf16.mxu1 %v8648_v58  ;;  %v8689_v55 = vld [vmem:[%s10744_s1 + $0x10d0] sm:$0xff]   ;;  %v8692_v58 = vld [vmem:[%s10744_s1 + $0x1058] sm:$0xff]  }
 0x1e4   :  { %7996 = vmatpush3.bf16.msra.mxu0 %v8649_v60  ;;  %6400 = vmatprep.mubr.bf16.mxu0 %v1586_v2  ;;  %v8694_v60 = vld [vmem:[%s10744_s1 + $0x1018] sm:$0xff]   ;;  %v8700_v2 = vld [vmem:[%s10744_s1 + $0x1068] sm:$0xff]  }
 0x1e5   :  { %6361 = vmatmul.mubr.bf16.vlgmr.msra.gmra.mrb[56].mxu1 %v1587_v0  ;;  %7997 = vmatprep.subr.bf16.mxu0 %v8651_v1  ;;  %v8698_v0 = vld [vmem:[%s10744_s1 + $0x1020] sm:$0xff]  }
 0x1e6   :  { %8018 = vmatpush3.bf16.msra.mxu1 %v8650_v62  ;;  %6440 = vmatprep.mubr.bf16.mxu1 %v1590_v5  ;;  %v8696_v62 = vld [vmem:[%s10744_s1 + $0x1060] sm:$0xff]   ;;  %v8703_v5 = vld [vmem:[%s10744_s1 + $0x10a8] sm:$0xff]  }
 0x1e7   :  { %8019 = vmatprep.subr.bf16.mxu1 %v8652_v3  ;;  %v8699_v1 = vld [vmem:[%s10744_s1 + $0x10a0] sm:$0xff]   ;;  %v8701_v3 = vld [vmem:[%s10744_s1 + $0x10e8] sm:$0xff]  }
 0x1e8   :  { %7998 = vmatpush3.bf16.msra.mxu0 %v8653_v4  ;;  %v8702_v4 = vld [vmem:[%s10744_s1 + $0x1028] sm:$0xff]  }
 0x1e9   :  { %7999 = vmatprep.subr.bf16.mxu0 %v8655_v7 }
 0x1ea   :  { %8020 = vmatpush3.bf16.msra.mxu1 %v8654_v6  ;;  %v8704_v6 = vld [vmem:[%s10744_s1 + $0x1070] sm:$0xff]  }
 0x1eb   :  { %8021 = vmatprep.subr.bf16.mxu1 %v8656_v8  ;;  %v8705_v8 = vld [vmem:[%s10744_s1 + $0x10f0] sm:$0xff]  }
 0x1ec   :  { %8000 = vmatpush3.bf16.msra.mxu0 %v8657_v9 }
 0x1ed   :  { %8001 = vmatprep.subr.bf16.mxu0 %v8659_v11 }
 0x1ee   :  { %8022 = vmatpush3.bf16.msra.mxu1 %v8658_v10  ;;  %v8706_v10 = vld [vmem:[%s10744_s1 + $0x1030] sm:$0xff]  }
 0x1ef   :  { %8023 = vmatprep.subr.bf16.mxu1 %v8660_v12 }
 0x1f0   :  { %8002 = vmatpush3.bf16.msra.mxu0 %v8661_v13 }
 0x1f1   :  { %8003 = vmatprep.subr.bf16.mxu0 %v8663_v15 }
 0x1f2   :  { %8024 = vmatpush3.bf16.msra.mxu1 %v8662_v14  ;;  %v8707_v14 = vld [vmem:[%s10744_s1 + $0x10b0] sm:$0xff]  }
 0x1f3   :  { %8025 = vmatprep.subr.bf16.mxu1 %v8664_v16 }
 0x1f4   :  { %8004 = vmatpush3.bf16.msra.mxu0 %v8665_v17  ;;  %v8708_v17 = vld [vmem:[%s10744_s1 + $0x1078] sm:$0xff]  }
 0x1f5   :  { %8005 = vmatprep.subr.bf16.mxu0 %v8667_v19 }
 0x1f6   :  { %8026 = vmatpush3.bf16.msra.mxu1 %v8666_v18  ;;  %v7703_v24 = vpop.f32.mrb[32].mxu0  ;;  %v8709_v18 = vld [vmem:[%s10744_s1 + $0x10f8] sm:$0xff]  }
 0x1f7   :  { %v7704_v26 = vpop.f32.mrb[33].mxu0  ;;  %8027 = vmatprep.subr.bf16.mxu1 %v8668_v20 }
 0x1f8   :  { %v7725_v28 = vpop.f32.mrb[32].mxu1  ;;  %v7705_v29 = vadd.f32 %v7704_v26, %v7703_v24  ;;  %v7706_v30 = vpop.f32.mrb[34].mxu0  ;;  %8006 = vmatpush3.bf16.msra.mxu0 %v8669_v21  ;;  %v30_v24 = vld [vmem:[%s10743_s0 + $0x40] sm:$0xff]  ;;  %v8711_v26 = vld [vmem:[%s10744_s1 + $0x10b8] sm:$0xff]  }
 0x1f9   :  { %v7726_v33 = vpop.f32.mrb[33].mxu1  ;;  %v7707_v34 = vpop.f32.mrb[35].mxu0  ;;  %8007 = vmatprep.subr.bf16.mxu0 %v8671_v23 }
 0x1fa   :  { %v5843_v35 = vadd.f32 %v7705_v29, %v10380_v52  ;;  %v7727_v36 = vadd.f32 %v7726_v33, %v7725_v28  ;;  %v7728_v37 = vpop.f32.mrb[34].mxu1  ;;  %8028 = vmatpush3.bf16.msra.mxu1 %v8670_v22  ;;  %v8686_v52 = vld [vmem:[%s10744_s1 + $0x1008] sm:$0xff]   ;;  %v8710_v22 = vld [vmem:[%s10744_s1 + $0x1038] sm:$0xff]   ;;  %v1591_v28 = vcombine.high %v30_v24, %v30_v24  ;;  %v8712_v29 = vld [vmem:[%s10744_s1 + $0x1140] sm:$0xff]  }
 0x1fb   :  { %v7729_v39 = vpop.f32.mrb[35].mxu1  ;;  %8029 = vmatprep.subr.bf16.mxu1 %v8672_v25  ;;  %v8714_v34 = vld [vmem:[%s10744_s1 + $0x1100] sm:$0xff]  }
 0x1fc   :  { %v10487_v42 = vadd.f32 %v7727_v36, %v5843_v35  ;;  %8008 = vmatpush3.bf16.msra.mxu0 %v8673_v27  ;;  %v1598_v27 = vrot.slane %v30_v24, %v8920_v41  ;;  %v10605_v33 = vrot.slane %v1591_v28, %v8920_v41  ;;  %v8715_v36 = vld [vmem:[%s10744_s1 + $0x1180] sm:$0xff]   ;;  %v8716_v39 = vld [vmem:[%s10744_s1 + $0x1148] sm:$0xff]  }
 0x1fd   :  { %8009 = vmatprep.subr.bf16.mxu0 %v8675_v32  ;;  %v8713_v32 = vld [vmem:[%s10744_s1 + $0x11c0] sm:$0xff]  }
 0x1fe   :  { %8030 = vmatpush3.bf16.msra.mxu1 %v8674_v31  ;;  %v1606_v30 = vcombine.high %v1598_v27, %v1598_v27  ;;  %v1614_v31 = vrot.slane %v1598_v27, %v8920_v41  ;;  %v1607_v37 = vcombine.high %v10605_v33, %v10605_v33 }
 0x1ff   :  { %8031 = vmatprep.subr.bf16.mxu1 %v8676_v38 }
 0x200   :  { %8010 = vmatpush3.bf16.msra.mxu0 %v8677_v40  ;;  %v1628_v35 = vrot.slane %v1606_v30, %v8920_v41  ;;  %v1636_v38 = vcombine.high %v1614_v31, %v1614_v31 }
 0x201   :  { %8039 = vmatprep.subr.bf16.mxu0 %v8680_v45  ;;  %v8719_v45 = vld [vmem:[%s10744_s1 + $0x1188] sm:$0xff]  }
 0x202   :  { %8032 = vmatpush3.bf16.msra.mxu1 %v8678_v43  ;;  %v1638_v40 = vcombine.high %v1628_v35, %v1628_v35  ;;  %v1635_v43 = vrot.slane %v1607_v37, %v8920_v41 }
 0x203   :  { %6401 = vmatmul.mubr.bf16.vlgmr.msra.gmra.mrb[60].mxu0 %v1572_v44  ;;  %8061 = vmatprep.subr.bf16.mxu1 %v8681_v46  ;;  %v8718_v44 = vld [vmem:[%s10744_s1 + $0x1108] sm:$0xff]  }
 0x204   :  { %8040 = vmatpush3.bf16.msra.mxu0 %v8682_v47  ;;  %6480 = vmatprep.mubr.bf16.mxu0 %v1628_v35  ;;  %v1639_v46 = vcombine.high %v1635_v43, %v1635_v43  ;;  %v8720_v47 = vld [vmem:[%s10744_s1 + $0x1150] sm:$0xff]  }
 0x205   :  { %6441 = vmatmul.mubr.bf16.vlgmr.msra.gmra.mrb[60].mxu1 %v1588_v49  ;;  %8041 = vmatprep.subr.bf16.mxu0 %v8684_v50  ;;  %v8722_v49 = vld [vmem:[%s10744_s1 + $0x1110] sm:$0xff]  }
 0x206   :  { %8062 = vmatpush3.bf16.msra.mxu1 %v8683_v48  ;;  %6520 = vmatprep.mubr.bf16.mxu1 %v1638_v40  ;;  %v8721_v48 = vld [vmem:[%s10744_s1 + $0x11d0] sm:$0xff]  }
 0x207   :  { %8063 = vmatprep.subr.bf16.mxu1 %v8685_v51  ;;  %v8723_v50 = vld [vmem:[%s10744_s1 + $0x1190] sm:$0xff]   ;;  %v8724_v51 = vld [vmem:[%s10744_s1 + $0x1158] sm:$0xff]  }
 0x208   :  { %8042 = vmatpush3.bf16.msra.mxu0 %v8686_v52  ;;  %v8725_v52 = vld [vmem:[%s10744_s1 + $0x11d8] sm:$0xff]  }
 0x209   :  { %8043 = vmatprep.subr.bf16.mxu0 %v8688_v54  ;;  %v8727_v54 = vld [vmem:[%s10744_s1 + $0x1198] sm:$0xff]  }
 0x20a   :  { %8064 = vmatpush3.bf16.msra.mxu1 %v8687_v53  ;;  %v8726_v53 = vld [vmem:[%s10744_s1 + $0x1118] sm:$0xff]  }
 0x20b   :  { %8065 = vmatprep.subr.bf16.mxu1 %v8689_v55  ;;  %v8728_v55 = vld [vmem:[%s10744_s1 + $0x1160] sm:$0xff]  }
 0x20c   :  { %8044 = vmatpush3.bf16.msra.mxu0 %v8690_v56  ;;  %v8729_v56 = vld [vmem:[%s10744_s1 + $0x11e0] sm:$0xff]  }
 0x20d   :  { %8045 = vmatprep.subr.bf16.mxu0 %v8692_v58  ;;  %v8731_v58 = vld [vmem:[%s10744_s1 + $0x11a0] sm:$0xff]  }
 0x20e   :  { %8066 = vmatpush3.bf16.msra.mxu1 %v8691_v57  ;;  %v8730_v57 = vld [vmem:[%s10744_s1 + $0x1120] sm:$0xff]  }
 0x20f   :  { %8067 = vmatprep.subr.bf16.mxu1 %v8693_v59  ;;  %v8732_v59 = vld [vmem:[%s10744_s1 + $0x1168] sm:$0xff]  }
 0x210   :  { %8046 = vmatpush3.bf16.msra.mxu0 %v8694_v60  ;;  %v8733_v60 = vld [vmem:[%s10744_s1 + $0x11e8] sm:$0xff]  }
 0x211   :  { %8047 = vmatprep.subr.bf16.mxu0 %v8696_v62  ;;  %v8735_v62 = vld [vmem:[%s10744_s1 + $0x11a8] sm:$0xff]  }
 0x212   :  { %8068 = vmatpush3.bf16.msra.mxu1 %v8695_v61  ;;  %v8734_v61 = vld [vmem:[%s10744_s1 + $0x1128] sm:$0xff]  }
 0x213   :  { %8069 = vmatprep.subr.bf16.mxu1 %v8697_v63  ;;  %v8736_v63 = vld [vmem:[%s10744_s1 + $0x1170] sm:$0xff]  }
 0x214   :  { %8048 = vmatpush3.bf16.msra.mxu0 %v8698_v0 }
 0x215   :  { %8049 = vmatprep.subr.bf16.mxu0 %v8700_v2 }
 0x216   :  { %8070 = vmatpush3.bf16.msra.mxu1 %v8699_v1  ;;  %v7747_v7 = vpop.f32.mrb[36].mxu0  ;;  %v8737_v1 = vld [vmem:[%s10744_s1 + $0x11f0] sm:$0xff]  }
 0x217   :  { %v7748_v9 = vpop.f32.mrb[37].mxu0  ;;  %8071 = vmatprep.subr.bf16.mxu1 %v8701_v3  ;;  %v8738_v3 = vld [vmem:[%s10744_s1 + $0x1130] sm:$0xff]  }
 0x218   :  { %v7769_v11 = vpop.f32.mrb[36].mxu1  ;;  %v7749_v12 = vadd.f32 %v7748_v9, %v7747_v7  ;;  %v7750_v13 = vpop.f32.mrb[38].mxu0  ;;  %8050 = vmatpush3.bf16.msra.mxu0 %v8702_v4  ;;  %v8739_v7 = vld [vmem:[%s10744_s1 + $0x11b0] sm:$0xff]  }
 0x219   :  { %v7770_v15 = vpop.f32.mrb[37].mxu1  ;;  %v7751_v16 = vpop.f32.mrb[39].mxu0  ;;  %8051 = vmatprep.subr.bf16.mxu0 %v8704_v6 }
 0x21a   :  { %v5923_v19 = vadd.f32 %v7749_v12, %v10487_v42  ;;  %v7771_v20 = vadd.f32 %v7770_v15, %v7769_v11  ;;  %v7772_v21 = vpop.f32.mrb[38].mxu1  ;;  %8072 = vmatpush3.bf16.msra.mxu1 %v8703_v5  ;;  %v8717_v42 = vld [vmem:[%s10744_s1 + $0x11c8] sm:$0xff]   ;;  %v8742_v16 = vld [vmem:[%s10744_s1 + $0x1138] sm:$0xff]  }
 0x21b   :  { %v7773_v23 = vpop.f32.mrb[39].mxu1  ;;  %8073 = vmatprep.subr.bf16.mxu1 %v8705_v8  ;;  %v8740_v8 = vld [vmem:[%s10744_s1 + $0x1178] sm:$0xff]  }
 0x21c   :  { %v10591_v25 = vadd.f32 %v7771_v20, %v5923_v19  ;;  %8052 = vmatpush3.bf16.msra.mxu0 %v8706_v10  ;;  %v1621_v19 = vrot.slane %v10605_v33, %v8920_v41 }
 0x21d   :  { %8053 = vmatprep.subr.bf16.mxu0 %v8708_v17 }
 0x21e   :  { %8074 = vmatpush3.bf16.msra.mxu1 %v8707_v14  ;;  %v8741_v14 = vld [vmem:[%s10744_s1 + $0x11f8] sm:$0xff]   ;;  %v1637_v20 = vcombine.high %v1621_v19, %v1621_v19 }
 0x21f   :  { %8075 = vmatprep.subr.bf16.mxu1 %v8709_v18  ;;  %v8743_v18 = vld [vmem:[%s10744_s1 + $0x11b8] sm:$0xff]  }
 0x220   :  { %8054 = vmatpush3.bf16.msra.mxu0 %v8710_v22 }
 0x221   :  { %8083 = vmatprep.subr.bf16.mxu0 %v8712_v29 }
 0x222   :  { %8076 = vmatpush3.bf16.msra.mxu1 %v8711_v26 }
 0x223   :  { %6481 = vmatmul.mubr.bf16.vlgmr.msra.gmra.mrb[64].mxu0 %v1614_v31  ;;  %8105 = vmatprep.subr.bf16.mxu1 %v8713_v32 }
 0x224   :  { %8084 = vmatpush3.bf16.msra.mxu0 %v8714_v34  ;;  %6560 = vmatprep.mubr.bf16.mxu0 %v1635_v43 }
 0x225   :  { %6521 = vmatmul.mubr.bf16.vlgmr.msra.gmra.mrb[64].mxu1 %v1636_v38  ;;  %8085 = vmatprep.subr.bf16.mxu0 %v8716_v39 }
 0x226   :  { %8106 = vmatpush3.bf16.msra.mxu1 %v8715_v36  ;;  %6600 = vmatprep.mubr.bf16.mxu1 %v1639_v46 }
 0x227   :  { %8107 = vmatprep.subr.bf16.mxu1 %v8717_v42 }
 0x228   :  { %8086 = vmatpush3.bf16.msra.mxu0 %v8718_v44 }
 0x229   :  { %8087 = vmatprep.subr.bf16.mxu0 %v8720_v47 }
 0x22a   :  { %8108 = vmatpush3.bf16.msra.mxu1 %v8719_v45 }
 0x22b   :  { %8109 = vmatprep.subr.bf16.mxu1 %v8721_v48 }
 0x22c   :  { %8088 = vmatpush3.bf16.msra.mxu0 %v8722_v49 }
 0x22d   :  { %8089 = vmatprep.subr.bf16.mxu0 %v8724_v51 }
 0x22e   :  { %8110 = vmatpush3.bf16.msra.mxu1 %v8723_v50 }
 0x22f   :  { %8111 = vmatprep.subr.bf16.mxu1 %v8725_v52 }
 0x230   :  { %8090 = vmatpush3.bf16.msra.mxu0 %v8726_v53 }
 0x231   :  { %8091 = vmatprep.subr.bf16.mxu0 %v8728_v55 }
 0x232   :  { %8112 = vmatpush3.bf16.msra.mxu1 %v8727_v54 }
 0x233   :  { %8113 = vmatprep.subr.bf16.mxu1 %v8729_v56 }
 0x234   :  { %8092 = vmatpush3.bf16.msra.mxu0 %v8730_v57 }
 0x235   :  { %8093 = vmatprep.subr.bf16.mxu0 %v8732_v59 }
 0x236   :  { %8114 = vmatpush3.bf16.msra.mxu1 %v8731_v58  ;;  %v7791_v0 = vpop.f32.mrb[40].mxu0 }
 0x237   :  { %v7792_v2 = vpop.f32.mrb[41].mxu0  ;;  %8115 = vmatprep.subr.bf16.mxu1 %v8733_v60 }
 0x238   :  { %v7813_v4 = vpop.f32.mrb[40].mxu1  ;;  %v7793_v5 = vadd.f32 %v7792_v2, %v7791_v0  ;;  %v7794_v6 = vpop.f32.mrb[42].mxu0  ;;  %8094 = vmatpush3.bf16.msra.mxu0 %v8734_v61 }
 0x239   :  { %v7814_v9 = vpop.f32.mrb[41].mxu1  ;;  %v7795_v10 = vpop.f32.mrb[43].mxu0  ;;  %8095 = vmatprep.subr.bf16.mxu0 %v8736_v63 }
 0x23a   :  { %v6003_v11 = vadd.f32 %v7793_v5, %v10591_v25  ;;  %v7815_v12 = vadd.f32 %v7814_v9, %v7813_v4  ;;  %v7816_v13 = vpop.f32.mrb[42].mxu1  ;;  %8116 = vmatpush3.bf16.msra.mxu1 %v8735_v62 }
 0x23b   :  { %v7817_v15 = vpop.f32.mrb[43].mxu1  ;;  %8117 = vmatprep.subr.bf16.mxu1 %v8737_v1 }
 0x23c   :  { %v6043_v17 = vadd.f32 %v7815_v12, %v6003_v11  ;;  %8096 = vmatpush3.bf16.msra.mxu0 %v8738_v3 }
 0x23d   :  { %8097 = vmatprep.subr.bf16.mxu0 %v8740_v8 }
 0x23e   :  { %8118 = vmatpush3.bf16.msra.mxu1 %v8739_v7 }
 0x23f   :  { %8119 = vmatprep.subr.bf16.mxu1 %v8741_v14 }
 0x240   :  { %8098 = vmatpush3.bf16.msra.mxu0 %v8742_v16 }
 0x241   :  { %10 = vsyncpa [#allocation3], 0  ;;  %v8745_v45 = vld [vmem:[%s10746_s3] sm:$0xff]   ;;  %v8782_v46 = vmov 0.0   ;;  %v8746_v47 = vld [vmem:[%s10746_s3 + $0x8] sm:$0xff]   ;;  %vm8783_vm0 = vmmov 0  }
 0x242   :  { %8120 = vmatpush3.bf16.msra.mxu1 %v8743_v18  ;;  %8136 = vmatprep.subr.bf16.mxu0 %v8782_v46  ;;  %v8747_v48 = vld [vmem:[%s10746_s3 + $0x10] sm:$0xff]   ;;  %v8748_v49 = vld [vmem:[%s10746_s3 + $0x18] sm:$0xff]   ;;  %v8749_v50 = vld [vmem:[%s10746_s3 + $0x20] sm:$0xff]   ;;  %vm6721_vm1 = vcmask 1041408   ;;  %s8784_s27 = smov [#allocation2]  }
 0x243   :  { %6561 = vmatmul.mubr.bf16.vlgmr.msra.gmra.mrb[68].mxu0 %v1621_v19  ;;  %v8750_v53 = vld [vmem:[%s10746_s3 + $0x28] sm:$0xff]   ;;  %v8751_v63 = vld [vmem:[%s10746_s3 + $0x30] sm:$0xff]   ;;  %v8752_v1 = vld [vmem:[%s10746_s3 + $0x38] sm:$0xff]  }
 0x244   :  { %8137 = vmatpush3.bf16.msra.mxu0 %v8745_v45  ;;  %8152 = vmatprep.mubr.msk.bf16.mxu0 %vm8783_vm0, %v8782_v46 }
 0x245   :  { %6601 = vmatmul.mubr.bf16.vlgmr.msra.gmra.mrb[68].mxu1 %v1637_v20  ;;  %8138 = vmatprep.subr.bf16.mxu0 %v8782_v46 }
 0x248   :  { %8139 = vmatpush3.bf16.msra.mxu0 %v8746_v47 }
 0x249   :  { %8140 = vmatprep.subr.bf16.mxu0 %v8782_v46 }
 0x24c   :  { %8141 = vmatpush3.bf16.msra.mxu0 %v8747_v48 }
 0x24d   :  { %8142 = vmatprep.subr.bf16.mxu0 %v8782_v46 }
 0x250   :  { %8143 = vmatpush3.bf16.msra.mxu0 %v8748_v49 }
 0x251   :  { %8144 = vmatprep.subr.bf16.mxu0 %v8782_v46 }
 0x254   :  { %8145 = vmatpush3.bf16.msra.mxu0 %v8749_v50 }
 0x255   :  { %8146 = vmatprep.subr.bf16.mxu0 %v8782_v46 }
 0x256   :  { %v7835_v21 = vpop.f32.mrb[44].mxu0 }
 0x257   :  { %v7836_v22 = vpop.f32.mrb[45].mxu0 }
 0x258   :  { %v7857_v23 = vpop.f32.mrb[44].mxu1  ;;  %v7837_v24 = vadd.f32 %v7836_v22, %v7835_v21  ;;  %v7838_v25 = vpop.f32.mrb[46].mxu0  ;;  %8147 = vmatpush3.bf16.msra.mxu0 %v8750_v53 }
 0x259   :  { %v7858_v26 = vpop.f32.mrb[45].mxu1  ;;  %v7839_v27 = vpop.f32.mrb[47].mxu0  ;;  %8148 = vmatprep.subr.bf16.mxu0 %v8782_v46 }
 0x25a   :  { %v6083_v28 = vadd.f32 %v7837_v24, %v6043_v17  ;;  %v7859_v29 = vadd.f32 %v7858_v26, %v7857_v23  ;;  %v7860_v30 = vpop.f32.mrb[46].mxu1 }
 0x25b   :  { %v7861_v31 = vpop.f32.mrb[47].mxu1 }
 0x25c   :  { %v6123_v41 = vadd.f32 %v7859_v29, %v6083_v28  ;;  %8149 = vmatpush3.bf16.msra.mxu0 %v8751_v63 }
 0x25d   :  { %8150 = vmatprep.subr.bf16.mxu0 %v8782_v46 }
 0x260   :  { %8151 = vmatpush3.bf16.msra.mxu0 %v8752_v1 }
 0x276   :  { %v7879_v32 = vpop.f32.mrb[48].mxu0 }
 0x277   :  { %v7880_v33 = vpop.f32.mrb[49].mxu0 }
 0x278   :  { %v7901_v34 = vpop.f32.mrb[48].mxu1  ;;  %v7881_v35 = vadd.f32 %v7880_v33, %v7879_v32  ;;  %v7882_v36 = vpop.f32.mrb[50].mxu0 }
 0x279   :  { %v7902_v37 = vpop.f32.mrb[49].mxu1  ;;  %v7883_v38 = vpop.f32.mrb[51].mxu0 }
 0x27a   :  { %v6163_v39 = vadd.f32 %v7881_v35, %v6123_v41  ;;  %v7903_v40 = vadd.f32 %v7902_v37, %v7901_v34  ;;  %v7904_v42 = vpop.f32.mrb[50].mxu1 }
 0x27b   :  { %v7905_v43 = vpop.f32.mrb[51].mxu1 }
 0x27c   :  { %v6203_v44 = vadd.f32 %v7903_v40, %v6163_v39 }
 0x296   :  { %v7923_v51 = vpop.f32.mrb[52].mxu0 }
 0x297   :  { %v7924_v52 = vpop.f32.mrb[53].mxu0 }
 0x298   :  { %v7945_v54 = vpop.f32.mrb[52].mxu1  ;;  %v7925_v55 = vadd.f32 %v7924_v52, %v7923_v51  ;;  %v7926_v56 = vpop.f32.mrb[54].mxu0  ;;  %v7326_v52 = vld [vmem:[%s10747_s4] ss:$0 sm:$0xff]  ;;  %s6741_s4 = sshll.u32 %s8784_s27, 4  ;;  %s6742_s4 = int_to_ptr.vmem [resolvable:$true] %s6741_s4 }
 0x299   :  { %v7946_v57 = vpop.f32.mrb[53].mxu1  ;;  %v7927_v58 = vpop.f32.mrb[55].mxu0  ;;  %s8757_s28 = scalar_lea.vmem %s6742_s4, 32  ;;  %p8762_p1 = scmp.lt.s32.totalorder %s6742_s4, %s6742_s4 }
 0x29a   :  { %v6243_v59 = vadd.f32 %v7925_v55, %v6203_v44  ;;  %v7947_v60 = vadd.f32 %v7946_v57, %v7945_v54  ;;  %v7948_v61 = vpop.f32.mrb[54].mxu1  ;;  %p8758_p0 = scmp.ne.s32.totalorder %s6742_s4, %s8757_s28  ;;  %p8763_p2 = scmp.lt.s32.totalorder %s8757_s28, %s8757_s28 }
 0x29b   :  { %v7949_v62 = vpop.f32.mrb[55].mxu1 }
 0x29c   :  { %v6283_v0 = vadd.f32 %v7947_v60, %v6243_v59  ;;  %p8764_p3 = por %p8763_p2, %p8762_p1 }
 0x29e   :  { %p8765_p4 = pnand %p8764_p3, %p8758_p0 }
 0x2b6   :  { %v7967_v2 = vpop.f32.mrb[56].mxu0 }
 0x2b7   :  { %v7968_v3 = vpop.f32.mrb[57].mxu0 }
 0x2b8   :  { %v7989_v4 = vpop.f32.mrb[56].mxu1  ;;  %v7969_v5 = vadd.f32 %v7968_v3, %v7967_v2  ;;  %v7970_v6 = vpop.f32.mrb[58].mxu0 }
 0x2b9   :  { %v7990_v7 = vpop.f32.mrb[57].mxu1  ;;  %v7971_v8 = vpop.f32.mrb[59].mxu0 }
 0x2ba   :  { %v6323_v9 = vadd.f32 %v7969_v5, %v6283_v0  ;;  %v7991_v10 = vadd.f32 %v7990_v7, %v7989_v4  ;;  %v7992_v11 = vpop.f32.mrb[58].mxu1 }
 0x2bb   :  { %v7993_v12 = vpop.f32.mrb[59].mxu1 }
 0x2bc   :  { %v6363_v13 = vadd.f32 %v7991_v10, %v6323_v9 }
 0x2d6   :  { %v8011_v14 = vpop.f32.mrb[60].mxu0 }
 0x2d7   :  { %v8012_v15 = vpop.f32.mrb[61].mxu0 }
 0x2d8   :  { %v8033_v16 = vpop.f32.mrb[60].mxu1  ;;  %v8013_v17 = vadd.f32 %v8012_v15, %v8011_v14  ;;  %v8014_v18 = vpop.f32.mrb[62].mxu0 }
 0x2d9   :  { %v8034_v19 = vpop.f32.mrb[61].mxu1  ;;  %v8015_v20 = vpop.f32.mrb[63].mxu0 }
 0x2da   :  { %v6403_v21 = vadd.f32 %v8013_v17, %v6363_v13  ;;  %v8035_v22 = vadd.f32 %v8034_v19, %v8033_v16  ;;  %v8036_v23 = vpop.f32.mrb[62].mxu1 }
 0x2db   :  { %v8037_v24 = vpop.f32.mrb[63].mxu1 }
 0x2dc   :  { %v6443_v25 = vadd.f32 %v8035_v22, %v6403_v21 }
 0x2f6   :  { %v8055_v26 = vpop.f32.mrb[64].mxu0 }
 0x2f7   :  { %v8056_v27 = vpop.f32.mrb[65].mxu0 }
 0x2f8   :  { %v8077_v28 = vpop.f32.mrb[64].mxu1  ;;  %v8057_v29 = vadd.f32 %v8056_v27, %v8055_v26  ;;  %v8058_v30 = vpop.f32.mrb[66].mxu0 }
 0x2f9   :  { %v8078_v31 = vpop.f32.mrb[65].mxu1  ;;  %v8059_v41 = vpop.f32.mrb[67].mxu0 }
 0x2fa   :  { %v6483_v32 = vadd.f32 %v8057_v29, %v6443_v25  ;;  %v8079_v33 = vadd.f32 %v8078_v31, %v8077_v28  ;;  %v8080_v34 = vpop.f32.mrb[66].mxu1 }
 0x2fb   :  { %v8081_v35 = vpop.f32.mrb[67].mxu1 }
 0x2fc   :  { %v6523_v36 = vadd.f32 %v8079_v33, %v6483_v32 }
 0x316   :  { %v8099_v37 = vpop.f32.mrb[68].mxu0 }
 0x317   :  { %v8100_v38 = vpop.f32.mrb[69].mxu0 }
 0x318   :  { %v8121_v39 = vpop.f32.mrb[68].mxu1  ;;  %v8101_v40 = vadd.f32 %v8100_v38, %v8099_v37  ;;  %v8102_v42 = vpop.f32.mrb[70].mxu0 }
 0x319   :  { %v8122_v43 = vpop.f32.mrb[69].mxu1  ;;  %v8103_v44 = vpop.f32.mrb[71].mxu0 }
 0x31a   :  { %v6563_v45 = vadd.f32 %v8101_v40, %v6523_v36  ;;  %v8123_v46 = vadd.f32 %v8122_v43, %v8121_v39  ;;  %v8124_v47 = vpop.f32.mrb[70].mxu1 }
 0x31b   :  { %v8125_v48 = vpop.f32.mrb[71].mxu1 }
 0x31c   :  { %v6603_v49 = vadd.f32 %v8123_v46, %v6563_v45 }
 0x31e   :  { %v6608_v50 = vmax.f32 %v6603_v49, 0.0 }
 0x320   :  { %v6609_v51 = vpack.c.bf16 %v6608_v50, %v6608_v50 }
 0x322   :  { %8153 = vmatmul.mubr.bf16.vlgmr.msra.gmra.mrb[72].mxu0 %v6609_v51 }
 0x3f5   :  { %v6715_v53 = vpop.f32.mrb[72].mxu0 }
 0x3f6   :  { %v6716_v54 = vadd.f32 %v7326_v52, %v6715_v53  ;;  %v8154_v55 = vpop.f32.mrb[73].mxu0 }
 0x3f7   :  { %v6718_v56 = vpop.f32.mrb[74].mxu0 }
 0x3f8   :  { %v8155_v57 = vpop.f32.mrb[75].mxu0  ;;  %v6722_v58 = vsel %vm6721_vm1, %v6716_v54, -inf }
 0x3f9   :  { %6723 = vmax.xlane.f32.xlu0 %v6722_v58 }
 0x486   :  { %v6724_v59 = vpop.xlane.xlu0 %6723 }
 0x487   :  { %v6725_v60 = vsub.f32 %v6716_v54, %v6724_v59 }
 0x489   :  { %v6726_v61 = vmul.f32 1.442695, %v6725_v60 }
 0x48b   :  { %8753 = vpow2.f32 %v6726_v61 }
 0x495   :  { %v8754_v62 = vpop.eup %8753 }
 0x496   :  { %v6728_v63 = vsel %vm6721_vm1, %v8754_v62, 0.0 }
 0x497   :  { %6729 = vadd.xlane.f32.xlu0 %v6728_v63 }
 0x524   :  { %v6730_v0 = vpop.xlane.xlu0 %6729 }
 0x525   :  { %8755 = vlog2.f32 %v6730_v0 }
 0x52f   :  { %v8756_v1 = vpop.eup %8755 }
 0x530   :  { %v6732_v2 = vmul.f32 0.6931472, %v8756_v1 }
 0x532   :  { %v6733_v3 = vsub.f32 %v6725_v60, %v6732_v2 }
 0x534   :  { %6734 = vst [vmem:[#allocation2] sm:$0x3] %v6733_v3 }
 0x535   :  { %8768 = shalt.err (!%p8765_p4)
}
 0x536   :  { %s8769_s2 = scalar_lea.hbm %s10748_s5, 32 }
 0x537   :  { %p8770_p5 = scmp.ne.s32.totalorder %s10748_s5, %s8769_s2  ;;  %p8773_p6 = scmp.lt.u32.totalorder %s8769_s2, %s10748_s5 }
 0x539   :  { %p8775_p7 = pnand %p8773_p6, %p8770_p5 }
 0x53b   :  { %8778 = shalt.err (!%p8775_p7)
}
 0x53c   :  { %6744 = dma.vmem_to_hbm [thread:$0]  %s6742_s4, 32, %s10748_s5, [#allocation3]  }
 0x53d   :  { %8779 = dma.done.wait [#allocation3], 32  }
 0x53e   :  { %8780 = vsyncadd [#allocation3], 4294967264 }
 0x53f   :  { %6748 = vsyncpa [#allocation3], 1 }

</bundles_post_ra>
